<compile_context>
chip_gen: v7x
topology: tpu7x:2x2x1
jax: 0.10.0
libtpu: 0.0.40
codegen_flags: <defaults>
</compile_context>

<pallas_src>
import functools

import numpy as np
import jax
import jax.numpy as jnp
from jax.experimental import pallas as pl
from jax.experimental.pallas import tpu as pltpu


# -----------------------------------------------------------------------------
# Fused forward kernel (one grid step = one batch element).
# -----------------------------------------------------------------------------
def _fused_kernel(x_ref, dww_ref, dwb_ref, pwm_ref, pwb_ref, a1_ref, a2_ref,
                  hw_ref, hb_ref, w1_ref, b1_ref, w2_ref, b2_ref,
                  o_ref, pad_ref, *, H0, W, C):
    WC = W * C
    NEG = jnp.float32(-jnp.inf)

    def dw_block(x, blk, H):
        """Conv2d(C,C,5,'same',groups=C) -> ReLU -> BN -> MaxPool(3,(2,1),(1,1))."""
        Ho = (H - 1) // 2 + 1
        w = dww_ref[blk]                          # (25, WC) taps, pre-tiled over W
        bst = dwb_ref[blk]                        # (3, WC): bias / bn scale / bn shift

        # 5x5 depthwise conv via 25 shift-MACs on a zero-padded (pad=2) scratch.
        pad_ref[...] = jnp.zeros(pad_ref.shape, jnp.float32)
        pad_ref[2:2 + H, 2 * C:2 * C + WC] = x
        acc = jnp.zeros((H, WC), jnp.float32)
        for di in range(5):
            rows = pad_ref[di:di + H, :]          # (H, (W+4)*C)
            for dj in range(5):
                k = 5 * di + dj
                acc = acc + rows[:, dj * C:dj * C + WC] * w[k:k + 1, :]
        y = jnp.maximum(acc + bst[0:1, :], 0.0)   # conv bias + ReLU
        y = y * bst[1:2, :] + bst[2:3, :]         # BatchNorm (eval, folded)

        # MaxPool, W direction (kernel 3, stride 1, pad 1, -inf padding).
        pad_ref[0:H, 0:C] = jnp.full((H, C), NEG, jnp.float32)
        pad_ref[0:H, C:C + WC] = y
        pad_ref[0:H, C + WC:2 * C + WC] = jnp.full((H, C), NEG, jnp.float32)
        wm = jnp.maximum(
            jnp.maximum(pad_ref[0:H, 0:WC], pad_ref[0:H, C:C + WC]),
            pad_ref[0:H, 2 * C:2 * C + WC])

        # MaxPool, H direction (kernel 3, stride 2, pad 1): three shifted row
        # maxima, picked with stride-2 reads.
        pad_ref[0:1, 0:WC] = jnp.full((1, WC), NEG, jnp.float32)
        pad_ref[1:1 + H, 0:WC] = wm
        pad_ref[1 + H:2 + H, 0:WC] = jnp.full((1, WC), NEG, jnp.float32)
        out = jnp.maximum(
            jnp.maximum(pad_ref[pl.ds(0, Ho, stride=2), 0:WC],
                        pad_ref[pl.ds(1, Ho, stride=2), 0:WC]),
            pad_ref[pl.ds(2, Ho, stride=2), 0:WC])
        return out, Ho

    def se_block(x, blk):
        """Global avg pool -> Linear -> ReLU -> Linear -> Sigmoid -> channel scale."""
        xsum = jnp.sum(x, axis=0, keepdims=True)                                   # (1, WC)
        h1 = jnp.maximum(
            jnp.dot(xsum, a1_ref[blk], preferred_element_type=jnp.float32), 0.0)   # (1, C)
        g = jax.nn.sigmoid(
            jnp.dot(h1, a2_ref[blk], preferred_element_type=jnp.float32))          # (1, WC)
        return x * g

    def pw_block(x, blk, H):
        """Conv2d(C,C,3,'same',groups=1) -> ReLU -> BN via 3 banded (WC,WC) matmuls."""
        bst = pwb_ref[blk]                        # (3, WC)
        pad_ref[...] = jnp.zeros(pad_ref.shape, jnp.float32)
        pad_ref[1:1 + H, 0:WC] = x
        acc = jnp.zeros((H, WC), jnp.float32)
        for di in range(3):
            acc = acc + jnp.dot(pad_ref[di:di + H, 0:WC], pwm_ref[blk, di],
                                preferred_element_type=jnp.float32)
        y = jnp.maximum(acc + bst[0:1, :], 0.0)
        return y * bst[1:2, :] + bst[2:3, :]

    x = x_ref[0].astype(jnp.float32)              # (H0, WC)
    H = H0
    x, H = dw_block(x, 0, H)
    x, H = dw_block(x, 1, H)
    x, H = dw_block(x, 2, H)
    x = se_block(x, 0)
    x = pw_block(x, 0, H)
    x, H = dw_block(x, 3, H)
    x = se_block(x, 1)
    x = pw_block(x, 1, H)

    # Head: relu(fc over H) -> (flatten perm folded into fc1) -> fc1 -> ReLU -> fc2.
    t = jnp.maximum(
        jnp.sum(x * hw_ref[...], axis=0, keepdims=True) + hb_ref[...], 0.0)        # (1, WC)
    h = jnp.maximum(
        jnp.dot(t, w1_ref[...], preferred_element_type=jnp.float32) + b1_ref[...], 0.0)
    y = jnp.dot(h, w2_ref[...], preferred_element_type=jnp.float32) + b2_ref[...]
    o_ref[0] = y.astype(o_ref.dtype)


# -----------------------------------------------------------------------------
# Parameter initialization (deterministic, synthetic) + pre-transforms for the
# folded (H, W*C) layout.  All of this is one-time, outside the kernel.
# -----------------------------------------------------------------------------
def _bn_fold(key, C, eps=1e-5):
    k1, k2, k3, k4 = jax.random.split(key, 4)
    gamma = 1.0 + 0.1 * jax.random.normal(k1, (C,), jnp.float32)
    beta = 0.1 * jax.random.normal(k2, (C,), jnp.float32)
    mean = 0.1 * jax.random.normal(k3, (C,), jnp.float32)
    var = 1.0 + 0.5 * jax.random.uniform(k4, (C,), jnp.float32)
    scale = gamma / jnp.sqrt(var + eps)
    shift = beta - mean * scale
    return scale, shift


def init_params(key, C, H0, W, nclass):
    WC = W * C
    keys = jax.random.split(key, 32)
    ki = iter(keys)

    def tile_w(v):                                # (C,) -> (WC,), folded index = w*C + c
        return jnp.tile(v, (W,))

    # H after each of the four depthwise blocks (MaxPool stride (2,1), pad 1).
    hs, h = [], H0
    for _ in range(4):
        h = (h - 1) // 2 + 1
        hs.append(h)
    H_se1, H_se2, H_final = hs[2], hs[3], hs[3]

    # depthwise blocks --------------------------------------------------------
    dw_w, dw_bst = [], []
    for _ in range(4):
        w = 0.1 * jax.random.normal(next(ki), (C, 1, 5, 5), jnp.float32)   # torch (C,1,5,5)
        b = 0.1 * jax.random.normal(next(ki), (C,), jnp.float32)
        scale, shift = _bn_fold(next(ki), C)
        taps = jnp.transpose(w[:, 0, :, :], (1, 2, 0)).reshape(25, C)      # [5*di+dj, c]
        dw_w.append(jnp.tile(taps, (1, W)))                                # (25, WC)
        dw_bst.append(jnp.stack([tile_w(b), tile_w(scale), tile_w(shift)]))
    dw_w = jnp.stack(dw_w)                        # (4, 25, WC)
    dw_bst = jnp.stack(dw_bst)                    # (4, 3, WC)

    # pointwise blocks: 3 banded (WC, WC) matrices per block -------------------
    pw_m, pw_bst = [], []
    for _ in range(2):
        w = 0.1 * jax.random.normal(next(ki), (C, C, 3, 3), jnp.float32)   # torch (co,ci,kh,kw)
        b = 0.1 * jax.random.normal(next(ki), (C,), jnp.float32)
        scale, shift = _bn_fold(next(ki), C)
        wn = np.asarray(w)
        m = np.zeros((3, WC, WC), np.float32)
        for di in range(3):
            for wi in range(W):
                for wo in range(W):
                    dj = wi - wo + 1
                    if 0 <= dj < 3:
                        m[di, wi * C:(wi + 1) * C, wo * C:(wo + 1) * C] = wn[:, :, di, dj].T
        pw_m.append(jnp.asarray(m))
        pw_bst.append(jnp.stack([tile_w(b), tile_w(scale), tile_w(shift)]))
    pw_m = jnp.stack(pw_m)                        # (2, 3, WC, WC)
    pw_bst = jnp.stack(pw_bst)                    # (2, 3, WC)

    # SE blocks: fold channel select/broadcast + 1/(H*W) into the two linears --
    sel = np.zeros((WC, C), np.float32)           # sel[w*C+c, c] = 1
    for wpos in range(W):
        for c in range(C):
            sel[wpos * C + c, c] = 1.0
    sel = jnp.asarray(sel)
    se_a1, se_a2 = [], []
    for h_se in (H_se1, H_se2):
        w1 = 0.3 * jax.random.normal(next(ki), (C, C), jnp.float32)        # Linear(C,C) (out,in)
        w2 = 0.3 * jax.random.normal(next(ki), (C, C), jnp.float32)
        se_a1.append((sel @ w1.T) / float(h_se * W))                       # (WC, C)
        se_a2.append(w2.T @ sel.T)                                         # (C, WC)
    se_a1 = jnp.stack(se_a1)
    se_a2 = jnp.stack(se_a2)

    # head: fc = Linear(H_final, 1) over H (weights shared across C and W) ------
    fw = 0.5 * jax.random.normal(next(ki), (1, H_final), jnp.float32)
    fb = 0.1 * jax.random.normal(next(ki), (1,), jnp.float32)
    head_w = jnp.broadcast_to(jnp.reshape(fw, (H_final, 1)), (H_final, WC)) + 0.0
    head_b = jnp.full((1, WC), fb[0], jnp.float32)

    # MLP head: fc1 (torch flatten order c*W+w folded into the rows), fc2 -------
    feat = C * W
    w1 = 0.1 * jax.random.normal(next(ki), (64, feat), jnp.float32)
    b1 = 0.1 * jax.random.normal(next(ki), (64,), jnp.float32)
    w2 = 0.1 * jax.random.normal(next(ki), (nclass, 64), jnp.float32)
    b2 = 0.1 * jax.random.normal(next(ki), (nclass,), jnp.float32)
    perm = np.array([c * W + wpos for wpos in range(W) for c in range(C)], np.int32)
    w1p = jnp.asarray(np.asarray(w1.T)[perm])     # (WC, 64), rows in folded order w*C+c

    return dict(dw_w=dw_w, dw_bst=dw_bst, pw_m=pw_m, pw_bst=pw_bst,
                se_a1=se_a1, se_a2=se_a2, head_w=head_w, head_b=head_b,
                w1p=w1p, b1=b1.reshape(1, 64), w2t=w2.T, b2=b2.reshape(1, nclass))


# -----------------------------------------------------------------------------
# Wrapper: one fused pallas_call, grid over batch.
# -----------------------------------------------------------------------------
def _const_index_map(ndim):
    return lambda b: (0,) * ndim


def cnn_freq_forward(x_nchw, params):
    """x_nchw: (B, C, H, W) exactly like the PyTorch module input."""
    B, C, H0, W = x_nchw.shape
    WC = W * C
    nclass = params["b2"].shape[-1]

    # One-time layout plumbing: NCHW -> folded (B, H, W*C).
    x_f = jnp.transpose(x_nchw, (0, 2, 3, 1)).reshape(B, H0, WC).astype(jnp.float32)

    weights = (params["dw_w"], params["dw_bst"], params["pw_m"], params["pw_bst"],
               params["se_a1"], params["se_a2"], params["head_w"], params["head_b"],
               params["w1p"], params["b1"], params["w2t"], params["b2"])

    in_specs = [pl.BlockSpec((1, H0, WC), lambda b: (b, 0, 0))]
    in_specs += [pl.BlockSpec(wt.shape, _const_index_map(wt.ndim)) for wt in weights]

    kernel = functools.partial(_fused_kernel, H0=H0, W=W, C=C)
    out = pl.pallas_call(
        kernel,
        out_shape=jax.ShapeDtypeStruct((B, 1, nclass), jnp.float32),
        grid=(B,),
        in_specs=in_specs,
        out_specs=pl.BlockSpec((1, 1, nclass), lambda b: (b, 0, 0)),
        scratch_shapes=[pltpu.VMEM((H0 + 4, (W + 4) * C), jnp.float32)],
        compiler_params=pltpu.CompilerParams(dimension_semantics=("parallel",)),
    )(x_f, *weights)
    return out.reshape(B, nclass)


if __name__ == "__main__":
    B, C, H, W = 2, 4, 16, 16          # input_shape = (2, 4, 16, 16)
    nclass = 5

    key = jax.random.PRNGKey(0)
    kx, kp = jax.random.split(key)
    x = jax.random.normal(kx, (B, C, H, W), jnp.float32)
    params = init_params(kp, C, H, W, nclass)

    out = jax.block_until_ready(cnn_freq_forward(x, params))
    assert out.shape == (B, nclass), out.shape
    assert bool(jnp.all(jnp.isfinite(out)))
    print("KERNEL_OK")
</pallas_src>

<mosaic_0001>
module attributes {stable_mosaic.version = 11 : i64} {
  func.func @_fused_kernel(%arg0: i32, %arg1: memref<1x16x64xf32, #tpu.memory_space<vmem>>, %arg2: memref<4x25x64xf32, #tpu.memory_space<vmem>>, %arg3: memref<4x3x64xf32, #tpu.memory_space<vmem>>, %arg4: memref<2x3x64x64xf32, #tpu.memory_space<vmem>>, %arg5: memref<2x3x64xf32, #tpu.memory_space<vmem>>, %arg6: memref<2x64x4xf32, #tpu.memory_space<vmem>>, %arg7: memref<2x4x64xf32, #tpu.memory_space<vmem>>, %arg8: memref<1x64xf32, #tpu.memory_space<vmem>>, %arg9: memref<1x64xf32, #tpu.memory_space<vmem>>, %arg10: memref<64x64xf32, #tpu.memory_space<vmem>>, %arg11: memref<1x64xf32, #tpu.memory_space<vmem>>, %arg12: memref<64x5xf32, #tpu.memory_space<vmem>>, %arg13: memref<1x5xf32, #tpu.memory_space<vmem>>, %arg14: memref<1x1x5xf32, #tpu.memory_space<vmem>>, %arg15: memref<20x80xf32, #tpu.memory_space<vmem>>) attributes {dimension_semantics = [#tpu.dimension_semantics<parallel>], iteration_bounds = array<i64: 2>, scalar_prefetch = 0 : i64, scratch_operands = 1 : i64, tpu.core_type = #tpu.core_type<tc>, window_params = [{transform_indices = @transform_0, window_bounds = array<i64: 1, 16, 64>}, {pipeline_mode = #tpu.pipeline_mode<synchronous>, transform_indices = @transform_1, window_bounds = array<i64: 4, 25, 64>}, {pipeline_mode = #tpu.pipeline_mode<synchronous>, transform_indices = @transform_2, window_bounds = array<i64: 4, 3, 64>}, {pipeline_mode = #tpu.pipeline_mode<synchronous>, transform_indices = @transform_3, window_bounds = array<i64: 2, 3, 64, 64>}, {pipeline_mode = #tpu.pipeline_mode<synchronous>, transform_indices = @transform_4, window_bounds = array<i64: 2, 3, 64>}, {pipeline_mode = #tpu.pipeline_mode<synchronous>, transform_indices = @transform_5, window_bounds = array<i64: 2, 64, 4>}, {pipeline_mode = #tpu.pipeline_mode<synchronous>, transform_indices = @transform_6, window_bounds = array<i64: 2, 4, 64>}, {pipeline_mode = #tpu.pipeline_mode<synchronous>, transform_indices = @transform_7, window_bounds = array<i64: 1, 64>}, {pipeline_mode = #tpu.pipeline_mode<synchronous>, transform_indices = @transform_8, window_bounds = array<i64: 1, 64>}, {pipeline_mode = #tpu.pipeline_mode<synchronous>, transform_indices = @transform_9, window_bounds = array<i64: 64, 64>}, {pipeline_mode = #tpu.pipeline_mode<synchronous>, transform_indices = @transform_10, window_bounds = array<i64: 1, 64>}, {pipeline_mode = #tpu.pipeline_mode<synchronous>, transform_indices = @transform_11, window_bounds = array<i64: 64, 5>}, {pipeline_mode = #tpu.pipeline_mode<synchronous>, transform_indices = @transform_12, window_bounds = array<i64: 1, 5>}, {transform_indices = @transform_13, window_bounds = array<i64: 1, 1, 5>}]} {
    %c0 = arith.constant 0 : index
    %c0_0 = arith.constant 0 : index
    %c0_1 = arith.constant 0 : index
    %0 = vector.load %arg1[%c0, %c0_0, %c0_1] : memref<1x16x64xf32, #tpu.memory_space<vmem>>, vector<1x16x64xf32>
    %1 = vector.shape_cast %0 : vector<1x16x64xf32> to vector<16x64xf32>
    %c0_2 = arith.constant 0 : index
    %c0_3 = arith.constant 0 : index
    %c0_4 = arith.constant 0 : index
    %2 = vector.load %arg2[%c0_2, %c0_3, %c0_4] : memref<4x25x64xf32, #tpu.memory_space<vmem>>, vector<1x25x64xf32>
    %3 = vector.shape_cast %2 : vector<1x25x64xf32> to vector<25x64xf32>
    %c0_5 = arith.constant 0 : index
    %c0_6 = arith.constant 0 : index
    %c0_7 = arith.constant 0 : index
    %4 = vector.load %arg3[%c0_5, %c0_6, %c0_7] : memref<4x3x64xf32, #tpu.memory_space<vmem>>, vector<1x3x64xf32>
    %5 = vector.shape_cast %4 : vector<1x3x64xf32> to vector<3x64xf32>
    %cst = arith.constant 0.000000e+00 : f32
    %6 = vector.broadcast %cst : f32 to vector<20x80xf32>
    %c0_8 = arith.constant 0 : index
    %c0_9 = arith.constant 0 : index
    %7 = vector.load %arg15[%c0_8, %c0_9] : memref<20x80xf32, #tpu.memory_space<vmem>>, vector<20x80xf32>
    tpu.vector_store %arg15[%c0_8, %c0_9], %6 {strides = array<i32>} : memref<20x80xf32, #tpu.memory_space<vmem>>, vector<20x80xf32>,
    %c2 = arith.constant 2 : index
    %c8 = arith.constant 8 : index
    %8 = vector.load %arg15[%c2, %c8] : memref<20x80xf32, #tpu.memory_space<vmem>>, vector<16x64xf32>
    tpu.vector_store %arg15[%c2, %c8], %1 {strides = array<i32>} : memref<20x80xf32, #tpu.memory_space<vmem>>, vector<16x64xf32>,
    %cst_10 = arith.constant 0.000000e+00 : f32
    %9 = vector.broadcast %cst_10 : f32 to vector<16x64xf32>
    %c0_11 = arith.constant 0 : index
    %c0_12 = arith.constant 0 : index
    %10 = vector.load %arg15[%c0_11, %c0_12] : memref<20x80xf32, #tpu.memory_space<vmem>>, vector<16x80xf32>
    %11 = vector.extract_strided_slice %10 {offsets = [0, 0], sizes = [16, 64], strides = [1, 1]} : vector<16x80xf32> to vector<16x64xf32>
    %12 = vector.extract_strided_slice %3 {offsets = [0, 0], sizes = [1, 64], strides = [1, 1]} : vector<25x64xf32> to vector<1x64xf32>
    %13 = vector.broadcast %12 : vector<1x64xf32> to vector<16x64xf32>
    %14 = arith.mulf %11, %13 : vector<16x64xf32>
    %15 = arith.addf %9, %14 : vector<16x64xf32>
    %16 = vector.extract_strided_slice %10 {offsets = [0, 4], sizes = [16, 64], strides = [1, 1]} : vector<16x80xf32> to vector<16x64xf32>
    %17 = vector.extract_strided_slice %3 {offsets = [1, 0], sizes = [1, 64], strides = [1, 1]} : vector<25x64xf32> to vector<1x64xf32>
    %18 = vector.broadcast %17 : vector<1x64xf32> to vector<16x64xf32>
    %19 = arith.mulf %16, %18 : vector<16x64xf32>
    %20 = arith.addf %15, %19 : vector<16x64xf32>
    %21 = vector.extract_strided_slice %10 {offsets = [0, 8], sizes = [16, 64], strides = [1, 1]} : vector<16x80xf32> to vector<16x64xf32>
    %22 = vector.extract_strided_slice %3 {offsets = [2, 0], sizes = [1, 64], strides = [1, 1]} : vector<25x64xf32> to vector<1x64xf32>
    %23 = vector.broadcast %22 : vector<1x64xf32> to vector<16x64xf32>
    %24 = arith.mulf %21, %23 : vector<16x64xf32>
    %25 = arith.addf %20, %24 : vector<16x64xf32>
    %26 = vector.extract_strided_slice %10 {offsets = [0, 12], sizes = [16, 64], strides = [1, 1]} : vector<16x80xf32> to vector<16x64xf32>
    %27 = vector.extract_strided_slice %3 {offsets = [3, 0], sizes = [1, 64], strides = [1, 1]} : vector<25x64xf32> to vector<1x64xf32>
    %28 = vector.broadcast %27 : vector<1x64xf32> to vector<16x64xf32>
    %29 = arith.mulf %26, %28 : vector<16x64xf32>
    %30 = arith.addf %25, %29 : vector<16x64xf32>
    %31 = vector.extract_strided_slice %10 {offsets = [0, 16], sizes = [16, 64], strides = [1, 1]} : vector<16x80xf32> to vector<16x64xf32>
    %32 = vector.extract_strided_slice %3 {offsets = [4, 0], sizes = [1, 64], strides = [1, 1]} : vector<25x64xf32> to vector<1x64xf32>
    %33 = vector.broadcast %32 : vector<1x64xf32> to vector<16x64xf32>
    %34 = arith.mulf %31, %33 : vector<16x64xf32>
    %35 = arith.addf %30, %34 : vector<16x64xf32>
    %c1 = arith.constant 1 : index
    %c0_13 = arith.constant 0 : index
    %36 = vector.load %arg15[%c1, %c0_13] : memref<20x80xf32, #tpu.memory_space<vmem>>, vector<16x80xf32>
    %37 = vector.extract_strided_slice %36 {offsets = [0, 0], sizes = [16, 64], strides = [1, 1]} : vector<16x80xf32> to vector<16x64xf32>
    %38 = vector.extract_strided_slice %3 {offsets = [5, 0], sizes = [1, 64], strides = [1, 1]} : vector<25x64xf32> to vector<1x64xf32>
    %39 = vector.broadcast %38 : vector<1x64xf32> to vector<16x64xf32>
    %40 = arith.mulf %37, %39 : vector<16x64xf32>
    %41 = arith.addf %35, %40 : vector<16x64xf32>
    %42 = vector.extract_strided_slice %36 {offsets = [0, 4], sizes = [16, 64], strides = [1, 1]} : vector<16x80xf32> to vector<16x64xf32>
    %43 = vector.extract_strided_slice %3 {offsets = [6, 0], sizes = [1, 64], strides = [1, 1]} : vector<25x64xf32> to vector<1x64xf32>
    %44 = vector.broadcast %43 : vector<1x64xf32> to vector<16x64xf32>
    %45 = arith.mulf %42, %44 : vector<16x64xf32>
    %46 = arith.addf %41, %45 : vector<16x64xf32>
    %47 = vector.extract_strided_slice %36 {offsets = [0, 8], sizes = [16, 64], strides = [1, 1]} : vector<16x80xf32> to vector<16x64xf32>
    %48 = vector.extract_strided_slice %3 {offsets = [7, 0], sizes = [1, 64], strides = [1, 1]} : vector<25x64xf32> to vector<1x64xf32>
    %49 = vector.broadcast %48 : vector<1x64xf32> to vector<16x64xf32>
    %50 = arith.mulf %47, %49 : vector<16x64xf32>
    %51 = arith.addf %46, %50 : vector<16x64xf32>
    %52 = vector.extract_strided_slice %36 {offsets = [0, 12], sizes = [16, 64], strides = [1, 1]} : vector<16x80xf32> to vector<16x64xf32>
    %53 = vector.extract_strided_slice %3 {offsets = [8, 0], sizes = [1, 64], strides = [1, 1]} : vector<25x64xf32> to vector<1x64xf32>
    %54 = vector.broadcast %53 : vector<1x64xf32> to vector<16x64xf32>
    %55 = arith.mulf %52, %54 : vector<16x64xf32>
    %56 = arith.addf %51, %55 : vector<16x64xf32>
    %57 = vector.extract_strided_slice %36 {offsets = [0, 16], sizes = [16, 64], strides = [1, 1]} : vector<16x80xf32> to vector<16x64xf32>
    %58 = vector.extract_strided_slice %3 {offsets = [9, 0], sizes = [1, 64], strides = [1, 1]} : vector<25x64xf32> to vector<1x64xf32>
    %59 = vector.broadcast %58 : vector<1x64xf32> to vector<16x64xf32>
    %60 = arith.mulf %57, %59 : vector<16x64xf32>
    %61 = arith.addf %56, %60 : vector<16x64xf32>
    %c2_14 = arith.constant 2 : index
    %c0_15 = arith.constant 0 : index
    %62 = vector.load %arg15[%c2_14, %c0_15] : memref<20x80xf32, #tpu.memory_space<vmem>>, vector<16x80xf32>
    %63 = vector.extract_strided_slice %62 {offsets = [0, 0], sizes = [16, 64], strides = [1, 1]} : vector<16x80xf32> to vector<16x64xf32>
    %64 = vector.extract_strided_slice %3 {offsets = [10, 0], sizes = [1, 64], strides = [1, 1]} : vector<25x64xf32> to vector<1x64xf32>
    %65 = vector.broadcast %64 : vector<1x64xf32> to vector<16x64xf32>
    %66 = arith.mulf %63, %65 : vector<16x64xf32>
    %67 = arith.addf %61, %66 : vector<16x64xf32>
    %68 = vector.extract_strided_slice %62 {offsets = [0, 4], sizes = [16, 64], strides = [1, 1]} : vector<16x80xf32> to vector<16x64xf32>
    %69 = vector.extract_strided_slice %3 {offsets = [11, 0], sizes = [1, 64], strides = [1, 1]} : vector<25x64xf32> to vector<1x64xf32>
    %70 = vector.broadcast %69 : vector<1x64xf32> to vector<16x64xf32>
    %71 = arith.mulf %68, %70 : vector<16x64xf32>
    %72 = arith.addf %67, %71 : vector<16x64xf32>
    %73 = vector.extract_strided_slice %62 {offsets = [0, 8], sizes = [16, 64], strides = [1, 1]} : vector<16x80xf32> to vector<16x64xf32>
    %74 = vector.extract_strided_slice %3 {offsets = [12, 0], sizes = [1, 64], strides = [1, 1]} : vector<25x64xf32> to vector<1x64xf32>
    %75 = vector.broadcast %74 : vector<1x64xf32> to vector<16x64xf32>
    %76 = arith.mulf %73, %75 : vector<16x64xf32>
    %77 = arith.addf %72, %76 : vector<16x64xf32>
    %78 = vector.extract_strided_slice %62 {offsets = [0, 12], sizes = [16, 64], strides = [1, 1]} : vector<16x80xf32> to vector<16x64xf32>
    %79 = vector.extract_strided_slice %3 {offsets = [13, 0], sizes = [1, 64], strides = [1, 1]} : vector<25x64xf32> to vector<1x64xf32>
    %80 = vector.broadcast %79 : vector<1x64xf32> to vector<16x64xf32>
    %81 = arith.mulf %78, %80 : vector<16x64xf32>
    %82 = arith.addf %77, %81 : vector<16x64xf32>
    %83 = vector.extract_strided_slice %62 {offsets = [0, 16], sizes = [16, 64], strides = [1, 1]} : vector<16x80xf32> to vector<16x64xf32>
    %84 = vector.extract_strided_slice %3 {offsets = [14, 0], sizes = [1, 64], strides = [1, 1]} : vector<25x64xf32> to vector<1x64xf32>
    %85 = vector.broadcast %84 : vector<1x64xf32> to vector<16x64xf32>
    %86 = arith.mulf %83, %85 : vector<16x64xf32>
    %87 = arith.addf %82, %86 : vector<16x64xf32>
    %c3 = arith.constant 3 : index
    %c0_16 = arith.constant 0 : index
    %88 = vector.load %arg15[%c3, %c0_16] : memref<20x80xf32, #tpu.memory_space<vmem>>, vector<16x80xf32>
    %89 = vector.extract_strided_slice %88 {offsets = [0, 0], sizes = [16, 64], strides = [1, 1]} : vector<16x80xf32> to vector<16x64xf32>
    %90 = vector.extract_strided_slice %3 {offsets = [15, 0], sizes = [1, 64], strides = [1, 1]} : vector<25x64xf32> to vector<1x64xf32>
    %91 = vector.broadcast %90 : vector<1x64xf32> to vector<16x64xf32>
    %92 = arith.mulf %89, %91 : vector<16x64xf32>
    %93 = arith.addf %87, %92 : vector<16x64xf32>
    %94 = vector.extract_strided_slice %88 {offsets = [0, 4], sizes = [16, 64], strides = [1, 1]} : vector<16x80xf32> to vector<16x64xf32>
    %95 = vector.extract_strided_slice %3 {offsets = [16, 0], sizes = [1, 64], strides = [1, 1]} : vector<25x64xf32> to vector<1x64xf32>
    %96 = vector.broadcast %95 : vector<1x64xf32> to vector<16x64xf32>
    %97 = arith.mulf %94, %96 : vector<16x64xf32>
    %98 = arith.addf %93, %97 : vector<16x64xf32>
    %99 = vector.extract_strided_slice %88 {offsets = [0, 8], sizes = [16, 64], strides = [1, 1]} : vector<16x80xf32> to vector<16x64xf32>
    %100 = vector.extract_strided_slice %3 {offsets = [17, 0], sizes = [1, 64], strides = [1, 1]} : vector<25x64xf32> to vector<1x64xf32>
    %101 = vector.broadcast %100 : vector<1x64xf32> to vector<16x64xf32>
    %102 = arith.mulf %99, %101 : vector<16x64xf32>
    %103 = arith.addf %98, %102 : vector<16x64xf32>
    %104 = vector.extract_strided_slice %88 {offsets = [0, 12], sizes = [16, 64], strides = [1, 1]} : vector<16x80xf32> to vector<16x64xf32>
    %105 = vector.extract_strided_slice %3 {offsets = [18, 0], sizes = [1, 64], strides = [1, 1]} : vector<25x64xf32> to vector<1x64xf32>
    %106 = vector.broadcast %105 : vector<1x64xf32> to vector<16x64xf32>
    %107 = arith.mulf %104, %106 : vector<16x64xf32>
    %108 = arith.addf %103, %107 : vector<16x64xf32>
    %109 = vector.extract_strided_slice %88 {offsets = [0, 16], sizes = [16, 64], strides = [1, 1]} : vector<16x80xf32> to vector<16x64xf32>
    %110 = vector.extract_strided_slice %3 {offsets = [19, 0], sizes = [1, 64], strides = [1, 1]} : vector<25x64xf32> to vector<1x64xf32>
    %111 = vector.broadcast %110 : vector<1x64xf32> to vector<16x64xf32>
    %112 = arith.mulf %109, %111 : vector<16x64xf32>
    %113 = arith.addf %108, %112 : vector<16x64xf32>
    %c4 = arith.constant 4 : index
    %c0_17 = arith.constant 0 : index
    %114 = vector.load %arg15[%c4, %c0_17] : memref<20x80xf32, #tpu.memory_space<vmem>>, vector<16x80xf32>
    %115 = vector.extract_strided_slice %114 {offsets = [0, 0], sizes = [16, 64], strides = [1, 1]} : vector<16x80xf32> to vector<16x64xf32>
    %116 = vector.extract_strided_slice %3 {offsets = [20, 0], sizes = [1, 64], strides = [1, 1]} : vector<25x64xf32> to vector<1x64xf32>
    %117 = vector.broadcast %116 : vector<1x64xf32> to vector<16x64xf32>
    %118 = arith.mulf %115, %117 : vector<16x64xf32>
    %119 = arith.addf %113, %118 : vector<16x64xf32>
    %120 = vector.extract_strided_slice %114 {offsets = [0, 4], sizes = [16, 64], strides = [1, 1]} : vector<16x80xf32> to vector<16x64xf32>
    %121 = vector.extract_strided_slice %3 {offsets = [21, 0], sizes = [1, 64], strides = [1, 1]} : vector<25x64xf32> to vector<1x64xf32>
    %122 = vector.broadcast %121 : vector<1x64xf32> to vector<16x64xf32>
    %123 = arith.mulf %120, %122 : vector<16x64xf32>
    %124 = arith.addf %119, %123 : vector<16x64xf32>
    %125 = vector.extract_strided_slice %114 {offsets = [0, 8], sizes = [16, 64], strides = [1, 1]} : vector<16x80xf32> to vector<16x64xf32>
    %126 = vector.extract_strided_slice %3 {offsets = [22, 0], sizes = [1, 64], strides = [1, 1]} : vector<25x64xf32> to vector<1x64xf32>
    %127 = vector.broadcast %126 : vector<1x64xf32> to vector<16x64xf32>
    %128 = arith.mulf %125, %127 : vector<16x64xf32>
    %129 = arith.addf %124, %128 : vector<16x64xf32>
    %130 = vector.extract_strided_slice %114 {offsets = [0, 12], sizes = [16, 64], strides = [1, 1]} : vector<16x80xf32> to vector<16x64xf32>
    %131 = vector.extract_strided_slice %3 {offsets = [23, 0], sizes = [1, 64], strides = [1, 1]} : vector<25x64xf32> to vector<1x64xf32>
    %132 = vector.broadcast %131 : vector<1x64xf32> to vector<16x64xf32>
    %133 = arith.mulf %130, %132 : vector<16x64xf32>
    %134 = arith.addf %129, %133 : vector<16x64xf32>
    %135 = vector.extract_strided_slice %114 {offsets = [0, 16], sizes = [16, 64], strides = [1, 1]} : vector<16x80xf32> to vector<16x64xf32>
    %136 = vector.extract_strided_slice %3 {offsets = [24, 0], sizes = [1, 64], strides = [1, 1]} : vector<25x64xf32> to vector<1x64xf32>
    %137 = vector.broadcast %136 : vector<1x64xf32> to vector<16x64xf32>
    %138 = arith.mulf %135, %137 : vector<16x64xf32>
    %139 = arith.addf %134, %138 : vector<16x64xf32>
    %140 = vector.extract_strided_slice %5 {offsets = [0, 0], sizes = [1, 64], strides = [1, 1]} : vector<3x64xf32> to vector<1x64xf32>
    %141 = vector.broadcast %140 : vector<1x64xf32> to vector<16x64xf32>
    %142 = arith.addf %139, %141 : vector<16x64xf32>
    %cst_18 = arith.constant 0.000000e+00 : f32
    %143 = vector.broadcast %cst_18 : f32 to vector<16x64xf32>
    %144 = arith.maximumf %142, %143 : vector<16x64xf32>
    %145 = vector.extract_strided_slice %5 {offsets = [1, 0], sizes = [1, 64], strides = [1, 1]} : vector<3x64xf32> to vector<1x64xf32>
    %146 = vector.broadcast %145 : vector<1x64xf32> to vector<16x64xf32>
    %147 = arith.mulf %144, %146 : vector<16x64xf32>
    %148 = vector.extract_strided_slice %5 {offsets = [2, 0], sizes = [1, 64], strides = [1, 1]} : vector<3x64xf32> to vector<1x64xf32>
    %149 = vector.broadcast %148 : vector<1x64xf32> to vector<16x64xf32>
    %150 = arith.addf %147, %149 : vector<16x64xf32>
    %cst_19 = arith.constant 0xFF800000 : f32
    %151 = vector.broadcast %cst_19 : f32 to vector<16x4xf32>
    %c0_20 = arith.constant 0 : index
    %c0_21 = arith.constant 0 : index
    %152 = vector.load %arg15[%c0_20, %c0_21] : memref<20x80xf32, #tpu.memory_space<vmem>>, vector<16x4xf32>
    tpu.vector_store %arg15[%c0_20, %c0_21], %151 {strides = array<i32>} : memref<20x80xf32, #tpu.memory_space<vmem>>, vector<16x4xf32>,
    %c0_22 = arith.constant 0 : index
    %c4_23 = arith.constant 4 : index
    %153 = vector.load %arg15[%c0_22, %c4_23] : memref<20x80xf32, #tpu.memory_space<vmem>>, vector<16x64xf32>
    tpu.vector_store %arg15[%c0_22, %c4_23], %150 {strides = array<i32>} : memref<20x80xf32, #tpu.memory_space<vmem>>, vector<16x64xf32>,
    %cst_24 = arith.constant 0xFF800000 : f32
    %154 = vector.broadcast %cst_24 : f32 to vector<16x4xf32>
    %c0_25 = arith.constant 0 : index
    %c68 = arith.constant 68 : index
    %155 = vector.load %arg15[%c0_25, %c68] : memref<20x80xf32, #tpu.memory_space<vmem>>, vector<16x4xf32>
    tpu.vector_store %arg15[%c0_25, %c68], %154 {strides = array<i32>} : memref<20x80xf32, #tpu.memory_space<vmem>>, vector<16x4xf32>,
    %c0_26 = arith.constant 0 : index
    %c0_27 = arith.constant 0 : index
    %156 = vector.load %arg15[%c0_26, %c0_27] : memref<20x80xf32, #tpu.memory_space<vmem>>, vector<16x64xf32>
    %c0_28 = arith.constant 0 : index
    %c4_29 = arith.constant 4 : index
    %157 = vector.load %arg15[%c0_28, %c4_29] : memref<20x80xf32, #tpu.memory_space<vmem>>, vector<16x64xf32>
    %158 = arith.maximumf %156, %157 : vector<16x64xf32>
    %c0_30 = arith.constant 0 : index
    %c8_31 = arith.constant 8 : index
    %159 = vector.load %arg15[%c0_30, %c8_31] : memref<20x80xf32, #tpu.memory_space<vmem>>, vector<16x64xf32>
    %160 = arith.maximumf %158, %159 : vector<16x64xf32>
    %cst_32 = arith.constant 0xFF800000 : f32
    %161 = vector.broadcast %cst_32 : f32 to vector<1x64xf32>
    %c0_33 = arith.constant 0 : index
    %c0_34 = arith.constant 0 : index
    %162 = vector.load %arg15[%c0_33, %c0_34] : memref<20x80xf32, #tpu.memory_space<vmem>>, vector<1x64xf32>
    tpu.vector_store %arg15[%c0_33, %c0_34], %161 {strides = array<i32>} : memref<20x80xf32, #tpu.memory_space<vmem>>, vector<1x64xf32>,
    %c1_35 = arith.constant 1 : index
    %c0_36 = arith.constant 0 : index
    %163 = vector.load %arg15[%c1_35, %c0_36] : memref<20x80xf32, #tpu.memory_space<vmem>>, vector<16x64xf32>
    tpu.vector_store %arg15[%c1_35, %c0_36], %160 {strides = array<i32>} : memref<20x80xf32, #tpu.memory_space<vmem>>, vector<16x64xf32>,
    %cst_37 = arith.constant 0xFF800000 : f32
    %164 = vector.broadcast %cst_37 : f32 to vector<1x64xf32>
    %c17 = arith.constant 17 : index
    %c0_38 = arith.constant 0 : index
    %165 = vector.load %arg15[%c17, %c0_38] : memref<20x80xf32, #tpu.memory_space<vmem>>, vector<1x64xf32>
    tpu.vector_store %arg15[%c17, %c0_38], %164 {strides = array<i32>} : memref<20x80xf32, #tpu.memory_space<vmem>>, vector<1x64xf32>,
    %c0_39 = arith.constant 0 : index
    %c0_40 = arith.constant 0 : index
    %166 = tpu.strided_load %arg15[%c0_39, %c0_40] {strides = array<i32: 2, 1>} : memref<20x80xf32, #tpu.memory_space<vmem>>, vector<8x64xf32>
    %c1_41 = arith.constant 1 : index
    %c0_42 = arith.constant 0 : index
    %167 = tpu.strided_load %arg15[%c1_41, %c0_42] {strides = array<i32: 2, 1>} : memref<20x80xf32, #tpu.memory_space<vmem>>, vector<8x64xf32>
    %168 = arith.maximumf %166, %167 : vector<8x64xf32>
    %c2_43 = arith.constant 2 : index
    %c0_44 = arith.constant 0 : index
    %169 = tpu.strided_load %arg15[%c2_43, %c0_44] {strides = array<i32: 2, 1>} : memref<20x80xf32, #tpu.memory_space<vmem>>, vector<8x64xf32>
    %170 = arith.maximumf %168, %169 : vector<8x64xf32>
    %c1_45 = arith.constant 1 : index
    %c0_46 = arith.constant 0 : index
    %c0_47 = arith.constant 0 : index
    %171 = vector.load %arg2[%c1_45, %c0_46, %c0_47] : memref<4x25x64xf32, #tpu.memory_space<vmem>>, vector<1x25x64xf32>
    %172 = vector.shape_cast %171 : vector<1x25x64xf32> to vector<25x64xf32>
    %c1_48 = arith.constant 1 : index
    %c0_49 = arith.constant 0 : index
    %c0_50 = arith.constant 0 : index
    %173 = vector.load %arg3[%c1_48, %c0_49, %c0_50] : memref<4x3x64xf32, #tpu.memory_space<vmem>>, vector<1x3x64xf32>
    %174 = vector.shape_cast %173 : vector<1x3x64xf32> to vector<3x64xf32>
    %cst_51 = arith.constant 0.000000e+00 : f32
    %175 = vector.broadcast %cst_51 : f32 to vector<20x80xf32>
    %c0_52 = arith.constant 0 : index
    %c0_53 = arith.constant 0 : index
    %176 = vector.load %arg15[%c0_52, %c0_53] : memref<20x80xf32, #tpu.memory_space<vmem>>, vector<20x80xf32>
    tpu.vector_store %arg15[%c0_52, %c0_53], %175 {strides = array<i32>} : memref<20x80xf32, #tpu.memory_space<vmem>>, vector<20x80xf32>,
    %c2_54 = arith.constant 2 : index
    %c8_55 = arith.constant 8 : index
    %177 = vector.load %arg15[%c2_54, %c8_55] : memref<20x80xf32, #tpu.memory_space<vmem>>, vector<8x64xf32>
    tpu.vector_store %arg15[%c2_54, %c8_55], %170 {strides = array<i32>} : memref<20x80xf32, #tpu.memory_space<vmem>>, vector<8x64xf32>,
    %cst_56 = arith.constant 0.000000e+00 : f32
    %178 = vector.broadcast %cst_56 : f32 to vector<8x64xf32>
    %c0_57 = arith.constant 0 : index
    %c0_58 = arith.constant 0 : index
    %179 = vector.load %arg15[%c0_57, %c0_58] : memref<20x80xf32, #tpu.memory_space<vmem>>, vector<8x80xf32>
    %180 = vector.extract_strided_slice %179 {offsets = [0, 0], sizes = [8, 64], strides = [1, 1]} : vector<8x80xf32> to vector<8x64xf32>
    %181 = vector.extract_strided_slice %172 {offsets = [0, 0], sizes = [1, 64], strides = [1, 1]} : vector<25x64xf32> to vector<1x64xf32>
    %182 = vector.broadcast %181 : vector<1x64xf32> to vector<8x64xf32>
    %183 = arith.mulf %180, %182 : vector<8x64xf32>
    %184 = arith.addf %178, %183 : vector<8x64xf32>
    %185 = vector.extract_strided_slice %179 {offsets = [0, 4], sizes = [8, 64], strides = [1, 1]} : vector<8x80xf32> to vector<8x64xf32>
    %186 = vector.extract_strided_slice %172 {offsets = [1, 0], sizes = [1, 64], strides = [1, 1]} : vector<25x64xf32> to vector<1x64xf32>
    %187 = vector.broadcast %186 : vector<1x64xf32> to vector<8x64xf32>
    %188 = arith.mulf %185, %187 : vector<8x64xf32>
    %189 = arith.addf %184, %188 : vector<8x64xf32>
    %190 = vector.extract_strided_slice %179 {offsets = [0, 8], sizes = [8, 64], strides = [1, 1]} : vector<8x80xf32> to vector<8x64xf32>
    %191 = vector.extract_strided_slice %172 {offsets = [2, 0], sizes = [1, 64], strides = [1, 1]} : vector<25x64xf32> to vector<1x64xf32>
    %192 = vector.broadcast %191 : vector<1x64xf32> to vector<8x64xf32>
    %193 = arith.mulf %190, %192 : vector<8x64xf32>
    %194 = arith.addf %189, %193 : vector<8x64xf32>
    %195 = vector.extract_strided_slice %179 {offsets = [0, 12], sizes = [8, 64], strides = [1, 1]} : vector<8x80xf32> to vector<8x64xf32>
    %196 = vector.extract_strided_slice %172 {offsets = [3, 0], sizes = [1, 64], strides = [1, 1]} : vector<25x64xf32> to vector<1x64xf32>
    %197 = vector.broadcast %196 : vector<1x64xf32> to vector<8x64xf32>
    %198 = arith.mulf %195, %197 : vector<8x64xf32>
    %199 = arith.addf %194, %198 : vector<8x64xf32>
    %200 = vector.extract_strided_slice %179 {offsets = [0, 16], sizes = [8, 64], strides = [1, 1]} : vector<8x80xf32> to vector<8x64xf32>
    %201 = vector.extract_strided_slice %172 {offsets = [4, 0], sizes = [1, 64], strides = [1, 1]} : vector<25x64xf32> to vector<1x64xf32>
    %202 = vector.broadcast %201 : vector<1x64xf32> to vector<8x64xf32>
    %203 = arith.mulf %200, %202 : vector<8x64xf32>
    %204 = arith.addf %199, %203 : vector<8x64xf32>
    %c1_59 = arith.constant 1 : index
    %c0_60 = arith.constant 0 : index
    %205 = vector.load %arg15[%c1_59, %c0_60] : memref<20x80xf32, #tpu.memory_space<vmem>>, vector<8x80xf32>
    %206 = vector.extract_strided_slice %205 {offsets = [0, 0], sizes = [8, 64], strides = [1, 1]} : vector<8x80xf32> to vector<8x64xf32>
    %207 = vector.extract_strided_slice %172 {offsets = [5, 0], sizes = [1, 64], strides = [1, 1]} : vector<25x64xf32> to vector<1x64xf32>
    %208 = vector.broadcast %207 : vector<1x64xf32> to vector<8x64xf32>
    %209 = arith.mulf %206, %208 : vector<8x64xf32>
    %210 = arith.addf %204, %209 : vector<8x64xf32>
    %211 = vector.extract_strided_slice %205 {offsets = [0, 4], sizes = [8, 64], strides = [1, 1]} : vector<8x80xf32> to vector<8x64xf32>
    %212 = vector.extract_strided_slice %172 {offsets = [6, 0], sizes = [1, 64], strides = [1, 1]} : vector<25x64xf32> to vector<1x64xf32>
    %213 = vector.broadcast %212 : vector<1x64xf32> to vector<8x64xf32>
    %214 = arith.mulf %211, %213 : vector<8x64xf32>
    %215 = arith.addf %210, %214 : vector<8x64xf32>
    %216 = vector.extract_strided_slice %205 {offsets = [0, 8], sizes = [8, 64], strides = [1, 1]} : vector<8x80xf32> to vector<8x64xf32>
    %217 = vector.extract_strided_slice %172 {offsets = [7, 0], sizes = [1, 64], strides = [1, 1]} : vector<25x64xf32> to vector<1x64xf32>
    %218 = vector.broadcast %217 : vector<1x64xf32> to vector<8x64xf32>
    %219 = arith.mulf %216, %218 : vector<8x64xf32>
    %220 = arith.addf %215, %219 : vector<8x64xf32>
    %221 = vector.extract_strided_slice %205 {offsets = [0, 12], sizes = [8, 64], strides = [1, 1]} : vector<8x80xf32> to vector<8x64xf32>
    %222 = vector.extract_strided_slice %172 {offsets = [8, 0], sizes = [1, 64], strides = [1, 1]} : vector<25x64xf32> to vector<1x64xf32>
    %223 = vector.broadcast %222 : vector<1x64xf32> to vector<8x64xf32>
    %224 = arith.mulf %221, %223 : vector<8x64xf32>
    %225 = arith.addf %220, %224 : vector<8x64xf32>
    %226 = vector.extract_strided_slice %205 {offsets = [0, 16], sizes = [8, 64], strides = [1, 1]} : vector<8x80xf32> to vector<8x64xf32>
    %227 = vector.extract_strided_slice %172 {offsets = [9, 0], sizes = [1, 64], strides = [1, 1]} : vector<25x64xf32> to vector<1x64xf32>
    %228 = vector.broadcast %227 : vector<1x64xf32> to vector<8x64xf32>
    %229 = arith.mulf %226, %228 : vector<8x64xf32>
    %230 = arith.addf %225, %229 : vector<8x64xf32>
    %c2_61 = arith.constant 2 : index
    %c0_62 = arith.constant 0 : index
    %231 = vector.load %arg15[%c2_61, %c0_62] : memref<20x80xf32, #tpu.memory_space<vmem>>, vector<8x80xf32>
    %232 = vector.extract_strided_slice %231 {offsets = [0, 0], sizes = [8, 64], strides = [1, 1]} : vector<8x80xf32> to vector<8x64xf32>
    %233 = vector.extract_strided_slice %172 {offsets = [10, 0], sizes = [1, 64], strides = [1, 1]} : vector<25x64xf32> to vector<1x64xf32>
    %234 = vector.broadcast %233 : vector<1x64xf32> to vector<8x64xf32>
    %235 = arith.mulf %232, %234 : vector<8x64xf32>
    %236 = arith.addf %230, %235 : vector<8x64xf32>
    %237 = vector.extract_strided_slice %231 {offsets = [0, 4], sizes = [8, 64], strides = [1, 1]} : vector<8x80xf32> to vector<8x64xf32>
    %238 = vector.extract_strided_slice %172 {offsets = [11, 0], sizes = [1, 64], strides = [1, 1]} : vector<25x64xf32> to vector<1x64xf32>
    %239 = vector.broadcast %238 : vector<1x64xf32> to vector<8x64xf32>
    %240 = arith.mulf %237, %239 : vector<8x64xf32>
    %241 = arith.addf %236, %240 : vector<8x64xf32>
    %242 = vector.extract_strided_slice %231 {offsets = [0, 8], sizes = [8, 64], strides = [1, 1]} : vector<8x80xf32> to vector<8x64xf32>
    %243 = vector.extract_strided_slice %172 {offsets = [12, 0], sizes = [1, 64], strides = [1, 1]} : vector<25x64xf32> to vector<1x64xf32>
    %244 = vector.broadcast %243 : vector<1x64xf32> to vector<8x64xf32>
    %245 = arith.mulf %242, %244 : vector<8x64xf32>
    %246 = arith.addf %241, %245 : vector<8x64xf32>
    %247 = vector.extract_strided_slice %231 {offsets = [0, 12], sizes = [8, 64], strides = [1, 1]} : vector<8x80xf32> to vector<8x64xf32>
    %248 = vector.extract_strided_slice %172 {offsets = [13, 0], sizes = [1, 64], strides = [1, 1]} : vector<25x64xf32> to vector<1x64xf32>
    %249 = vector.broadcast %248 : vector<1x64xf32> to vector<8x64xf32>
    %250 = arith.mulf %247, %249 : vector<8x64xf32>
    %251 = arith.addf %246, %250 : vector<8x64xf32>
    %252 = vector.extract_strided_slice %231 {offsets = [0, 16], sizes = [8, 64], strides = [1, 1]} : vector<8x80xf32> to vector<8x64xf32>
    %253 = vector.extract_strided_slice %172 {offsets = [14, 0], sizes = [1, 64], strides = [1, 1]} : vector<25x64xf32> to vector<1x64xf32>
    %254 = vector.broadcast %253 : vector<1x64xf32> to vector<8x64xf32>
    %255 = arith.mulf %252, %254 : vector<8x64xf32>
    %256 = arith.addf %251, %255 : vector<8x64xf32>
    %c3_63 = arith.constant 3 : index
    %c0_64 = arith.constant 0 : index
    %257 = vector.load %arg15[%c3_63, %c0_64] : memref<20x80xf32, #tpu.memory_space<vmem>>, vector<8x80xf32>
    %258 = vector.extract_strided_slice %257 {offsets = [0, 0], sizes = [8, 64], strides = [1, 1]} : vector<8x80xf32> to vector<8x64xf32>
    %259 = vector.extract_strided_slice %172 {offsets = [15, 0], sizes = [1, 64], strides = [1, 1]} : vector<25x64xf32> to vector<1x64xf32>
    %260 = vector.broadcast %259 : vector<1x64xf32> to vector<8x64xf32>
    %261 = arith.mulf %258, %260 : vector<8x64xf32>
    %262 = arith.addf %256, %261 : vector<8x64xf32>
    %263 = vector.extract_strided_slice %257 {offsets = [0, 4], sizes = [8, 64], strides = [1, 1]} : vector<8x80xf32> to vector<8x64xf32>
    %264 = vector.extract_strided_slice %172 {offsets = [16, 0], sizes = [1, 64], strides = [1, 1]} : vector<25x64xf32> to vector<1x64xf32>
    %265 = vector.broadcast %264 : vector<1x64xf32> to vector<8x64xf32>
    %266 = arith.mulf %263, %265 : vector<8x64xf32>
    %267 = arith.addf %262, %266 : vector<8x64xf32>
    %268 = vector.extract_strided_slice %257 {offsets = [0, 8], sizes = [8, 64], strides = [1, 1]} : vector<8x80xf32> to vector<8x64xf32>
    %269 = vector.extract_strided_slice %172 {offsets = [17, 0], sizes = [1, 64], strides = [1, 1]} : vector<25x64xf32> to vector<1x64xf32>
    %270 = vector.broadcast %269 : vector<1x64xf32> to vector<8x64xf32>
    %271 = arith.mulf %268, %270 : vector<8x64xf32>
    %272 = arith.addf %267, %271 : vector<8x64xf32>
    %273 = vector.extract_strided_slice %257 {offsets = [0, 12], sizes = [8, 64], strides = [1, 1]} : vector<8x80xf32> to vector<8x64xf32>
    %274 = vector.extract_strided_slice %172 {offsets = [18, 0], sizes = [1, 64], strides = [1, 1]} : vector<25x64xf32> to vector<1x64xf32>
    %275 = vector.broadcast %274 : vector<1x64xf32> to vector<8x64xf32>
    %276 = arith.mulf %273, %275 : vector<8x64xf32>
    %277 = arith.addf %272, %276 : vector<8x64xf32>
    %278 = vector.extract_strided_slice %257 {offsets = [0, 16], sizes = [8, 64], strides = [1, 1]} : vector<8x80xf32> to vector<8x64xf32>
    %279 = vector.extract_strided_slice %172 {offsets = [19, 0], sizes = [1, 64], strides = [1, 1]} : vector<25x64xf32> to vector<1x64xf32>
    %280 = vector.broadcast %279 : vector<1x64xf32> to vector<8x64xf32>
    %281 = arith.mulf %278, %280 : vector<8x64xf32>
    %282 = arith.addf %277, %281 : vector<8x64xf32>
    %c4_65 = arith.constant 4 : index
    %c0_66 = arith.constant 0 : index
    %283 = vector.load %arg15[%c4_65, %c0_66] : memref<20x80xf32, #tpu.memory_space<vmem>>, vector<8x80xf32>
    %284 = vector.extract_strided_slice %283 {offsets = [0, 0], sizes = [8, 64], strides = [1, 1]} : vector<8x80xf32> to vector<8x64xf32>
    %285 = vector.extract_strided_slice %172 {offsets = [20, 0], sizes = [1, 64], strides = [1, 1]} : vector<25x64xf32> to vector<1x64xf32>
    %286 = vector.broadcast %285 : vector<1x64xf32> to vector<8x64xf32>
    %287 = arith.mulf %284, %286 : vector<8x64xf32>
    %288 = arith.addf %282, %287 : vector<8x64xf32>
    %289 = vector.extract_strided_slice %283 {offsets = [0, 4], sizes = [8, 64], strides = [1, 1]} : vector<8x80xf32> to vector<8x64xf32>
    %290 = vector.extract_strided_slice %172 {offsets = [21, 0], sizes = [1, 64], strides = [1, 1]} : vector<25x64xf32> to vector<1x64xf32>
    %291 = vector.broadcast %290 : vector<1x64xf32> to vector<8x64xf32>
    %292 = arith.mulf %289, %291 : vector<8x64xf32>
    %293 = arith.addf %288, %292 : vector<8x64xf32>
    %294 = vector.extract_strided_slice %283 {offsets = [0, 8], sizes = [8, 64], strides = [1, 1]} : vector<8x80xf32> to vector<8x64xf32>
    %295 = vector.extract_strided_slice %172 {offsets = [22, 0], sizes = [1, 64], strides = [1, 1]} : vector<25x64xf32> to vector<1x64xf32>
    %296 = vector.broadcast %295 : vector<1x64xf32> to vector<8x64xf32>
    %297 = arith.mulf %294, %296 : vector<8x64xf32>
    %298 = arith.addf %293, %297 : vector<8x64xf32>
    %299 = vector.extract_strided_slice %283 {offsets = [0, 12], sizes = [8, 64], strides = [1, 1]} : vector<8x80xf32> to vector<8x64xf32>
    %300 = vector.extract_strided_slice %172 {offsets = [23, 0], sizes = [1, 64], strides = [1, 1]} : vector<25x64xf32> to vector<1x64xf32>
    %301 = vector.broadcast %300 : vector<1x64xf32> to vector<8x64xf32>
    %302 = arith.mulf %299, %301 : vector<8x64xf32>
    %303 = arith.addf %298, %302 : vector<8x64xf32>
    %304 = vector.extract_strided_slice %283 {offsets = [0, 16], sizes = [8, 64], strides = [1, 1]} : vector<8x80xf32> to vector<8x64xf32>
    %305 = vector.extract_strided_slice %172 {offsets = [24, 0], sizes = [1, 64], strides = [1, 1]} : vector<25x64xf32> to vector<1x64xf32>
    %306 = vector.broadcast %305 : vector<1x64xf32> to vector<8x64xf32>
    %307 = arith.mulf %304, %306 : vector<8x64xf32>
    %308 = arith.addf %303, %307 : vector<8x64xf32>
    %309 = vector.extract_strided_slice %174 {offsets = [0, 0], sizes = [1, 64], strides = [1, 1]} : vector<3x64xf32> to vector<1x64xf32>
    %310 = vector.broadcast %309 : vector<1x64xf32> to vector<8x64xf32>
    %311 = arith.addf %308, %310 : vector<8x64xf32>
    %cst_67 = arith.constant 0.000000e+00 : f32
    %312 = vector.broadcast %cst_67 : f32 to vector<8x64xf32>
    %313 = arith.maximumf %311, %312 : vector<8x64xf32>
    %314 = vector.extract_strided_slice %174 {offsets = [1, 0], sizes = [1, 64], strides = [1, 1]} : vector<3x64xf32> to vector<1x64xf32>
    %315 = vector.broadcast %314 : vector<1x64xf32> to vector<8x64xf32>
    %316 = arith.mulf %313, %315 : vector<8x64xf32>
    %317 = vector.extract_strided_slice %174 {offsets = [2, 0], sizes = [1, 64], strides = [1, 1]} : vector<3x64xf32> to vector<1x64xf32>
    %318 = vector.broadcast %317 : vector<1x64xf32> to vector<8x64xf32>
    %319 = arith.addf %316, %318 : vector<8x64xf32>
    %cst_68 = arith.constant 0xFF800000 : f32
    %320 = vector.broadcast %cst_68 : f32 to vector<8x4xf32>
    %c0_69 = arith.constant 0 : index
    %c0_70 = arith.constant 0 : index
    %321 = vector.load %arg15[%c0_69, %c0_70] : memref<20x80xf32, #tpu.memory_space<vmem>>, vector<8x4xf32>
    tpu.vector_store %arg15[%c0_69, %c0_70], %320 {strides = array<i32>} : memref<20x80xf32, #tpu.memory_space<vmem>>, vector<8x4xf32>,
    %c0_71 = arith.constant 0 : index
    %c4_72 = arith.constant 4 : index
    %322 = vector.load %arg15[%c0_71, %c4_72] : memref<20x80xf32, #tpu.memory_space<vmem>>, vector<8x64xf32>
    tpu.vector_store %arg15[%c0_71, %c4_72], %319 {strides = array<i32>} : memref<20x80xf32, #tpu.memory_space<vmem>>, vector<8x64xf32>,
    %cst_73 = arith.constant 0xFF800000 : f32
    %323 = vector.broadcast %cst_73 : f32 to vector<8x4xf32>
    %c0_74 = arith.constant 0 : index
    %c68_75 = arith.constant 68 : index
    %324 = vector.load %arg15[%c0_74, %c68_75] : memref<20x80xf32, #tpu.memory_space<vmem>>, vector<8x4xf32>
    tpu.vector_store %arg15[%c0_74, %c68_75], %323 {strides = array<i32>} : memref<20x80xf32, #tpu.memory_space<vmem>>, vector<8x4xf32>,
    %c0_76 = arith.constant 0 : index
    %c0_77 = arith.constant 0 : index
    %325 = vector.load %arg15[%c0_76, %c0_77] : memref<20x80xf32, #tpu.memory_space<vmem>>, vector<8x64xf32>
    %c0_78 = arith.constant 0 : index
    %c4_79 = arith.constant 4 : index
    %326 = vector.load %arg15[%c0_78, %c4_79] : memref<20x80xf32, #tpu.memory_space<vmem>>, vector<8x64xf32>
    %327 = arith.maximumf %325, %326 : vector<8x64xf32>
    %c0_80 = arith.constant 0 : index
    %c8_81 = arith.constant 8 : index
    %328 = vector.load %arg15[%c0_80, %c8_81] : memref<20x80xf32, #tpu.memory_space<vmem>>, vector<8x64xf32>
    %329 = arith.maximumf %327, %328 : vector<8x64xf32>
    %cst_82 = arith.constant 0xFF800000 : f32
    %330 = vector.broadcast %cst_82 : f32 to vector<1x64xf32>
    %c0_83 = arith.constant 0 : index
    %c0_84 = arith.constant 0 : index
    %331 = vector.load %arg15[%c0_83, %c0_84] : memref<20x80xf32, #tpu.memory_space<vmem>>, vector<1x64xf32>
    tpu.vector_store %arg15[%c0_83, %c0_84], %330 {strides = array<i32>} : memref<20x80xf32, #tpu.memory_space<vmem>>, vector<1x64xf32>,
    %c1_85 = arith.constant 1 : index
    %c0_86 = arith.constant 0 : index
    %332 = vector.load %arg15[%c1_85, %c0_86] : memref<20x80xf32, #tpu.memory_space<vmem>>, vector<8x64xf32>
    tpu.vector_store %arg15[%c1_85, %c0_86], %329 {strides = array<i32>} : memref<20x80xf32, #tpu.memory_space<vmem>>, vector<8x64xf32>,
    %cst_87 = arith.constant 0xFF800000 : f32
    %333 = vector.broadcast %cst_87 : f32 to vector<1x64xf32>
    %c9 = arith.constant 9 : index
    %c0_88 = arith.constant 0 : index
    %334 = vector.load %arg15[%c9, %c0_88] : memref<20x80xf32, #tpu.memory_space<vmem>>, vector<1x64xf32>
    tpu.vector_store %arg15[%c9, %c0_88], %333 {strides = array<i32>} : memref<20x80xf32, #tpu.memory_space<vmem>>, vector<1x64xf32>,
    %c0_89 = arith.constant 0 : index
    %c0_90 = arith.constant 0 : index
    %335 = tpu.strided_load %arg15[%c0_89, %c0_90] {strides = array<i32: 2, 1>} : memref<20x80xf32, #tpu.memory_space<vmem>>, vector<4x64xf32>
    %c1_91 = arith.constant 1 : index
    %c0_92 = arith.constant 0 : index
    %336 = tpu.strided_load %arg15[%c1_91, %c0_92] {strides = array<i32: 2, 1>} : memref<20x80xf32, #tpu.memory_space<vmem>>, vector<4x64xf32>
    %337 = arith.maximumf %335, %336 : vector<4x64xf32>
    %c2_93 = arith.constant 2 : index
    %c0_94 = arith.constant 0 : index
    %338 = tpu.strided_load %arg15[%c2_93, %c0_94] {strides = array<i32: 2, 1>} : memref<20x80xf32, #tpu.memory_space<vmem>>, vector<4x64xf32>
    %339 = arith.maximumf %337, %338 : vector<4x64xf32>
    %c2_95 = arith.constant 2 : index
    %c0_96 = arith.constant 0 : index
    %c0_97 = arith.constant 0 : index
    %340 = vector.load %arg2[%c2_95, %c0_96, %c0_97] : memref<4x25x64xf32, #tpu.memory_space<vmem>>, vector<1x25x64xf32>
    %341 = vector.shape_cast %340 : vector<1x25x64xf32> to vector<25x64xf32>
    %c2_98 = arith.constant 2 : index
    %c0_99 = arith.constant 0 : index
    %c0_100 = arith.constant 0 : index
    %342 = vector.load %arg3[%c2_98, %c0_99, %c0_100] : memref<4x3x64xf32, #tpu.memory_space<vmem>>, vector<1x3x64xf32>
    %343 = vector.shape_cast %342 : vector<1x3x64xf32> to vector<3x64xf32>
    %cst_101 = arith.constant 0.000000e+00 : f32
    %344 = vector.broadcast %cst_101 : f32 to vector<20x80xf32>
    %c0_102 = arith.constant 0 : index
    %c0_103 = arith.constant 0 : index
    %345 = vector.load %arg15[%c0_102, %c0_103] : memref<20x80xf32, #tpu.memory_space<vmem>>, vector<20x80xf32>
    tpu.vector_store %arg15[%c0_102, %c0_103], %344 {strides = array<i32>} : memref<20x80xf32, #tpu.memory_space<vmem>>, vector<20x80xf32>,
    %c2_104 = arith.constant 2 : index
    %c8_105 = arith.constant 8 : index
    %346 = vector.load %arg15[%c2_104, %c8_105] : memref<20x80xf32, #tpu.memory_space<vmem>>, vector<4x64xf32>
    tpu.vector_store %arg15[%c2_104, %c8_105], %339 {strides = array<i32>} : memref<20x80xf32, #tpu.memory_space<vmem>>, vector<4x64xf32>,
    %cst_106 = arith.constant 0.000000e+00 : f32
    %347 = vector.broadcast %cst_106 : f32 to vector<4x64xf32>
    %c0_107 = arith.constant 0 : index
    %c0_108 = arith.constant 0 : index
    %348 = vector.load %arg15[%c0_107, %c0_108] : memref<20x80xf32, #tpu.memory_space<vmem>>, vector<4x80xf32>
    %349 = vector.extract_strided_slice %348 {offsets = [0, 0], sizes = [4, 64], strides = [1, 1]} : vector<4x80xf32> to vector<4x64xf32>
    %350 = vector.extract_strided_slice %341 {offsets = [0, 0], sizes = [1, 64], strides = [1, 1]} : vector<25x64xf32> to vector<1x64xf32>
    %351 = vector.broadcast %350 : vector<1x64xf32> to vector<4x64xf32>
    %352 = arith.mulf %349, %351 : vector<4x64xf32>
    %353 = arith.addf %347, %352 : vector<4x64xf32>
    %354 = vector.extract_strided_slice %348 {offsets = [0, 4], sizes = [4, 64], strides = [1, 1]} : vector<4x80xf32> to vector<4x64xf32>
    %355 = vector.extract_strided_slice %341 {offsets = [1, 0], sizes = [1, 64], strides = [1, 1]} : vector<25x64xf32> to vector<1x64xf32>
    %356 = vector.broadcast %355 : vector<1x64xf32> to vector<4x64xf32>
    %357 = arith.mulf %354, %356 : vector<4x64xf32>
    %358 = arith.addf %353, %357 : vector<4x64xf32>
    %359 = vector.extract_strided_slice %348 {offsets = [0, 8], sizes = [4, 64], strides = [1, 1]} : vector<4x80xf32> to vector<4x64xf32>
    %360 = vector.extract_strided_slice %341 {offsets = [2, 0], sizes = [1, 64], strides = [1, 1]} : vector<25x64xf32> to vector<1x64xf32>
    %361 = vector.broadcast %360 : vector<1x64xf32> to vector<4x64xf32>
    %362 = arith.mulf %359, %361 : vector<4x64xf32>
    %363 = arith.addf %358, %362 : vector<4x64xf32>
    %364 = vector.extract_strided_slice %348 {offsets = [0, 12], sizes = [4, 64], strides = [1, 1]} : vector<4x80xf32> to vector<4x64xf32>
    %365 = vector.extract_strided_slice %341 {offsets = [3, 0], sizes = [1, 64], strides = [1, 1]} : vector<25x64xf32> to vector<1x64xf32>
    %366 = vector.broadcast %365 : vector<1x64xf32> to vector<4x64xf32>
    %367 = arith.mulf %364, %366 : vector<4x64xf32>
    %368 = arith.addf %363, %367 : vector<4x64xf32>
    %369 = vector.extract_strided_slice %348 {offsets = [0, 16], sizes = [4, 64], strides = [1, 1]} : vector<4x80xf32> to vector<4x64xf32>
    %370 = vector.extract_strided_slice %341 {offsets = [4, 0], sizes = [1, 64], strides = [1, 1]} : vector<25x64xf32> to vector<1x64xf32>
    %371 = vector.broadcast %370 : vector<1x64xf32> to vector<4x64xf32>
    %372 = arith.mulf %369, %371 : vector<4x64xf32>
    %373 = arith.addf %368, %372 : vector<4x64xf32>
    %c1_109 = arith.constant 1 : index
    %c0_110 = arith.constant 0 : index
    %374 = vector.load %arg15[%c1_109, %c0_110] : memref<20x80xf32, #tpu.memory_space<vmem>>, vector<4x80xf32>
    %375 = vector.extract_strided_slice %374 {offsets = [0, 0], sizes = [4, 64], strides = [1, 1]} : vector<4x80xf32> to vector<4x64xf32>
    %376 = vector.extract_strided_slice %341 {offsets = [5, 0], sizes = [1, 64], strides = [1, 1]} : vector<25x64xf32> to vector<1x64xf32>
    %377 = vector.broadcast %376 : vector<1x64xf32> to vector<4x64xf32>
    %378 = arith.mulf %375, %377 : vector<4x64xf32>
    %379 = arith.addf %373, %378 : vector<4x64xf32>
    %380 = vector.extract_strided_slice %374 {offsets = [0, 4], sizes = [4, 64], strides = [1, 1]} : vector<4x80xf32> to vector<4x64xf32>
    %381 = vector.extract_strided_slice %341 {offsets = [6, 0], sizes = [1, 64], strides = [1, 1]} : vector<25x64xf32> to vector<1x64xf32>
    %382 = vector.broadcast %381 : vector<1x64xf32> to vector<4x64xf32>
    %383 = arith.mulf %380, %382 : vector<4x64xf32>
    %384 = arith.addf %379, %383 : vector<4x64xf32>
    %385 = vector.extract_strided_slice %374 {offsets = [0, 8], sizes = [4, 64], strides = [1, 1]} : vector<4x80xf32> to vector<4x64xf32>
    %386 = vector.extract_strided_slice %341 {offsets = [7, 0], sizes = [1, 64], strides = [1, 1]} : vector<25x64xf32> to vector<1x64xf32>
    %387 = vector.broadcast %386 : vector<1x64xf32> to vector<4x64xf32>
    %388 = arith.mulf %385, %387 : vector<4x64xf32>
    %389 = arith.addf %384, %388 : vector<4x64xf32>
    %390 = vector.extract_strided_slice %374 {offsets = [0, 12], sizes = [4, 64], strides = [1, 1]} : vector<4x80xf32> to vector<4x64xf32>
    %391 = vector.extract_strided_slice %341 {offsets = [8, 0], sizes = [1, 64], strides = [1, 1]} : vector<25x64xf32> to vector<1x64xf32>
    %392 = vector.broadcast %391 : vector<1x64xf32> to vector<4x64xf32>
    %393 = arith.mulf %390, %392 : vector<4x64xf32>
    %394 = arith.addf %389, %393 : vector<4x64xf32>
    %395 = vector.extract_strided_slice %374 {offsets = [0, 16], sizes = [4, 64], strides = [1, 1]} : vector<4x80xf32> to vector<4x64xf32>
    %396 = vector.extract_strided_slice %341 {offsets = [9, 0], sizes = [1, 64], strides = [1, 1]} : vector<25x64xf32> to vector<1x64xf32>
    %397 = vector.broadcast %396 : vector<1x64xf32> to vector<4x64xf32>
    %398 = arith.mulf %395, %397 : vector<4x64xf32>
    %399 = arith.addf %394, %398 : vector<4x64xf32>
    %c2_111 = arith.constant 2 : index
    %c0_112 = arith.constant 0 : index
    %400 = vector.load %arg15[%c2_111, %c0_112] : memref<20x80xf32, #tpu.memory_space<vmem>>, vector<4x80xf32>
    %401 = vector.extract_strided_slice %400 {offsets = [0, 0], sizes = [4, 64], strides = [1, 1]} : vector<4x80xf32> to vector<4x64xf32>
    %402 = vector.extract_strided_slice %341 {offsets = [10, 0], sizes = [1, 64], strides = [1, 1]} : vector<25x64xf32> to vector<1x64xf32>
    %403 = vector.broadcast %402 : vector<1x64xf32> to vector<4x64xf32>
    %404 = arith.mulf %401, %403 : vector<4x64xf32>
    %405 = arith.addf %399, %404 : vector<4x64xf32>
    %406 = vector.extract_strided_slice %400 {offsets = [0, 4], sizes = [4, 64], strides = [1, 1]} : vector<4x80xf32> to vector<4x64xf32>
    %407 = vector.extract_strided_slice %341 {offsets = [11, 0], sizes = [1, 64], strides = [1, 1]} : vector<25x64xf32> to vector<1x64xf32>
    %408 = vector.broadcast %407 : vector<1x64xf32> to vector<4x64xf32>
    %409 = arith.mulf %406, %408 : vector<4x64xf32>
    %410 = arith.addf %405, %409 : vector<4x64xf32>
    %411 = vector.extract_strided_slice %400 {offsets = [0, 8], sizes = [4, 64], strides = [1, 1]} : vector<4x80xf32> to vector<4x64xf32>
    %412 = vector.extract_strided_slice %341 {offsets = [12, 0], sizes = [1, 64], strides = [1, 1]} : vector<25x64xf32> to vector<1x64xf32>
    %413 = vector.broadcast %412 : vector<1x64xf32> to vector<4x64xf32>
    %414 = arith.mulf %411, %413 : vector<4x64xf32>
    %415 = arith.addf %410, %414 : vector<4x64xf32>
    %416 = vector.extract_strided_slice %400 {offsets = [0, 12], sizes = [4, 64], strides = [1, 1]} : vector<4x80xf32> to vector<4x64xf32>
    %417 = vector.extract_strided_slice %341 {offsets = [13, 0], sizes = [1, 64], strides = [1, 1]} : vector<25x64xf32> to vector<1x64xf32>
    %418 = vector.broadcast %417 : vector<1x64xf32> to vector<4x64xf32>
    %419 = arith.mulf %416, %418 : vector<4x64xf32>
    %420 = arith.addf %415, %419 : vector<4x64xf32>
    %421 = vector.extract_strided_slice %400 {offsets = [0, 16], sizes = [4, 64], strides = [1, 1]} : vector<4x80xf32> to vector<4x64xf32>
    %422 = vector.extract_strided_slice %341 {offsets = [14, 0], sizes = [1, 64], strides = [1, 1]} : vector<25x64xf32> to vector<1x64xf32>
    %423 = vector.broadcast %422 : vector<1x64xf32> to vector<4x64xf32>
    %424 = arith.mulf %421, %423 : vector<4x64xf32>
    %425 = arith.addf %420, %424 : vector<4x64xf32>
    %c3_113 = arith.constant 3 : index
    %c0_114 = arith.constant 0 : index
    %426 = vector.load %arg15[%c3_113, %c0_114] : memref<20x80xf32, #tpu.memory_space<vmem>>, vector<4x80xf32>
    %427 = vector.extract_strided_slice %426 {offsets = [0, 0], sizes = [4, 64], strides = [1, 1]} : vector<4x80xf32> to vector<4x64xf32>
    %428 = vector.extract_strided_slice %341 {offsets = [15, 0], sizes = [1, 64], strides = [1, 1]} : vector<25x64xf32> to vector<1x64xf32>
    %429 = vector.broadcast %428 : vector<1x64xf32> to vector<4x64xf32>
    %430 = arith.mulf %427, %429 : vector<4x64xf32>
    %431 = arith.addf %425, %430 : vector<4x64xf32>
    %432 = vector.extract_strided_slice %426 {offsets = [0, 4], sizes = [4, 64], strides = [1, 1]} : vector<4x80xf32> to vector<4x64xf32>
    %433 = vector.extract_strided_slice %341 {offsets = [16, 0], sizes = [1, 64], strides = [1, 1]} : vector<25x64xf32> to vector<1x64xf32>
    %434 = vector.broadcast %433 : vector<1x64xf32> to vector<4x64xf32>
    %435 = arith.mulf %432, %434 : vector<4x64xf32>
    %436 = arith.addf %431, %435 : vector<4x64xf32>
    %437 = vector.extract_strided_slice %426 {offsets = [0, 8], sizes = [4, 64], strides = [1, 1]} : vector<4x80xf32> to vector<4x64xf32>
    %438 = vector.extract_strided_slice %341 {offsets = [17, 0], sizes = [1, 64], strides = [1, 1]} : vector<25x64xf32> to vector<1x64xf32>
    %439 = vector.broadcast %438 : vector<1x64xf32> to vector<4x64xf32>
    %440 = arith.mulf %437, %439 : vector<4x64xf32>
    %441 = arith.addf %436, %440 : vector<4x64xf32>
    %442 = vector.extract_strided_slice %426 {offsets = [0, 12], sizes = [4, 64], strides = [1, 1]} : vector<4x80xf32> to vector<4x64xf32>
    %443 = vector.extract_strided_slice %341 {offsets = [18, 0], sizes = [1, 64], strides = [1, 1]} : vector<25x64xf32> to vector<1x64xf32>
    %444 = vector.broadcast %443 : vector<1x64xf32> to vector<4x64xf32>
    %445 = arith.mulf %442, %444 : vector<4x64xf32>
    %446 = arith.addf %441, %445 : vector<4x64xf32>
    %447 = vector.extract_strided_slice %426 {offsets = [0, 16], sizes = [4, 64], strides = [1, 1]} : vector<4x80xf32> to vector<4x64xf32>
    %448 = vector.extract_strided_slice %341 {offsets = [19, 0], sizes = [1, 64], strides = [1, 1]} : vector<25x64xf32> to vector<1x64xf32>
    %449 = vector.broadcast %448 : vector<1x64xf32> to vector<4x64xf32>
    %450 = arith.mulf %447, %449 : vector<4x64xf32>
    %451 = arith.addf %446, %450 : vector<4x64xf32>
    %c4_115 = arith.constant 4 : index
    %c0_116 = arith.constant 0 : index
    %452 = vector.load %arg15[%c4_115, %c0_116] : memref<20x80xf32, #tpu.memory_space<vmem>>, vector<4x80xf32>
    %453 = vector.extract_strided_slice %452 {offsets = [0, 0], sizes = [4, 64], strides = [1, 1]} : vector<4x80xf32> to vector<4x64xf32>
    %454 = vector.extract_strided_slice %341 {offsets = [20, 0], sizes = [1, 64], strides = [1, 1]} : vector<25x64xf32> to vector<1x64xf32>
    %455 = vector.broadcast %454 : vector<1x64xf32> to vector<4x64xf32>
    %456 = arith.mulf %453, %455 : vector<4x64xf32>
    %457 = arith.addf %451, %456 : vector<4x64xf32>
    %458 = vector.extract_strided_slice %452 {offsets = [0, 4], sizes = [4, 64], strides = [1, 1]} : vector<4x80xf32> to vector<4x64xf32>
    %459 = vector.extract_strided_slice %341 {offsets = [21, 0], sizes = [1, 64], strides = [1, 1]} : vector<25x64xf32> to vector<1x64xf32>
    %460 = vector.broadcast %459 : vector<1x64xf32> to vector<4x64xf32>
    %461 = arith.mulf %458, %460 : vector<4x64xf32>
    %462 = arith.addf %457, %461 : vector<4x64xf32>
    %463 = vector.extract_strided_slice %452 {offsets = [0, 8], sizes = [4, 64], strides = [1, 1]} : vector<4x80xf32> to vector<4x64xf32>
    %464 = vector.extract_strided_slice %341 {offsets = [22, 0], sizes = [1, 64], strides = [1, 1]} : vector<25x64xf32> to vector<1x64xf32>
    %465 = vector.broadcast %464 : vector<1x64xf32> to vector<4x64xf32>
    %466 = arith.mulf %463, %465 : vector<4x64xf32>
    %467 = arith.addf %462, %466 : vector<4x64xf32>
    %468 = vector.extract_strided_slice %452 {offsets = [0, 12], sizes = [4, 64], strides = [1, 1]} : vector<4x80xf32> to vector<4x64xf32>
    %469 = vector.extract_strided_slice %341 {offsets = [23, 0], sizes = [1, 64], strides = [1, 1]} : vector<25x64xf32> to vector<1x64xf32>
    %470 = vector.broadcast %469 : vector<1x64xf32> to vector<4x64xf32>
    %471 = arith.mulf %468, %470 : vector<4x64xf32>
    %472 = arith.addf %467, %471 : vector<4x64xf32>
    %473 = vector.extract_strided_slice %452 {offsets = [0, 16], sizes = [4, 64], strides = [1, 1]} : vector<4x80xf32> to vector<4x64xf32>
    %474 = vector.extract_strided_slice %341 {offsets = [24, 0], sizes = [1, 64], strides = [1, 1]} : vector<25x64xf32> to vector<1x64xf32>
    %475 = vector.broadcast %474 : vector<1x64xf32> to vector<4x64xf32>
    %476 = arith.mulf %473, %475 : vector<4x64xf32>
    %477 = arith.addf %472, %476 : vector<4x64xf32>
    %478 = vector.extract_strided_slice %343 {offsets = [0, 0], sizes = [1, 64], strides = [1, 1]} : vector<3x64xf32> to vector<1x64xf32>
    %479 = vector.broadcast %478 : vector<1x64xf32> to vector<4x64xf32>
    %480 = arith.addf %477, %479 : vector<4x64xf32>
    %cst_117 = arith.constant 0.000000e+00 : f32
    %481 = vector.broadcast %cst_117 : f32 to vector<4x64xf32>
    %482 = arith.maximumf %480, %481 : vector<4x64xf32>
    %483 = vector.extract_strided_slice %343 {offsets = [1, 0], sizes = [1, 64], strides = [1, 1]} : vector<3x64xf32> to vector<1x64xf32>
    %484 = vector.broadcast %483 : vector<1x64xf32> to vector<4x64xf32>
    %485 = arith.mulf %482, %484 : vector<4x64xf32>
    %486 = vector.extract_strided_slice %343 {offsets = [2, 0], sizes = [1, 64], strides = [1, 1]} : vector<3x64xf32> to vector<1x64xf32>
    %487 = vector.broadcast %486 : vector<1x64xf32> to vector<4x64xf32>
    %488 = arith.addf %485, %487 : vector<4x64xf32>
    %cst_118 = arith.constant 0xFF800000 : f32
    %489 = vector.broadcast %cst_118 : f32 to vector<4x4xf32>
    %c0_119 = arith.constant 0 : index
    %c0_120 = arith.constant 0 : index
    %490 = vector.load %arg15[%c0_119, %c0_120] : memref<20x80xf32, #tpu.memory_space<vmem>>, vector<4x4xf32>
    tpu.vector_store %arg15[%c0_119, %c0_120], %489 {strides = array<i32>} : memref<20x80xf32, #tpu.memory_space<vmem>>, vector<4x4xf32>,
    %c0_121 = arith.constant 0 : index
    %c4_122 = arith.constant 4 : index
    %491 = vector.load %arg15[%c0_121, %c4_122] : memref<20x80xf32, #tpu.memory_space<vmem>>, vector<4x64xf32>
    tpu.vector_store %arg15[%c0_121, %c4_122], %488 {strides = array<i32>} : memref<20x80xf32, #tpu.memory_space<vmem>>, vector<4x64xf32>,
    %cst_123 = arith.constant 0xFF800000 : f32
    %492 = vector.broadcast %cst_123 : f32 to vector<4x4xf32>
    %c0_124 = arith.constant 0 : index
    %c68_125 = arith.constant 68 : index
    %493 = vector.load %arg15[%c0_124, %c68_125] : memref<20x80xf32, #tpu.memory_space<vmem>>, vector<4x4xf32>
    tpu.vector_store %arg15[%c0_124, %c68_125], %492 {strides = array<i32>} : memref<20x80xf32, #tpu.memory_space<vmem>>, vector<4x4xf32>,
    %c0_126 = arith.constant 0 : index
    %c0_127 = arith.constant 0 : index
    %494 = vector.load %arg15[%c0_126, %c0_127] : memref<20x80xf32, #tpu.memory_space<vmem>>, vector<4x64xf32>
    %c0_128 = arith.constant 0 : index
    %c4_129 = arith.constant 4 : index
    %495 = vector.load %arg15[%c0_128, %c4_129] : memref<20x80xf32, #tpu.memory_space<vmem>>, vector<4x64xf32>
    %496 = arith.maximumf %494, %495 : vector<4x64xf32>
    %c0_130 = arith.constant 0 : index
    %c8_131 = arith.constant 8 : index
    %497 = vector.load %arg15[%c0_130, %c8_131] : memref<20x80xf32, #tpu.memory_space<vmem>>, vector<4x64xf32>
    %498 = arith.maximumf %496, %497 : vector<4x64xf32>
    %cst_132 = arith.constant 0xFF800000 : f32
    %499 = vector.broadcast %cst_132 : f32 to vector<1x64xf32>
    %c0_133 = arith.constant 0 : index
    %c0_134 = arith.constant 0 : index
    %500 = vector.load %arg15[%c0_133, %c0_134] : memref<20x80xf32, #tpu.memory_space<vmem>>, vector<1x64xf32>
    tpu.vector_store %arg15[%c0_133, %c0_134], %499 {strides = array<i32>} : memref<20x80xf32, #tpu.memory_space<vmem>>, vector<1x64xf32>,
    %c1_135 = arith.constant 1 : index
    %c0_136 = arith.constant 0 : index
    %501 = vector.load %arg15[%c1_135, %c0_136] : memref<20x80xf32, #tpu.memory_space<vmem>>, vector<4x64xf32>
    tpu.vector_store %arg15[%c1_135, %c0_136], %498 {strides = array<i32>} : memref<20x80xf32, #tpu.memory_space<vmem>>, vector<4x64xf32>,
    %cst_137 = arith.constant 0xFF800000 : f32
    %502 = vector.broadcast %cst_137 : f32 to vector<1x64xf32>
    %c5 = arith.constant 5 : index
    %c0_138 = arith.constant 0 : index
    %503 = vector.load %arg15[%c5, %c0_138] : memref<20x80xf32, #tpu.memory_space<vmem>>, vector<1x64xf32>
    tpu.vector_store %arg15[%c5, %c0_138], %502 {strides = array<i32>} : memref<20x80xf32, #tpu.memory_space<vmem>>, vector<1x64xf32>,
    %c0_139 = arith.constant 0 : index
    %c0_140 = arith.constant 0 : index
    %504 = tpu.strided_load %arg15[%c0_139, %c0_140] {strides = array<i32: 2, 1>} : memref<20x80xf32, #tpu.memory_space<vmem>>, vector<2x64xf32>
    %c1_141 = arith.constant 1 : index
    %c0_142 = arith.constant 0 : index
    %505 = tpu.strided_load %arg15[%c1_141, %c0_142] {strides = array<i32: 2, 1>} : memref<20x80xf32, #tpu.memory_space<vmem>>, vector<2x64xf32>
    %506 = arith.maximumf %504, %505 : vector<2x64xf32>
    %c2_143 = arith.constant 2 : index
    %c0_144 = arith.constant 0 : index
    %507 = tpu.strided_load %arg15[%c2_143, %c0_144] {strides = array<i32: 2, 1>} : memref<20x80xf32, #tpu.memory_space<vmem>>, vector<2x64xf32>
    %508 = arith.maximumf %506, %507 : vector<2x64xf32>
    %cst_145 = arith.constant dense<0.000000e+00> : vector<64xf32>
    %509 = vector.multi_reduction <add>, %508, %cst_145 [0] : vector<2x64xf32> to vector<64xf32>
    %510 = vector.shape_cast %509 : vector<64xf32> to vector<1x64xf32>
    %c0_146 = arith.constant 0 : index
    %c0_147 = arith.constant 0 : index
    %c0_148 = arith.constant 0 : index
    %511 = vector.load %arg6[%c0_146, %c0_147, %c0_148] : memref<2x64x4xf32, #tpu.memory_space<vmem>>, vector<1x64x4xf32>
    %512 = vector.shape_cast %511 : vector<1x64x4xf32> to vector<64x4xf32>
    %cst_149 = arith.constant dense<0.000000e+00> : vector<1x4xf32>
    %513 = tpu.matmul %510, %512, %cst_149 {dimension_numbers = #tpu.dot_dimension_numbers<[1], [0], [0], [1], [0, 0, 1, 1], [], []>} : vector<1x64xf32>, vector<64x4xf32>, vector<1x4xf32> -> vector<1x4xf32>
    %cst_150 = arith.constant 0.000000e+00 : f32
    %514 = vector.broadcast %cst_150 : f32 to vector<1x4xf32>
    %515 = arith.maximumf %513, %514 : vector<1x4xf32>
    %c0_151 = arith.constant 0 : index
    %c0_152 = arith.constant 0 : index
    %c0_153 = arith.constant 0 : index
    %516 = vector.load %arg7[%c0_151, %c0_152, %c0_153] : memref<2x4x64xf32, #tpu.memory_space<vmem>>, vector<1x4x64xf32>
    %517 = vector.shape_cast %516 : vector<1x4x64xf32> to vector<4x64xf32>
    %cst_154 = arith.constant dense<0.000000e+00> : vector<1x64xf32>
    %518 = tpu.matmul %515, %517, %cst_154 {dimension_numbers = #tpu.dot_dimension_numbers<[1], [0], [0], [1], [0, 0, 1, 1], [], []>} : vector<1x4xf32>, vector<4x64xf32>, vector<1x64xf32> -> vector<1x64xf32>
    %519 = arith.negf %518 : vector<1x64xf32>
    %520 = math.exp %519 : vector<1x64xf32>
    %cst_155 = arith.constant 1.000000e+00 : f32
    %521 = vector.broadcast %cst_155 : f32 to vector<1x64xf32>
    %522 = arith.addf %521, %520 : vector<1x64xf32>
    %523 = arith.divf %521, %522 : vector<1x64xf32>
    %524 = vector.broadcast %523 : vector<1x64xf32> to vector<2x64xf32>
    %525 = arith.mulf %508, %524 : vector<2x64xf32>
    %c0_156 = arith.constant 0 : index
    %c0_157 = arith.constant 0 : index
    %c0_158 = arith.constant 0 : index
    %526 = vector.load %arg5[%c0_156, %c0_157, %c0_158] : memref<2x3x64xf32, #tpu.memory_space<vmem>>, vector<1x3x64xf32>
    %527 = vector.shape_cast %526 : vector<1x3x64xf32> to vector<3x64xf32>
    %cst_159 = arith.constant 0.000000e+00 : f32
    %528 = vector.broadcast %cst_159 : f32 to vector<20x80xf32>
    %c0_160 = arith.constant 0 : index
    %c0_161 = arith.constant 0 : index
    %529 = vector.load %arg15[%c0_160, %c0_161] : memref<20x80xf32, #tpu.memory_space<vmem>>, vector<20x80xf32>
    tpu.vector_store %arg15[%c0_160, %c0_161], %528 {strides = array<i32>} : memref<20x80xf32, #tpu.memory_space<vmem>>, vector<20x80xf32>,
    %c1_162 = arith.constant 1 : index
    %c0_163 = arith.constant 0 : index
    %530 = vector.load %arg15[%c1_162, %c0_163] : memref<20x80xf32, #tpu.memory_space<vmem>>, vector<2x64xf32>
    tpu.vector_store %arg15[%c1_162, %c0_163], %525 {strides = array<i32>} : memref<20x80xf32, #tpu.memory_space<vmem>>, vector<2x64xf32>,
    %cst_164 = arith.constant 0.000000e+00 : f32
    %531 = vector.broadcast %cst_164 : f32 to vector<2x64xf32>
    %c0_165 = arith.constant 0 : index
    %c0_166 = arith.constant 0 : index
    %532 = vector.load %arg15[%c0_165, %c0_166] : memref<20x80xf32, #tpu.memory_space<vmem>>, vector<2x64xf32>
    %c0_167 = arith.constant 0 : index
    %c0_168 = arith.constant 0 : index
    %c0_169 = arith.constant 0 : index
    %c0_170 = arith.constant 0 : index
    %533 = vector.load %arg4[%c0_167, %c0_168, %c0_169, %c0_170] : memref<2x3x64x64xf32, #tpu.memory_space<vmem>>, vector<1x1x64x64xf32>
    %534 = vector.shape_cast %533 : vector<1x1x64x64xf32> to vector<64x64xf32>
    %cst_171 = arith.constant dense<0.000000e+00> : vector<2x64xf32>
    %535 = tpu.matmul %532, %534, %cst_171 {dimension_numbers = #tpu.dot_dimension_numbers<[1], [0], [0], [1], [0, 0, 1, 1], [], []>} : vector<2x64xf32>, vector<64x64xf32>, vector<2x64xf32> -> vector<2x64xf32>
    %536 = arith.addf %531, %535 : vector<2x64xf32>
    %c1_172 = arith.constant 1 : index
    %c0_173 = arith.constant 0 : index
    %537 = vector.load %arg15[%c1_172, %c0_173] : memref<20x80xf32, #tpu.memory_space<vmem>>, vector<2x64xf32>
    %c0_174 = arith.constant 0 : index
    %c1_175 = arith.constant 1 : index
    %c0_176 = arith.constant 0 : index
    %c0_177 = arith.constant 0 : index
    %538 = vector.load %arg4[%c0_174, %c1_175, %c0_176, %c0_177] : memref<2x3x64x64xf32, #tpu.memory_space<vmem>>, vector<1x1x64x64xf32>
    %539 = vector.shape_cast %538 : vector<1x1x64x64xf32> to vector<64x64xf32>
    %cst_178 = arith.constant dense<0.000000e+00> : vector<2x64xf32>
    %540 = tpu.matmul %537, %539, %cst_178 {dimension_numbers = #tpu.dot_dimension_numbers<[1], [0], [0], [1], [0, 0, 1, 1], [], []>} : vector<2x64xf32>, vector<64x64xf32>, vector<2x64xf32> -> vector<2x64xf32>
    %541 = arith.addf %536, %540 : vector<2x64xf32>
    %c2_179 = arith.constant 2 : index
    %c0_180 = arith.constant 0 : index
    %542 = vector.load %arg15[%c2_179, %c0_180] : memref<20x80xf32, #tpu.memory_space<vmem>>, vector<2x64xf32>
    %c0_181 = arith.constant 0 : index
    %c2_182 = arith.constant 2 : index
    %c0_183 = arith.constant 0 : index
    %c0_184 = arith.constant 0 : index
    %543 = vector.load %arg4[%c0_181, %c2_182, %c0_183, %c0_184] : memref<2x3x64x64xf32, #tpu.memory_space<vmem>>, vector<1x1x64x64xf32>
    %544 = vector.shape_cast %543 : vector<1x1x64x64xf32> to vector<64x64xf32>
    %cst_185 = arith.constant dense<0.000000e+00> : vector<2x64xf32>
    %545 = tpu.matmul %542, %544, %cst_185 {dimension_numbers = #tpu.dot_dimension_numbers<[1], [0], [0], [1], [0, 0, 1, 1], [], []>} : vector<2x64xf32>, vector<64x64xf32>, vector<2x64xf32> -> vector<2x64xf32>
    %546 = arith.addf %541, %545 : vector<2x64xf32>
    %547 = vector.extract_strided_slice %527 {offsets = [0, 0], sizes = [1, 64], strides = [1, 1]} : vector<3x64xf32> to vector<1x64xf32>
    %548 = vector.broadcast %547 : vector<1x64xf32> to vector<2x64xf32>
    %549 = arith.addf %546, %548 : vector<2x64xf32>
    %cst_186 = arith.constant 0.000000e+00 : f32
    %550 = vector.broadcast %cst_186 : f32 to vector<2x64xf32>
    %551 = arith.maximumf %549, %550 : vector<2x64xf32>
    %552 = vector.extract_strided_slice %527 {offsets = [1, 0], sizes = [1, 64], strides = [1, 1]} : vector<3x64xf32> to vector<1x64xf32>
    %553 = vector.broadcast %552 : vector<1x64xf32> to vector<2x64xf32>
    %554 = arith.mulf %551, %553 : vector<2x64xf32>
    %555 = vector.extract_strided_slice %527 {offsets = [2, 0], sizes = [1, 64], strides = [1, 1]} : vector<3x64xf32> to vector<1x64xf32>
    %556 = vector.broadcast %555 : vector<1x64xf32> to vector<2x64xf32>
    %557 = arith.addf %554, %556 : vector<2x64xf32>
    %c3_187 = arith.constant 3 : index
    %c0_188 = arith.constant 0 : index
    %c0_189 = arith.constant 0 : index
    %558 = vector.load %arg2[%c3_187, %c0_188, %c0_189] : memref<4x25x64xf32, #tpu.memory_space<vmem>>, vector<1x25x64xf32>
    %559 = vector.shape_cast %558 : vector<1x25x64xf32> to vector<25x64xf32>
    %c3_190 = arith.constant 3 : index
    %c0_191 = arith.constant 0 : index
    %c0_192 = arith.constant 0 : index
    %560 = vector.load %arg3[%c3_190, %c0_191, %c0_192] : memref<4x3x64xf32, #tpu.memory_space<vmem>>, vector<1x3x64xf32>
    %561 = vector.shape_cast %560 : vector<1x3x64xf32> to vector<3x64xf32>
    %cst_193 = arith.constant 0.000000e+00 : f32
    %562 = vector.broadcast %cst_193 : f32 to vector<20x80xf32>
    %c0_194 = arith.constant 0 : index
    %c0_195 = arith.constant 0 : index
    %563 = vector.load %arg15[%c0_194, %c0_195] : memref<20x80xf32, #tpu.memory_space<vmem>>, vector<20x80xf32>
    tpu.vector_store %arg15[%c0_194, %c0_195], %562 {strides = array<i32>} : memref<20x80xf32, #tpu.memory_space<vmem>>, vector<20x80xf32>,
    %c2_196 = arith.constant 2 : index
    %c8_197 = arith.constant 8 : index
    %564 = vector.load %arg15[%c2_196, %c8_197] : memref<20x80xf32, #tpu.memory_space<vmem>>, vector<2x64xf32>
    tpu.vector_store %arg15[%c2_196, %c8_197], %557 {strides = array<i32>} : memref<20x80xf32, #tpu.memory_space<vmem>>, vector<2x64xf32>,
    %cst_198 = arith.constant 0.000000e+00 : f32
    %565 = vector.broadcast %cst_198 : f32 to vector<2x64xf32>
    %c0_199 = arith.constant 0 : index
    %c0_200 = arith.constant 0 : index
    %566 = vector.load %arg15[%c0_199, %c0_200] : memref<20x80xf32, #tpu.memory_space<vmem>>, vector<2x80xf32>
    %567 = vector.extract_strided_slice %566 {offsets = [0, 0], sizes = [2, 64], strides = [1, 1]} : vector<2x80xf32> to vector<2x64xf32>
    %568 = vector.extract_strided_slice %559 {offsets = [0, 0], sizes = [1, 64], strides = [1, 1]} : vector<25x64xf32> to vector<1x64xf32>
    %569 = vector.broadcast %568 : vector<1x64xf32> to vector<2x64xf32>
    %570 = arith.mulf %567, %569 : vector<2x64xf32>
    %571 = arith.addf %565, %570 : vector<2x64xf32>
    %572 = vector.extract_strided_slice %566 {offsets = [0, 4], sizes = [2, 64], strides = [1, 1]} : vector<2x80xf32> to vector<2x64xf32>
    %573 = vector.extract_strided_slice %559 {offsets = [1, 0], sizes = [1, 64], strides = [1, 1]} : vector<25x64xf32> to vector<1x64xf32>
    %574 = vector.broadcast %573 : vector<1x64xf32> to vector<2x64xf32>
    %575 = arith.mulf %572, %574 : vector<2x64xf32>
    %576 = arith.addf %571, %575 : vector<2x64xf32>
    %577 = vector.extract_strided_slice %566 {offsets = [0, 8], sizes = [2, 64], strides = [1, 1]} : vector<2x80xf32> to vector<2x64xf32>
    %578 = vector.extract_strided_slice %559 {offsets = [2, 0], sizes = [1, 64], strides = [1, 1]} : vector<25x64xf32> to vector<1x64xf32>
    %579 = vector.broadcast %578 : vector<1x64xf32> to vector<2x64xf32>
    %580 = arith.mulf %577, %579 : vector<2x64xf32>
    %581 = arith.addf %576, %580 : vector<2x64xf32>
    %582 = vector.extract_strided_slice %566 {offsets = [0, 12], sizes = [2, 64], strides = [1, 1]} : vector<2x80xf32> to vector<2x64xf32>
    %583 = vector.extract_strided_slice %559 {offsets = [3, 0], sizes = [1, 64], strides = [1, 1]} : vector<25x64xf32> to vector<1x64xf32>
    %584 = vector.broadcast %583 : vector<1x64xf32> to vector<2x64xf32>
    %585 = arith.mulf %582, %584 : vector<2x64xf32>
    %586 = arith.addf %581, %585 : vector<2x64xf32>
    %587 = vector.extract_strided_slice %566 {offsets = [0, 16], sizes = [2, 64], strides = [1, 1]} : vector<2x80xf32> to vector<2x64xf32>
    %588 = vector.extract_strided_slice %559 {offsets = [4, 0], sizes = [1, 64], strides = [1, 1]} : vector<25x64xf32> to vector<1x64xf32>
    %589 = vector.broadcast %588 : vector<1x64xf32> to vector<2x64xf32>
    %590 = arith.mulf %587, %589 : vector<2x64xf32>
    %591 = arith.addf %586, %590 : vector<2x64xf32>
    %c1_201 = arith.constant 1 : index
    %c0_202 = arith.constant 0 : index
    %592 = vector.load %arg15[%c1_201, %c0_202] : memref<20x80xf32, #tpu.memory_space<vmem>>, vector<2x80xf32>
    %593 = vector.extract_strided_slice %592 {offsets = [0, 0], sizes = [2, 64], strides = [1, 1]} : vector<2x80xf32> to vector<2x64xf32>
    %594 = vector.extract_strided_slice %559 {offsets = [5, 0], sizes = [1, 64], strides = [1, 1]} : vector<25x64xf32> to vector<1x64xf32>
    %595 = vector.broadcast %594 : vector<1x64xf32> to vector<2x64xf32>
    %596 = arith.mulf %593, %595 : vector<2x64xf32>
    %597 = arith.addf %591, %596 : vector<2x64xf32>
    %598 = vector.extract_strided_slice %592 {offsets = [0, 4], sizes = [2, 64], strides = [1, 1]} : vector<2x80xf32> to vector<2x64xf32>
    %599 = vector.extract_strided_slice %559 {offsets = [6, 0], sizes = [1, 64], strides = [1, 1]} : vector<25x64xf32> to vector<1x64xf32>
    %600 = vector.broadcast %599 : vector<1x64xf32> to vector<2x64xf32>
    %601 = arith.mulf %598, %600 : vector<2x64xf32>
    %602 = arith.addf %597, %601 : vector<2x64xf32>
    %603 = vector.extract_strided_slice %592 {offsets = [0, 8], sizes = [2, 64], strides = [1, 1]} : vector<2x80xf32> to vector<2x64xf32>
    %604 = vector.extract_strided_slice %559 {offsets = [7, 0], sizes = [1, 64], strides = [1, 1]} : vector<25x64xf32> to vector<1x64xf32>
    %605 = vector.broadcast %604 : vector<1x64xf32> to vector<2x64xf32>
    %606 = arith.mulf %603, %605 : vector<2x64xf32>
    %607 = arith.addf %602, %606 : vector<2x64xf32>
    %608 = vector.extract_strided_slice %592 {offsets = [0, 12], sizes = [2, 64], strides = [1, 1]} : vector<2x80xf32> to vector<2x64xf32>
    %609 = vector.extract_strided_slice %559 {offsets = [8, 0], sizes = [1, 64], strides = [1, 1]} : vector<25x64xf32> to vector<1x64xf32>
    %610 = vector.broadcast %609 : vector<1x64xf32> to vector<2x64xf32>
    %611 = arith.mulf %608, %610 : vector<2x64xf32>
    %612 = arith.addf %607, %611 : vector<2x64xf32>
    %613 = vector.extract_strided_slice %592 {offsets = [0, 16], sizes = [2, 64], strides = [1, 1]} : vector<2x80xf32> to vector<2x64xf32>
    %614 = vector.extract_strided_slice %559 {offsets = [9, 0], sizes = [1, 64], strides = [1, 1]} : vector<25x64xf32> to vector<1x64xf32>
    %615 = vector.broadcast %614 : vector<1x64xf32> to vector<2x64xf32>
    %616 = arith.mulf %613, %615 : vector<2x64xf32>
    %617 = arith.addf %612, %616 : vector<2x64xf32>
    %c2_203 = arith.constant 2 : index
    %c0_204 = arith.constant 0 : index
    %618 = vector.load %arg15[%c2_203, %c0_204] : memref<20x80xf32, #tpu.memory_space<vmem>>, vector<2x80xf32>
    %619 = vector.extract_strided_slice %618 {offsets = [0, 0], sizes = [2, 64], strides = [1, 1]} : vector<2x80xf32> to vector<2x64xf32>
    %620 = vector.extract_strided_slice %559 {offsets = [10, 0], sizes = [1, 64], strides = [1, 1]} : vector<25x64xf32> to vector<1x64xf32>
    %621 = vector.broadcast %620 : vector<1x64xf32> to vector<2x64xf32>
    %622 = arith.mulf %619, %621 : vector<2x64xf32>
    %623 = arith.addf %617, %622 : vector<2x64xf32>
    %624 = vector.extract_strided_slice %618 {offsets = [0, 4], sizes = [2, 64], strides = [1, 1]} : vector<2x80xf32> to vector<2x64xf32>
    %625 = vector.extract_strided_slice %559 {offsets = [11, 0], sizes = [1, 64], strides = [1, 1]} : vector<25x64xf32> to vector<1x64xf32>
    %626 = vector.broadcast %625 : vector<1x64xf32> to vector<2x64xf32>
    %627 = arith.mulf %624, %626 : vector<2x64xf32>
    %628 = arith.addf %623, %627 : vector<2x64xf32>
    %629 = vector.extract_strided_slice %618 {offsets = [0, 8], sizes = [2, 64], strides = [1, 1]} : vector<2x80xf32> to vector<2x64xf32>
    %630 = vector.extract_strided_slice %559 {offsets = [12, 0], sizes = [1, 64], strides = [1, 1]} : vector<25x64xf32> to vector<1x64xf32>
    %631 = vector.broadcast %630 : vector<1x64xf32> to vector<2x64xf32>
    %632 = arith.mulf %629, %631 : vector<2x64xf32>
    %633 = arith.addf %628, %632 : vector<2x64xf32>
    %634 = vector.extract_strided_slice %618 {offsets = [0, 12], sizes = [2, 64], strides = [1, 1]} : vector<2x80xf32> to vector<2x64xf32>
    %635 = vector.extract_strided_slice %559 {offsets = [13, 0], sizes = [1, 64], strides = [1, 1]} : vector<25x64xf32> to vector<1x64xf32>
    %636 = vector.broadcast %635 : vector<1x64xf32> to vector<2x64xf32>
    %637 = arith.mulf %634, %636 : vector<2x64xf32>
    %638 = arith.addf %633, %637 : vector<2x64xf32>
    %639 = vector.extract_strided_slice %618 {offsets = [0, 16], sizes = [2, 64], strides = [1, 1]} : vector<2x80xf32> to vector<2x64xf32>
    %640 = vector.extract_strided_slice %559 {offsets = [14, 0], sizes = [1, 64], strides = [1, 1]} : vector<25x64xf32> to vector<1x64xf32>
    %641 = vector.broadcast %640 : vector<1x64xf32> to vector<2x64xf32>
    %642 = arith.mulf %639, %641 : vector<2x64xf32>
    %643 = arith.addf %638, %642 : vector<2x64xf32>
    %c3_205 = arith.constant 3 : index
    %c0_206 = arith.constant 0 : index
    %644 = vector.load %arg15[%c3_205, %c0_206] : memref<20x80xf32, #tpu.memory_space<vmem>>, vector<2x80xf32>
    %645 = vector.extract_strided_slice %644 {offsets = [0, 0], sizes = [2, 64], strides = [1, 1]} : vector<2x80xf32> to vector<2x64xf32>
    %646 = vector.extract_strided_slice %559 {offsets = [15, 0], sizes = [1, 64], strides = [1, 1]} : vector<25x64xf32> to vector<1x64xf32>
    %647 = vector.broadcast %646 : vector<1x64xf32> to vector<2x64xf32>
    %648 = arith.mulf %645, %647 : vector<2x64xf32>
    %649 = arith.addf %643, %648 : vector<2x64xf32>
    %650 = vector.extract_strided_slice %644 {offsets = [0, 4], sizes = [2, 64], strides = [1, 1]} : vector<2x80xf32> to vector<2x64xf32>
    %651 = vector.extract_strided_slice %559 {offsets = [16, 0], sizes = [1, 64], strides = [1, 1]} : vector<25x64xf32> to vector<1x64xf32>
    %652 = vector.broadcast %651 : vector<1x64xf32> to vector<2x64xf32>
    %653 = arith.mulf %650, %652 : vector<2x64xf32>
    %654 = arith.addf %649, %653 : vector<2x64xf32>
    %655 = vector.extract_strided_slice %644 {offsets = [0, 8], sizes = [2, 64], strides = [1, 1]} : vector<2x80xf32> to vector<2x64xf32>
    %656 = vector.extract_strided_slice %559 {offsets = [17, 0], sizes = [1, 64], strides = [1, 1]} : vector<25x64xf32> to vector<1x64xf32>
    %657 = vector.broadcast %656 : vector<1x64xf32> to vector<2x64xf32>
    %658 = arith.mulf %655, %657 : vector<2x64xf32>
    %659 = arith.addf %654, %658 : vector<2x64xf32>
    %660 = vector.extract_strided_slice %644 {offsets = [0, 12], sizes = [2, 64], strides = [1, 1]} : vector<2x80xf32> to vector<2x64xf32>
    %661 = vector.extract_strided_slice %559 {offsets = [18, 0], sizes = [1, 64], strides = [1, 1]} : vector<25x64xf32> to vector<1x64xf32>
    %662 = vector.broadcast %661 : vector<1x64xf32> to vector<2x64xf32>
    %663 = arith.mulf %660, %662 : vector<2x64xf32>
    %664 = arith.addf %659, %663 : vector<2x64xf32>
    %665 = vector.extract_strided_slice %644 {offsets = [0, 16], sizes = [2, 64], strides = [1, 1]} : vector<2x80xf32> to vector<2x64xf32>
    %666 = vector.extract_strided_slice %559 {offsets = [19, 0], sizes = [1, 64], strides = [1, 1]} : vector<25x64xf32> to vector<1x64xf32>
    %667 = vector.broadcast %666 : vector<1x64xf32> to vector<2x64xf32>
    %668 = arith.mulf %665, %667 : vector<2x64xf32>
    %669 = arith.addf %664, %668 : vector<2x64xf32>
    %c4_207 = arith.constant 4 : index
    %c0_208 = arith.constant 0 : index
    %670 = vector.load %arg15[%c4_207, %c0_208] : memref<20x80xf32, #tpu.memory_space<vmem>>, vector<2x80xf32>
    %671 = vector.extract_strided_slice %670 {offsets = [0, 0], sizes = [2, 64], strides = [1, 1]} : vector<2x80xf32> to vector<2x64xf32>
    %672 = vector.extract_strided_slice %559 {offsets = [20, 0], sizes = [1, 64], strides = [1, 1]} : vector<25x64xf32> to vector<1x64xf32>
    %673 = vector.broadcast %672 : vector<1x64xf32> to vector<2x64xf32>
    %674 = arith.mulf %671, %673 : vector<2x64xf32>
    %675 = arith.addf %669, %674 : vector<2x64xf32>
    %676 = vector.extract_strided_slice %670 {offsets = [0, 4], sizes = [2, 64], strides = [1, 1]} : vector<2x80xf32> to vector<2x64xf32>
    %677 = vector.extract_strided_slice %559 {offsets = [21, 0], sizes = [1, 64], strides = [1, 1]} : vector<25x64xf32> to vector<1x64xf32>
    %678 = vector.broadcast %677 : vector<1x64xf32> to vector<2x64xf32>
    %679 = arith.mulf %676, %678 : vector<2x64xf32>
    %680 = arith.addf %675, %679 : vector<2x64xf32>
    %681 = vector.extract_strided_slice %670 {offsets = [0, 8], sizes = [2, 64], strides = [1, 1]} : vector<2x80xf32> to vector<2x64xf32>
    %682 = vector.extract_strided_slice %559 {offsets = [22, 0], sizes = [1, 64], strides = [1, 1]} : vector<25x64xf32> to vector<1x64xf32>
    %683 = vector.broadcast %682 : vector<1x64xf32> to vector<2x64xf32>
    %684 = arith.mulf %681, %683 : vector<2x64xf32>
    %685 = arith.addf %680, %684 : vector<2x64xf32>
    %686 = vector.extract_strided_slice %670 {offsets = [0, 12], sizes = [2, 64], strides = [1, 1]} : vector<2x80xf32> to vector<2x64xf32>
    %687 = vector.extract_strided_slice %559 {offsets = [23, 0], sizes = [1, 64], strides = [1, 1]} : vector<25x64xf32> to vector<1x64xf32>
    %688 = vector.broadcast %687 : vector<1x64xf32> to vector<2x64xf32>
    %689 = arith.mulf %686, %688 : vector<2x64xf32>
    %690 = arith.addf %685, %689 : vector<2x64xf32>
    %691 = vector.extract_strided_slice %670 {offsets = [0, 16], sizes = [2, 64], strides = [1, 1]} : vector<2x80xf32> to vector<2x64xf32>
    %692 = vector.extract_strided_slice %559 {offsets = [24, 0], sizes = [1, 64], strides = [1, 1]} : vector<25x64xf32> to vector<1x64xf32>
    %693 = vector.broadcast %692 : vector<1x64xf32> to vector<2x64xf32>
    %694 = arith.mulf %691, %693 : vector<2x64xf32>
    %695 = arith.addf %690, %694 : vector<2x64xf32>
    %696 = vector.extract_strided_slice %561 {offsets = [0, 0], sizes = [1, 64], strides = [1, 1]} : vector<3x64xf32> to vector<1x64xf32>
    %697 = vector.broadcast %696 : vector<1x64xf32> to vector<2x64xf32>
    %698 = arith.addf %695, %697 : vector<2x64xf32>
    %cst_209 = arith.constant 0.000000e+00 : f32
    %699 = vector.broadcast %cst_209 : f32 to vector<2x64xf32>
    %700 = arith.maximumf %698, %699 : vector<2x64xf32>
    %701 = vector.extract_strided_slice %561 {offsets = [1, 0], sizes = [1, 64], strides = [1, 1]} : vector<3x64xf32> to vector<1x64xf32>
    %702 = vector.broadcast %701 : vector<1x64xf32> to vector<2x64xf32>
    %703 = arith.mulf %700, %702 : vector<2x64xf32>
    %704 = vector.extract_strided_slice %561 {offsets = [2, 0], sizes = [1, 64], strides = [1, 1]} : vector<3x64xf32> to vector<1x64xf32>
    %705 = vector.broadcast %704 : vector<1x64xf32> to vector<2x64xf32>
    %706 = arith.addf %703, %705 : vector<2x64xf32>
    %cst_210 = arith.constant 0xFF800000 : f32
    %707 = vector.broadcast %cst_210 : f32 to vector<2x4xf32>
    %c0_211 = arith.constant 0 : index
    %c0_212 = arith.constant 0 : index
    %708 = vector.load %arg15[%c0_211, %c0_212] : memref<20x80xf32, #tpu.memory_space<vmem>>, vector<2x4xf32>
    tpu.vector_store %arg15[%c0_211, %c0_212], %707 {strides = array<i32>} : memref<20x80xf32, #tpu.memory_space<vmem>>, vector<2x4xf32>,
    %c0_213 = arith.constant 0 : index
    %c4_214 = arith.constant 4 : index
    %709 = vector.load %arg15[%c0_213, %c4_214] : memref<20x80xf32, #tpu.memory_space<vmem>>, vector<2x64xf32>
    tpu.vector_store %arg15[%c0_213, %c4_214], %706 {strides = array<i32>} : memref<20x80xf32, #tpu.memory_space<vmem>>, vector<2x64xf32>,
    %cst_215 = arith.constant 0xFF800000 : f32
    %710 = vector.broadcast %cst_215 : f32 to vector<2x4xf32>
    %c0_216 = arith.constant 0 : index
    %c68_217 = arith.constant 68 : index
    %711 = vector.load %arg15[%c0_216, %c68_217] : memref<20x80xf32, #tpu.memory_space<vmem>>, vector<2x4xf32>
    tpu.vector_store %arg15[%c0_216, %c68_217], %710 {strides = array<i32>} : memref<20x80xf32, #tpu.memory_space<vmem>>, vector<2x4xf32>,
    %c0_218 = arith.constant 0 : index
    %c0_219 = arith.constant 0 : index
    %712 = vector.load %arg15[%c0_218, %c0_219] : memref<20x80xf32, #tpu.memory_space<vmem>>, vector<2x64xf32>
    %c0_220 = arith.constant 0 : index
    %c4_221 = arith.constant 4 : index
    %713 = vector.load %arg15[%c0_220, %c4_221] : memref<20x80xf32, #tpu.memory_space<vmem>>, vector<2x64xf32>
    %714 = arith.maximumf %712, %713 : vector<2x64xf32>
    %c0_222 = arith.constant 0 : index
    %c8_223 = arith.constant 8 : index
    %715 = vector.load %arg15[%c0_222, %c8_223] : memref<20x80xf32, #tpu.memory_space<vmem>>, vector<2x64xf32>
    %716 = arith.maximumf %714, %715 : vector<2x64xf32>
    %cst_224 = arith.constant 0xFF800000 : f32
    %717 = vector.broadcast %cst_224 : f32 to vector<1x64xf32>
    %c0_225 = arith.constant 0 : index
    %c0_226 = arith.constant 0 : index
    %718 = vector.load %arg15[%c0_225, %c0_226] : memref<20x80xf32, #tpu.memory_space<vmem>>, vector<1x64xf32>
    tpu.vector_store %arg15[%c0_225, %c0_226], %717 {strides = array<i32>} : memref<20x80xf32, #tpu.memory_space<vmem>>, vector<1x64xf32>,
    %c1_227 = arith.constant 1 : index
    %c0_228 = arith.constant 0 : index
    %719 = vector.load %arg15[%c1_227, %c0_228] : memref<20x80xf32, #tpu.memory_space<vmem>>, vector<2x64xf32>
    tpu.vector_store %arg15[%c1_227, %c0_228], %716 {strides = array<i32>} : memref<20x80xf32, #tpu.memory_space<vmem>>, vector<2x64xf32>,
    %cst_229 = arith.constant 0xFF800000 : f32
    %720 = vector.broadcast %cst_229 : f32 to vector<1x64xf32>
    %c3_230 = arith.constant 3 : index
    %c0_231 = arith.constant 0 : index
    %721 = vector.load %arg15[%c3_230, %c0_231] : memref<20x80xf32, #tpu.memory_space<vmem>>, vector<1x64xf32>
    tpu.vector_store %arg15[%c3_230, %c0_231], %720 {strides = array<i32>} : memref<20x80xf32, #tpu.memory_space<vmem>>, vector<1x64xf32>,
    %c0_232 = arith.constant 0 : index
    %c0_233 = arith.constant 0 : index
    %722 = tpu.strided_load %arg15[%c0_232, %c0_233] {strides = array<i32: 2, 1>} : memref<20x80xf32, #tpu.memory_space<vmem>>, vector<1x64xf32>
    %c1_234 = arith.constant 1 : index
    %c0_235 = arith.constant 0 : index
    %723 = tpu.strided_load %arg15[%c1_234, %c0_235] {strides = array<i32: 2, 1>} : memref<20x80xf32, #tpu.memory_space<vmem>>, vector<1x64xf32>
    %724 = arith.maximumf %722, %723 : vector<1x64xf32>
    %c2_236 = arith.constant 2 : index
    %c0_237 = arith.constant 0 : index
    %725 = tpu.strided_load %arg15[%c2_236, %c0_237] {strides = array<i32: 2, 1>} : memref<20x80xf32, #tpu.memory_space<vmem>>, vector<1x64xf32>
    %726 = arith.maximumf %724, %725 : vector<1x64xf32>
    %cst_238 = arith.constant dense<0.000000e+00> : vector<64xf32>
    %727 = vector.multi_reduction <add>, %726, %cst_238 [0] : vector<1x64xf32> to vector<64xf32>
    %728 = vector.shape_cast %727 : vector<64xf32> to vector<1x64xf32>
    %c1_239 = arith.constant 1 : index
    %c0_240 = arith.constant 0 : index
    %c0_241 = arith.constant 0 : index
    %729 = vector.load %arg6[%c1_239, %c0_240, %c0_241] : memref<2x64x4xf32, #tpu.memory_space<vmem>>, vector<1x64x4xf32>
    %730 = vector.shape_cast %729 : vector<1x64x4xf32> to vector<64x4xf32>
    %cst_242 = arith.constant dense<0.000000e+00> : vector<1x4xf32>
    %731 = tpu.matmul %728, %730, %cst_242 {dimension_numbers = #tpu.dot_dimension_numbers<[1], [0], [0], [1], [0, 0, 1, 1], [], []>} : vector<1x64xf32>, vector<64x4xf32>, vector<1x4xf32> -> vector<1x4xf32>
    %cst_243 = arith.constant 0.000000e+00 : f32
    %732 = vector.broadcast %cst_243 : f32 to vector<1x4xf32>
    %733 = arith.maximumf %731, %732 : vector<1x4xf32>
    %c1_244 = arith.constant 1 : index
    %c0_245 = arith.constant 0 : index
    %c0_246 = arith.constant 0 : index
    %734 = vector.load %arg7[%c1_244, %c0_245, %c0_246] : memref<2x4x64xf32, #tpu.memory_space<vmem>>, vector<1x4x64xf32>
    %735 = vector.shape_cast %734 : vector<1x4x64xf32> to vector<4x64xf32>
    %cst_247 = arith.constant dense<0.000000e+00> : vector<1x64xf32>
    %736 = tpu.matmul %733, %735, %cst_247 {dimension_numbers = #tpu.dot_dimension_numbers<[1], [0], [0], [1], [0, 0, 1, 1], [], []>} : vector<1x4xf32>, vector<4x64xf32>, vector<1x64xf32> -> vector<1x64xf32>
    %737 = arith.negf %736 : vector<1x64xf32>
    %738 = math.exp %737 : vector<1x64xf32>
    %cst_248 = arith.constant 1.000000e+00 : f32
    %739 = vector.broadcast %cst_248 : f32 to vector<1x64xf32>
    %740 = arith.addf %739, %738 : vector<1x64xf32>
    %741 = arith.divf %739, %740 : vector<1x64xf32>
    %742 = arith.mulf %726, %741 : vector<1x64xf32>
    %c1_249 = arith.constant 1 : index
    %c0_250 = arith.constant 0 : index
    %c0_251 = arith.constant 0 : index
    %743 = vector.load %arg5[%c1_249, %c0_250, %c0_251] : memref<2x3x64xf32, #tpu.memory_space<vmem>>, vector<1x3x64xf32>
    %744 = vector.shape_cast %743 : vector<1x3x64xf32> to vector<3x64xf32>
    %cst_252 = arith.constant 0.000000e+00 : f32
    %745 = vector.broadcast %cst_252 : f32 to vector<20x80xf32>
    %c0_253 = arith.constant 0 : index
    %c0_254 = arith.constant 0 : index
    %746 = vector.load %arg15[%c0_253, %c0_254] : memref<20x80xf32, #tpu.memory_space<vmem>>, vector<20x80xf32>
    tpu.vector_store %arg15[%c0_253, %c0_254], %745 {strides = array<i32>} : memref<20x80xf32, #tpu.memory_space<vmem>>, vector<20x80xf32>,
    %c1_255 = arith.constant 1 : index
    %c0_256 = arith.constant 0 : index
    %747 = vector.load %arg15[%c1_255, %c0_256] : memref<20x80xf32, #tpu.memory_space<vmem>>, vector<1x64xf32>
    tpu.vector_store %arg15[%c1_255, %c0_256], %742 {strides = array<i32>} : memref<20x80xf32, #tpu.memory_space<vmem>>, vector<1x64xf32>,
    %cst_257 = arith.constant 0.000000e+00 : f32
    %748 = vector.broadcast %cst_257 : f32 to vector<1x64xf32>
    %c0_258 = arith.constant 0 : index
    %c0_259 = arith.constant 0 : index
    %749 = vector.load %arg15[%c0_258, %c0_259] : memref<20x80xf32, #tpu.memory_space<vmem>>, vector<1x64xf32>
    %c1_260 = arith.constant 1 : index
    %c0_261 = arith.constant 0 : index
    %c0_262 = arith.constant 0 : index
    %c0_263 = arith.constant 0 : index
    %750 = vector.load %arg4[%c1_260, %c0_261, %c0_262, %c0_263] : memref<2x3x64x64xf32, #tpu.memory_space<vmem>>, vector<1x1x64x64xf32>
    %751 = vector.shape_cast %750 : vector<1x1x64x64xf32> to vector<64x64xf32>
    %cst_264 = arith.constant dense<0.000000e+00> : vector<1x64xf32>
    %752 = tpu.matmul %749, %751, %cst_264 {dimension_numbers = #tpu.dot_dimension_numbers<[1], [0], [0], [1], [0, 0, 1, 1], [], []>} : vector<1x64xf32>, vector<64x64xf32>, vector<1x64xf32> -> vector<1x64xf32>
    %753 = arith.addf %748, %752 : vector<1x64xf32>
    %c1_265 = arith.constant 1 : index
    %c0_266 = arith.constant 0 : index
    %754 = vector.load %arg15[%c1_265, %c0_266] : memref<20x80xf32, #tpu.memory_space<vmem>>, vector<1x64xf32>
    %c1_267 = arith.constant 1 : index
    %c1_268 = arith.constant 1 : index
    %c0_269 = arith.constant 0 : index
    %c0_270 = arith.constant 0 : index
    %755 = vector.load %arg4[%c1_267, %c1_268, %c0_269, %c0_270] : memref<2x3x64x64xf32, #tpu.memory_space<vmem>>, vector<1x1x64x64xf32>
    %756 = vector.shape_cast %755 : vector<1x1x64x64xf32> to vector<64x64xf32>
    %cst_271 = arith.constant dense<0.000000e+00> : vector<1x64xf32>
    %757 = tpu.matmul %754, %756, %cst_271 {dimension_numbers = #tpu.dot_dimension_numbers<[1], [0], [0], [1], [0, 0, 1, 1], [], []>} : vector<1x64xf32>, vector<64x64xf32>, vector<1x64xf32> -> vector<1x64xf32>
    %758 = arith.addf %753, %757 : vector<1x64xf32>
    %c2_272 = arith.constant 2 : index
    %c0_273 = arith.constant 0 : index
    %759 = vector.load %arg15[%c2_272, %c0_273] : memref<20x80xf32, #tpu.memory_space<vmem>>, vector<1x64xf32>
    %c1_274 = arith.constant 1 : index
    %c2_275 = arith.constant 2 : index
    %c0_276 = arith.constant 0 : index
    %c0_277 = arith.constant 0 : index
    %760 = vector.load %arg4[%c1_274, %c2_275, %c0_276, %c0_277] : memref<2x3x64x64xf32, #tpu.memory_space<vmem>>, vector<1x1x64x64xf32>
    %761 = vector.shape_cast %760 : vector<1x1x64x64xf32> to vector<64x64xf32>
    %cst_278 = arith.constant dense<0.000000e+00> : vector<1x64xf32>
    %762 = tpu.matmul %759, %761, %cst_278 {dimension_numbers = #tpu.dot_dimension_numbers<[1], [0], [0], [1], [0, 0, 1, 1], [], []>} : vector<1x64xf32>, vector<64x64xf32>, vector<1x64xf32> -> vector<1x64xf32>
    %763 = arith.addf %758, %762 : vector<1x64xf32>
    %764 = vector.extract_strided_slice %744 {offsets = [0, 0], sizes = [1, 64], strides = [1, 1]} : vector<3x64xf32> to vector<1x64xf32>
    %765 = arith.addf %763, %764 : vector<1x64xf32>
    %cst_279 = arith.constant 0.000000e+00 : f32
    %766 = vector.broadcast %cst_279 : f32 to vector<1x64xf32>
    %767 = arith.maximumf %765, %766 : vector<1x64xf32>
    %768 = vector.extract_strided_slice %744 {offsets = [1, 0], sizes = [1, 64], strides = [1, 1]} : vector<3x64xf32> to vector<1x64xf32>
    %769 = arith.mulf %767, %768 : vector<1x64xf32>
    %770 = vector.extract_strided_slice %744 {offsets = [2, 0], sizes = [1, 64], strides = [1, 1]} : vector<3x64xf32> to vector<1x64xf32>
    %771 = arith.addf %769, %770 : vector<1x64xf32>
    %c0_280 = arith.constant 0 : index
    %c0_281 = arith.constant 0 : index
    %772 = vector.load %arg8[%c0_280, %c0_281] : memref<1x64xf32, #tpu.memory_space<vmem>>, vector<1x64xf32>
    %773 = arith.mulf %771, %772 : vector<1x64xf32>
    %cst_282 = arith.constant dense<0.000000e+00> : vector<64xf32>
    %774 = vector.multi_reduction <add>, %773, %cst_282 [0] : vector<1x64xf32> to vector<64xf32>
    %775 = vector.shape_cast %774 : vector<64xf32> to vector<1x64xf32>
    %c0_283 = arith.constant 0 : index
    %c0_284 = arith.constant 0 : index
    %776 = vector.load %arg9[%c0_283, %c0_284] : memref<1x64xf32, #tpu.memory_space<vmem>>, vector<1x64xf32>
    %777 = arith.addf %775, %776 : vector<1x64xf32>
    %cst_285 = arith.constant 0.000000e+00 : f32
    %778 = vector.broadcast %cst_285 : f32 to vector<1x64xf32>
    %779 = arith.maximumf %777, %778 : vector<1x64xf32>
    %c0_286 = arith.constant 0 : index
    %c0_287 = arith.constant 0 : index
    %780 = vector.load %arg10[%c0_286, %c0_287] : memref<64x64xf32, #tpu.memory_space<vmem>>, vector<64x64xf32>
    %cst_288 = arith.constant dense<0.000000e+00> : vector<1x64xf32>
    %781 = tpu.matmul %779, %780, %cst_288 {dimension_numbers = #tpu.dot_dimension_numbers<[1], [0], [0], [1], [0, 0, 1, 1], [], []>} : vector<1x64xf32>, vector<64x64xf32>, vector<1x64xf32> -> vector<1x64xf32>
    %c0_289 = arith.constant 0 : index
    %c0_290 = arith.constant 0 : index
    %782 = vector.load %arg11[%c0_289, %c0_290] : memref<1x64xf32, #tpu.memory_space<vmem>>, vector<1x64xf32>
    %783 = arith.addf %781, %782 : vector<1x64xf32>
    %cst_291 = arith.constant 0.000000e+00 : f32
    %784 = vector.broadcast %cst_291 : f32 to vector<1x64xf32>
    %785 = arith.maximumf %783, %784 : vector<1x64xf32>
    %c0_292 = arith.constant 0 : index
    %c0_293 = arith.constant 0 : index
    %786 = vector.load %arg12[%c0_292, %c0_293] : memref<64x5xf32, #tpu.memory_space<vmem>>, vector<64x5xf32>
    %cst_294 = arith.constant dense<0.000000e+00> : vector<1x5xf32>
    %787 = tpu.matmul %785, %786, %cst_294 {dimension_numbers = #tpu.dot_dimension_numbers<[1], [0], [0], [1], [0, 0, 1, 1], [], []>} : vector<1x64xf32>, vector<64x5xf32>, vector<1x5xf32> -> vector<1x5xf32>
    %c0_295 = arith.constant 0 : index
    %c0_296 = arith.constant 0 : index
    %788 = vector.load %arg13[%c0_295, %c0_296] : memref<1x5xf32, #tpu.memory_space<vmem>>, vector<1x5xf32>
    %789 = arith.addf %787, %788 : vector<1x5xf32>
    %c0_297 = arith.constant 0 : index
    %c0_298 = arith.constant 0 : index
    %c0_299 = arith.constant 0 : index
    %790 = vector.load %arg14[%c0_297, %c0_298, %c0_299] : memref<1x1x5xf32, #tpu.memory_space<vmem>>, vector<1x1x5xf32>
    %791 = vector.shape_cast %790 : vector<1x1x5xf32> to vector<1x5xf32>
    %792 = vector.shape_cast %789 : vector<1x5xf32> to vector<1x1x5xf32>
    tpu.vector_store %arg14[%c0_297, %c0_298, %c0_299], %792 {strides = array<i32>} : memref<1x1x5xf32, #tpu.memory_space<vmem>>, vector<1x1x5xf32>,
    return
  }
  func.func @transform_0(%arg0: i32) -> (i32, i32, i32) {
    %c0_i32 = arith.constant 0 : i32
    %c0_i32_0 = arith.constant 0 : i32
    %c0_i32_1 = arith.constant 0 : i32
    return %arg0, %c0_i32, %c0_i32_0 : i32, i32, i32
  }
  func.func @transform_1(%arg0: i32) -> (i32, i32, i32) {
    %c0_i32 = arith.constant 0 : i32
    %c0_i32_0 = arith.constant 0 : i32
    %c0_i32_1 = arith.constant 0 : i32
    %c0_i32_2 = arith.constant 0 : i32
    return %c0_i32, %c0_i32_0, %c0_i32_1 : i32, i32, i32
  }
  func.func @transform_2(%arg0: i32) -> (i32, i32, i32) {
    %c0_i32 = arith.constant 0 : i32
    %c0_i32_0 = arith.constant 0 : i32
    %c0_i32_1 = arith.constant 0 : i32
    %c0_i32_2 = arith.constant 0 : i32
    return %c0_i32, %c0_i32_0, %c0_i32_1 : i32, i32, i32
  }
  func.func @transform_3(%arg0: i32) -> (i32, i32, i32, i32) {
    %c0_i32 = arith.constant 0 : i32
    %c0_i32_0 = arith.constant 0 : i32
    %c0_i32_1 = arith.constant 0 : i32
    %c0_i32_2 = arith.constant 0 : i32
    %c0_i32_3 = arith.constant 0 : i32
    return %c0_i32, %c0_i32_0, %c0_i32_1, %c0_i32_2 : i32, i32, i32, i32
  }
  func.func @transform_4(%arg0: i32) -> (i32, i32, i32) {
    %c0_i32 = arith.constant 0 : i32
    %c0_i32_0 = arith.constant 0 : i32
    %c0_i32_1 = arith.constant 0 : i32
    %c0_i32_2 = arith.constant 0 : i32
    return %c0_i32, %c0_i32_0, %c0_i32_1 : i32, i32, i32
  }
  func.func @transform_5(%arg0: i32) -> (i32, i32, i32) {
    %c0_i32 = arith.constant 0 : i32
    %c0_i32_0 = arith.constant 0 : i32
    %c0_i32_1 = arith.constant 0 : i32
    %c0_i32_2 = arith.constant 0 : i32
    return %c0_i32, %c0_i32_0, %c0_i32_1 : i32, i32, i32
  }
  func.func @transform_6(%arg0: i32) -> (i32, i32, i32) {
    %c0_i32 = arith.constant 0 : i32
    %c0_i32_0 = arith.constant 0 : i32
    %c0_i32_1 = arith.constant 0 : i32
    %c0_i32_2 = arith.constant 0 : i32
    return %c0_i32, %c0_i32_0, %c0_i32_1 : i32, i32, i32
  }
  func.func @transform_7(%arg0: i32) -> (i32, i32) {
    %c0_i32 = arith.constant 0 : i32
    %c0_i32_0 = arith.constant 0 : i32
    %c0_i32_1 = arith.constant 0 : i32
    return %c0_i32, %c0_i32_0 : i32, i32
  }
  func.func @transform_8(%arg0: i32) -> (i32, i32) {
    %c0_i32 = arith.constant 0 : i32
    %c0_i32_0 = arith.constant 0 : i32
    %c0_i32_1 = arith.constant 0 : i32
    return %c0_i32, %c0_i32_0 : i32, i32
  }
  func.func @transform_9(%arg0: i32) -> (i32, i32) {
    %c0_i32 = arith.constant 0 : i32
    %c0_i32_0 = arith.constant 0 : i32
    %c0_i32_1 = arith.constant 0 : i32
    return %c0_i32, %c0_i32_0 : i32, i32
  }
  func.func @transform_10(%arg0: i32) -> (i32, i32) {
    %c0_i32 = arith.constant 0 : i32
    %c0_i32_0 = arith.constant 0 : i32
    %c0_i32_1 = arith.constant 0 : i32
    return %c0_i32, %c0_i32_0 : i32, i32
  }
  func.func @transform_11(%arg0: i32) -> (i32, i32) {
    %c0_i32 = arith.constant 0 : i32
    %c0_i32_0 = arith.constant 0 : i32
    %c0_i32_1 = arith.constant 0 : i32
    return %c0_i32, %c0_i32_0 : i32, i32
  }
  func.func @transform_12(%arg0: i32) -> (i32, i32) {
    %c0_i32 = arith.constant 0 : i32
    %c0_i32_0 = arith.constant 0 : i32
    %c0_i32_1 = arith.constant 0 : i32
    return %c0_i32, %c0_i32_0 : i32, i32
  }
  func.func @transform_13(%arg0: i32) -> (i32, i32, i32) {
    %c0_i32 = arith.constant 0 : i32
    %c0_i32_0 = arith.constant 0 : i32
    %c0_i32_1 = arith.constant 0 : i32
    return %arg0, %c0_i32, %c0_i32_0 : i32, i32, i32
  }
}

</mosaic_0001>

<bundles_post_ra>
// kernel: tpu_custom_call.1
= control target key start
LH: loop header
LB: loop body
LE: loop exit
PB: predicated region body
PF: predicated region fallthrough
CT: control target
= control target key end

     0   :  { %s5216_s0 = inlined_call_operand.vmem [shape: f32[2,16,64], index: 0, kind: input, shape index: {}]   ;;  %s5217_s1 = inlined_call_operand.vmem [shape: f32[4,25,64], index: 1, kind: input, shape index: {}]   ;;  %s5218_s2 = inlined_call_operand.vmem [shape: f32[4,3,64], index: 2, kind: input, shape index: {}]   ;;  %s5219_s3 = inlined_call_operand.vmem [shape: f32[2,3,64,64], index: 3, kind: input, shape index: {}]   ;;  %s5220_s4 = inlined_call_operand.vmem [shape: f32[2,3,64], index: 4, kind: input, shape index: {}]   ;;  %s5221_s5 = inlined_call_operand.vmem [shape: f32[2,64,4], index: 5, kind: input, shape index: {}]   ;;  %s5222_s6 = inlined_call_operand.hbm [shape: f32[2,4,64], index: 6, kind: input, shape index: {}]   ;;  %s5223_s7 = inlined_call_operand.vmem [shape: f32[1,64], index: 7, kind: input, shape index: {}]   ;;  %s5224_s8 = inlined_call_operand.vmem [shape: f32[1,64], index: 8, kind: input, shape index: {}]   ;;  %s5225_s9 = inlined_call_operand.vmem [shape: f32[64,64], index: 9, kind: input, shape index: {}]   ;;  %s5226_s10 = inlined_call_operand.vmem [shape: f32[1,64], index: 10, kind: input, shape index: {}]   ;;  %s5227_s11 = inlined_call_operand.vmem [shape: f32[64,5], index: 11, kind: input, shape index: {}]   ;;  %s5228_s12 = inlined_call_operand.vmem [shape: f32[1,5], index: 12, kind: input, shape index: {}]   ;;  %s5229_s13 = inlined_call_operand.hbm [shape: f32[2,1,5], index: 13, kind: output, shape index: {}]  }
   0x1   :  { %5253 = sst [smem:[#allocation13_spill]] %s5216_s0 }
   0x2   :  { %5254 = sst [smem:[#allocation14_spill]] %s5222_s6 }
   0x3   :  { %18 = vsyncpa [#allocation4], 0 }
   0x4   :  { %19 = vsyncpa [#allocation5], 0 }
   0x5   :  { %21 = vsyncpa [#allocation5 + $0x1], 0  ;;  %s4018_s25 = smov 0   ;;  %s4020_s26 = smov 0  }
   0x6   :  { %s4022_s27 = smov 0   ;;  %s4024_s28 = smov 0  }
   0x7 LB: > { %5255 = sst [smem:[#allocation9_spill]] %s3926_s27  ;;  %s4039_s29 = sadd.s32 4294967295, %s3930_s28   ;;  %s3930_s28 = sphi %s4024_s28, %s5279_s28   ;;  %s3926_s27 = sphi %s4022_s27, %s5281_s27   ;;  %s3922_s26 = sphi %s4020_s26, %s5283_s26   ;;  %s3918_s25 = sphi %s4018_s25, %s5282_s25  }
   0x8   : > { %s3254_s30 = sadd.s32 4294967294, %s3930_s28   ;;  %s4043_s14 = sadd.s32 1, %s3930_s28  }
   0x9   : > { %5256 = sst [smem:[#allocation10_spill]] %s4043_s14  ;;  %s312_s15 = sadd.s32 1, %s3926_s27 }
   0xa   : > { %s309_s16 = ssub.s32 %s3930_s28, %s4043_s14  ;;  %p322_p0 = scmp.ne.s32.totalorder %s3926_s27, %s3922_s26 }
   0xb   : > { %p310_p1 = scmp.eq.s32.totalorder %s309_s16, 0  ;;  %p323_p2 = scmp.eq.s32.totalorder %s4039_s29, 1 }
   0xc   : > { %p328_p3 = scmp.ne.s32.totalorder %s3922_s26, %s3918_s25  ;;  %p329_p4 = scmp.eq.s32.totalorder %s3254_s30, 1 }
   0xd   : > { %s4054_s17 = scalar_select %p310_p1, %s3926_s27, %s312_s15  }
   0xe   : > { %p4056_p5 = por %p323_p2, %p322_p0  ;;  %p4060_p6 = por %p329_p4, %p328_p3 }
   0xf   : > { %5257 = sst [smem:[#allocation11_spill]] %s4054_s17  ;;  %p3255_p7 = scmp.ge.s32.totalorder %s3930_s28, 1 }
  0x10   : > { %s5258_s18 = scalar_select %p4056_p5, 1, 0 }
  0x11   : > { %s5259_s19 = scalar_select %p4060_p6, 1, 0 }
  0x12   : > { %p336_p8 = scmp.lt.s32.totalorder %s3930_s28, 3  ;;  %p5233_p9 = scmp.eq.s32.totalorder %s4039_s29, 0 }
  0x13   : > { %5260 = sst [smem:[#allocation12_spill]] %s5259_s19  ;;  %s3932_s21 = smov [#allocation3]  }
  0x14   : > { %p4067_p10 = pnand %p3255_p7, %p336_p8  ;;  %s363_s22 = sshll.u32 %s3932_s21, 4  ;;  %s364_s22 = int_to_ptr.vmem [resolvable:$true] %s363_s22 }
  0x15   : > { %s5263_s6 = sld [smem:[#allocation14_spill]] }
  0x16   : > { %s5261_s20 = scalar_select %p4067_p10, 1, 0 }
  0x17   : > { %p3770_p11 = pneg %p4067_p10 }
  0x19   : > { %p4075_p12 = pnand %p5233_p9, %p3770_p11 }
  0x1b   : > { %s3836_s15 = scalar_lea.hbm %s5263_s6, 128  ;;  %p3838_p0 = pneg %p4075_p12 }
  0x1c   : > { %p3837_p13 = scmp.ne.s32.totalorder %s5263_s6, %s3836_s15  ;;  %p3843_p3 = scmp.lt.u32.totalorder %s3836_s15, %s5263_s6 }
  0x1e   : > { %p3839_p1 = pnand %p3838_p0, %p3837_p13 }
  0x20   : > { %p3840_p2 = pneg %p3839_p1 }
  0x22   : > { %p3845_p4 = pnand %p3843_p3, %p3840_p2 }
  0x24   : > { %3848 = shalt.err (!%p3845_p4)
}
  0x25   : > { %s3849_s14 = scalar_lea.vmem %s364_s22, 128  ;;  %p3857_p9 = scmp.lt.s32.totalorder %s364_s22, %s364_s22 }
  0x26   : > { %p3850_p7 = scmp.ne.s32.totalorder %s364_s22, %s3849_s14  ;;  %p3858_p6 = scmp.lt.s32.totalorder %s3849_s14, %s3849_s14 }
  0x28   : > { %p3852_p8 = pnand %p3850_p7, %p3838_p0  ;;  %p3859_p5 = por %p3858_p6, %p3857_p9 }
  0x2a   : > { %p3853_p11 = pneg %p3852_p8 }
  0x2c   : > { %p3860_p10 = pnand %p3859_p5, %p3853_p11 }
  0x2e   : > { %3863 = shalt.err (!%p3860_p10)
}
  0x2f   : > { %s3933_s17 = smov 64   ;;  %s3934_s24 = smov 4  }
  0x30   : > { %3773 = dma.hbm_to_vmem [thread:$0]  (!%p4075_p12), %s5263_s6, 128, %s364_s22, [#allocation4], %s3933_s17, %s3933_s17, %s3934_s24  }
  0x31   : > { %p5264_p13 = scmp.ne.s32.totalorder %s5261_s20, 0 }
  0x32   : > { %p5265_p1 = scmp.eq.s32.totalorder (!%p5264_p13), %s4039_s29, 0 }
  0x33   : > { %405 = sbr.rel (%p5264_p13) target bundleno = 4170 (0x104a), region = 72 }
  0x3a   : > { %3909 = dma.done.wait (%p5265_p1), [#allocation4], 128   ;;  %p5266_p0 = pmov %p5265_p1 }
  0x3b   : > { %p448_p5 = scmp.lt.s32.totalorder %s4039_s29, 1  ;;  %v478_v0 = vlaneseq  ;;  %vm460_vm0 = vcmask 654336   ;;  %v3935_v1 = vmov 0.0   ;;  %vm463_vm1 = vcmask 650240   ;;  %s5267_s0 = sld [smem:[#allocation13_spill]]  ;;  %v4119_v6 = vld [vmem:[%s5217_s1] sm:$0xff] }
  0x3c   : > { %3911 = vsyncadd (%p5266_p0), [#allocation4], 4294967168  ;;  %461 = vst.msk [vmem:[#allocation2] sm:$0xff] %vm460_vm0, %v3935_v1  ;;  %s5244_s17 = smov 8   ;;  %s5246_s24 = smov 4   ;;  %v4149_v18 = vld [vmem:[%s5217_s1 + $0x8] sm:$0xff] }
  0x3d   : > { %462 = vst.msk [vmem:[#allocation2 + $0x8] sm:$0xff] %vm460_vm0, %v3935_v1  ;;  %s449_s27 = scalar_select %p448_p5, %s4039_s29, 1  ;;  %v479_v2 = vshrl.u32 %v478_v0, 7  ;;  %v4174_v26 = vld [vmem:[%s5217_s1 + $0x10] sm:$0xff]  ;;  %v3262_v35 = vld [vmem:[%s5217_s1 + $0x18] ss:$0 sm:$0xff] }
  0x3e   : > { %464 = vst.msk [vmem:[#allocation2 + $0x10] sm:$0xf] %vm463_vm1, %v3935_v1  ;;  %s5240_s30 = smov 12   ;;  %vm473_vm2 = vcmask 588864   ;;  %vm946_vm3 = vcmask 31744   ;;  %s5250_s21 = smov 124  }
  0x3f   : > { %s3349_s14 = sshll.u32 %s449_s27, 4  ;;  %v4109_v3 = vsub.s32 1, %v479_v2  ;;  %v4114_v4 = vsub.s32 2, %v479_v2  ;;  %v4124_v8 = vsub.s32 3, %v479_v2  ;;  %v4129_v11 = vsub.s32 4, %v479_v2  ;;  %s5248_s16 = smov 120  }
  0x40   : > { %v4134_v13 = vsub.s32 6, %v479_v2  ;;  %v4139_v15 = vsub.s32 7, %v479_v2  ;;  %v4144_v17 = vsub.s32 0, %v479_v2  ;;  %v4163_v23 = vsub.s32 5, %v479_v2  ;;  %s5238_s27 = smov 116   ;;  %s5236_s20 = smov 112  }
  0x41   : > { %s452_s23 = scalar_lea.vmem %s5267_s0, %s3349_s14  ;;  %v489_v7 = vrot.slane %v4119_v6, %v4109_v3  ;;  %v509_v10 = vrot.slane %v4119_v6, %v4114_v4  ;;  %v529_v12 = vrot.slane %v4119_v6, %v4124_v8  ;;  %v549_v14 = vrot.slane %v4119_v6, %v4129_v11  ;;  %s5242_s14 = smov 16  }
  0x42   : > { %v453_v5 = vld [vmem:[%s452_s23] sm:$0xff]  ;;  %v454_v9 = vld [vmem:[%s452_s23 + $0x8] sm:$0xff]  ;;  %v579_v16 = vrot.slane %v4119_v6, %v4134_v13  ;;  %v599_v19 = vrot.slane %v4119_v6, %v4139_v15  ;;  %v619_v20 = vrot.slane %v4149_v18, %v4144_v17  ;;  %v639_v21 = vrot.slane %v4149_v18, %v4109_v3  ;;  %s5268_s15 = smov 112   ;;  %s5269_s23 = smov 116  }
  0x43   : > { %467 = vrot.lane.b32.xlu0 %v453_v5, %s5244_s17  ;;  %491 = vrot.lane.b32.xlu1 %v489_v7, %s5246_s24  ;;  %v669_v22 = vrot.slane %v4149_v18, %v4124_v8  ;;  %v689_v24 = vrot.slane %v4149_v18, %v4129_v11  ;;  %v709_v25 = vrot.slane %v4149_v18, %v4163_v23  ;;  %vm983_vm4 = vcmask 516096   ;;  %p5276_p9 = scmp.ne.s32.totalorder %s5258_s18, 0 }
  0x44   : > { %v729_v27 = vrot.slane %v4149_v18, %v4134_v13  ;;  %v759_v28 = vrot.slane %v4174_v26, %v4144_v17  ;;  %v779_v29 = vrot.slane %v4174_v26, %v4109_v3  ;;  %v799_v30 = vrot.slane %v4174_v26, %v4114_v4 }
  0x45   : > { %v819_v31 = vrot.slane %v4174_v26, %v4124_v8  ;;  %v849_v32 = vrot.slane %v4174_v26, %v4163_v23  ;;  %v869_v33 = vrot.slane %v4174_v26, %v4134_v13  ;;  %v889_v34 = vrot.slane %v4174_v26, %v4139_v15 }
  0x46   : > { %v481_v38 = vrot.slane %v4119_v6, %v4144_v17  ;;  %v3941_v54 = vmov -inf   ;;  %vm957_vm5 = vcmask 556064   ;;  %vm960_vm6 = vcmask 589344  }
  0x47   : > { %469 = vrot.lane.b32.xlu0 %v454_v9, %s5244_s17  ;;  %511 = vrot.lane.b32.xlu1 %v509_v10, %s5244_s17  ;;  %vm985_vm7 = vcmask 523264   ;;  %vm1381_vm8 = vcmask 584768   ;;  %vm1714_vm9 = vcmask 27648   ;;  %vm1720_vm10 = vcmask 551968  }
  0x48   : > { %vm1722_vm11 = vcmask 585248   ;;  %vm3946_vm12 = vmmov 0   ;;  %vm1735_vm13 = vcmask 519168   ;;  %vm1743_vm14 = vcmask 517120  }
  0x49   : > { %3460 = vmatprep.mubr.msk.f32.mxu0 %vm3946_vm12, %v3935_v1  ;;  %3484 = vmatprep.mubr.msk.f32.mxu1 %vm3946_vm12, %v3935_v1  ;;  %vm1837_vm15 = vcmask 1043456  }
  0x4b   : > { %531 = vrot.lane.b32.xlu0 %v529_v12, %s5240_s30  ;;  %551 = vrot.lane.b32.xlu1 %v549_v14, %s5242_s14 }
  0x4f   : > { %581 = vrot.lane.b32.xlu0 %v579_v16, %s5246_s24  ;;  %601 = vrot.lane.b32.xlu1 %v599_v19, %s5244_s17 }
  0x53   : > { %621 = vrot.lane.b32.xlu0 %v619_v20, %s5240_s30  ;;  %641 = vrot.lane.b32.xlu1 %v639_v21, %s5242_s14 }
  0x57   : > { %671 = vrot.lane.b32.xlu0 %v669_v22, %s5246_s24  ;;  %691 = vrot.lane.b32.xlu1 %v689_v24, %s5244_s17 }
  0x5b   : > { %711 = vrot.lane.b32.xlu0 %v709_v25, %s5240_s30  ;;  %731 = vrot.lane.b32.xlu1 %v729_v27, %s5242_s14 }
  0x5f   : > { %761 = vrot.lane.b32.xlu0 %v759_v28, %s5246_s24  ;;  %781 = vrot.lane.b32.xlu1 %v779_v29, %s5244_s17 }
  0x63   : > { %801 = vrot.lane.b32.xlu0 %v799_v30, %s5240_s30  ;;  %821 = vrot.lane.b32.xlu1 %v819_v31, %s5242_s14 }
  0x67   : > { %851 = vrot.lane.b32.xlu0 %v849_v32, %s5246_s24  ;;  %871 = vrot.lane.b32.xlu1 %v869_v33, %s5244_s17 }
  0x6b   : > { %891 = vrot.lane.b32.xlu0 %v889_v34, %s5240_s30  ;;  %911 = vrot.lane.b32.xlu1 %v3262_v35, %s5242_s14 }
  0xb5   : > { %v468_v36 = vpop.permute.xlu0 %467  ;;  %v492_v39 = vpop.permute.xlu1 %491 }
  0xb6   : > { %474 = vst.msk [vmem:[#allocation2 + $0x2] sm:$0xff] %vm473_vm2, %v468_v36 }
  0xb9   : > { %v470_v37 = vpop.permute.xlu0 %469  ;;  %v512_v46 = vpop.permute.xlu1 %511 }
  0xba   : > { %475 = vst.msk [vmem:[#allocation2 + $0xa] sm:$0xff] %vm473_vm2, %v470_v37 }
  0xbd   : > { %v476_v40 = vld [vmem:[#allocation2] sm:$0xff]  ;;  %v532_v55 = vpop.permute.xlu0 %531  ;;  %v552_v60 = vpop.permute.xlu1 %551 }
  0xbe   : > { %v494_v41 = vmul.f32 %v492_v39, %v476_v40  ;;  %v4210_v42 = vmul.f32 %v481_v38, %v476_v40  ;;  %v4213_v43 = vld [vmem:[#allocation2 + $0x1] sm:$0xff]  ;;  %v514_v50 = vmul.f32 %v512_v46, %v476_v40  ;;  %v534_v58 = vmul.f32 %v532_v55, %v476_v40 }
  0xbf   : > { %v4215_v44 = vld [vmem:[#allocation2 + $0x2] sm:$0xff]  ;;  %v554_v61 = vmul.f32 %v552_v60, %v476_v40 }
  0xc0   : > { %498 = vrot.lane.b32.xlu0 %v494_v41, %s5250_s21 }
  0xc1   : > { %v477_v45 = vld [vmem:[#allocation2 + $0x8] sm:$0xff]  ;;  %v582_v63 = vpop.permute.xlu0 %581  ;;  %v602_v5 = vpop.permute.xlu1 %601 }
  0xc2   : > { %v4217_v47 = vld [vmem:[#allocation2 + $0x9] sm:$0xff]  ;;  %v495_v56 = vmul.f32 %v492_v39, %v477_v45  ;;  %v4231_v57 = vmul.f32 %v481_v38, %v477_v45  ;;  %v515_v59 = vmul.f32 %v512_v46, %v477_v45  ;;  %v535_v62 = vmul.f32 %v532_v55, %v477_v45 }
  0xc3   : > { %v4219_v48 = vld [vmem:[#allocation2 + $0x3] sm:$0xff]  ;;  %v4225_v52 = vld [vmem:[#allocation2 + $0xb] sm:$0xff]  ;;  %v584_v0 = vmul.f32 %v582_v63, %v4213_v43  ;;  %v555_v2 = vmul.f32 %v552_v60, %v477_v45  ;;  %v604_v7 = vmul.f32 %v602_v5, %v4213_v43  ;;  %v585_v9 = vmul.f32 %v582_v63, %v4217_v47 }
  0xc4   : > { %v4221_v49 = vld [vmem:[#allocation2 + $0x4] sm:$0xff]  ;;  %v4227_v53 = vld [vmem:[#allocation2 + $0xc] sm:$0xff]  ;;  %518 = vrot.lane.b32.xlu0 %v514_v50, %s5248_s16  ;;  %500 = vrot.lane.b32.xlu1 %v495_v56, %s5250_s21  ;;  %v605_v14 = vmul.f32 %v602_v5, %v4217_v47 }
  0xc5   : > { %v4223_v51 = vld [vmem:[#allocation2 + $0xa] sm:$0xff]  ;;  %947 = vst.msk [vmem:[#allocation2] sm:$0xff] %vm946_vm3, %v3941_v54  ;;  %v622_v10 = vpop.permute.xlu0 %621  ;;  %v642_v16 = vpop.permute.xlu1 %641 }
  0xc6   : > { %948 = vst.msk [vmem:[#allocation2 + $0x8] sm:$0xff] %vm946_vm3, %v3941_v54  ;;  %v624_v12 = vmul.f32 %v622_v10, %v4213_v43  ;;  %v644_v19 = vmul.f32 %v642_v16, %v4213_v43  ;;  %v625_v20 = vmul.f32 %v622_v10, %v4217_v47  ;;  %v645_v24 = vmul.f32 %v642_v16, %v4217_v47 }
  0xc7   : > { %988 = vst.msk [vmem:[#allocation2 + $0x11] sm:$0x1] %vm983_vm4, %v3941_v54 }
  0xc8   : > { %538 = vrot.lane.b32.xlu0 %v534_v58, %s5238_s27  ;;  %520 = vrot.lane.b32.xlu1 %v515_v59, %s5248_s16 }
  0xc9   : > { %v672_v21 = vpop.permute.xlu0 %671  ;;  %v692_v25 = vpop.permute.xlu1 %691 }
  0xca   : > { %v674_v22 = vmul.f32 %v672_v21, %v4215_v44  ;;  %v694_v27 = vmul.f32 %v692_v25, %v4215_v44  ;;  %v675_v28 = vmul.f32 %v672_v21, %v4223_v51  ;;  %v695_v31 = vmul.f32 %v692_v25, %v4223_v51 }
  0xcb   : > { %v571_v25 = vrot.slane %v4119_v6, %v4163_v23 }
  0xcc   : > { %558 = vrot.lane.b32.xlu0 %v554_v61, %s5236_s20  ;;  %540 = vrot.lane.b32.xlu1 %v535_v62, %s5238_s27 }
  0xcd   : > { %v712_v29 = vpop.permute.xlu0 %711  ;;  %v732_v32 = vpop.permute.xlu1 %731 }
  0xce   : > { %v714_v30 = vmul.f32 %v712_v29, %v4215_v44  ;;  %v734_v33 = vmul.f32 %v732_v32, %v4215_v44  ;;  %v715_v34 = vmul.f32 %v712_v29, %v4223_v51  ;;  %v735_v37 = vmul.f32 %v732_v32, %v4223_v51 }
  0xcf   : > { %v572_v32 = vmul.f32 %v571_v25, %v4213_v43 }
  0xd0   : > { %588 = vrot.lane.b32.xlu0 %v584_v0, %s5250_s21  ;;  %560 = vrot.lane.b32.xlu1 %v555_v2, %s5236_s20 }
  0xd1   : > { %v762_v35 = vpop.permute.xlu0 %761  ;;  %v782_v38 = vpop.permute.xlu1 %781 }
  0xd2   : > { %v764_v36 = vmul.f32 %v762_v35, %v4219_v48  ;;  %v784_v39 = vmul.f32 %v782_v38, %v4219_v48  ;;  %v765_v40 = vmul.f32 %v762_v35, %v4225_v52  ;;  %v785_v46 = vmul.f32 %v782_v38, %v4225_v52 }
  0xd3   : > { %v573_v38 = vmul.f32 %v571_v25, %v4217_v47 }
  0xd4   : > { %608 = vrot.lane.b32.xlu0 %v604_v7, %s5248_s16  ;;  %590 = vrot.lane.b32.xlu1 %v585_v9, %s5250_s21 }
  0xd5   : > { %v802_v41 = vpop.permute.xlu0 %801  ;;  %v822_v50 = vpop.permute.xlu1 %821 }
  0xd6   : > { %v804_v45 = vmul.f32 %v802_v41, %v4219_v48  ;;  %v824_v55 = vmul.f32 %v822_v50, %v4219_v48  ;;  %v805_v56 = vmul.f32 %v802_v41, %v4225_v52  ;;  %v825_v60 = vmul.f32 %v822_v50, %v4225_v52 }
  0xd7   : > { %v661_v50 = vrot.slane %v4149_v18, %v4114_v4 }
  0xd8   : > { %628 = vrot.lane.b32.xlu0 %v624_v12, %s5238_s27  ;;  %610 = vrot.lane.b32.xlu1 %v605_v14, %s5248_s16 }
  0xd9   : > { %v852_v58 = vpop.permute.xlu0 %851  ;;  %v872_v61 = vpop.permute.xlu1 %871 }
  0xda   : > { %v854_v59 = vmul.f32 %v852_v58, %v4221_v49  ;;  %v874_v62 = vmul.f32 %v872_v61, %v4221_v49  ;;  %v855_v63 = vmul.f32 %v852_v58, %v4227_v53  ;;  %v875_v5 = vmul.f32 %v872_v61, %v4227_v53 }
  0xdc   : > { %648 = vrot.lane.b32.xlu0 %v644_v19, %s5236_s20  ;;  %630 = vrot.lane.b32.xlu1 %v625_v20, %s5238_s27 }
  0xdd   : > { %v892_v0 = vpop.permute.xlu0 %891  ;;  %v912_v7 = vpop.permute.xlu1 %911 }
  0xde   : > { %v894_v2 = vmul.f32 %v892_v0, %v4221_v49  ;;  %v914_v9 = vmul.f32 %v912_v7, %v4221_v49  ;;  %v895_v10 = vmul.f32 %v892_v0, %v4227_v53  ;;  %v915_v12 = vmul.f32 %v912_v7, %v4227_v53 }
  0xe0   : > { %678 = vrot.lane.b32.xlu0 %v674_v22, %s5250_s21  ;;  %650 = vrot.lane.b32.xlu1 %v645_v24, %s5236_s20 }
  0xe4   : > { %698 = vrot.lane.b32.xlu0 %v694_v27, %s5248_s16  ;;  %680 = vrot.lane.b32.xlu1 %v675_v28, %s5250_s21 }
  0xe8   : > { %718 = vrot.lane.b32.xlu0 %v714_v30, %s5238_s27  ;;  %700 = vrot.lane.b32.xlu1 %v695_v31, %s5248_s16 }
  0xec   : > { %738 = vrot.lane.b32.xlu0 %v734_v33, %s5236_s20  ;;  %720 = vrot.lane.b32.xlu1 %v715_v34, %s5238_s27 }
  0xf0   : > { %768 = vrot.lane.b32.xlu0 %v764_v36, %s5250_s21  ;;  %740 = vrot.lane.b32.xlu1 %v735_v37, %s5236_s20 }
  0xf4   : > { %788 = vrot.lane.b32.xlu0 %v784_v39, %s5248_s16  ;;  %770 = vrot.lane.b32.xlu1 %v765_v40, %s5250_s21 }
  0xf8   : > { %808 = vrot.lane.b32.xlu0 %v804_v45, %s5238_s27  ;;  %790 = vrot.lane.b32.xlu1 %v785_v46, %s5248_s16 }
  0xfc   : > { %828 = vrot.lane.b32.xlu0 %v824_v55, %s5236_s20  ;;  %810 = vrot.lane.b32.xlu1 %v805_v56, %s5238_s27 }
 0x100   : > { %858 = vrot.lane.b32.xlu0 %v854_v59, %s5250_s21  ;;  %830 = vrot.lane.b32.xlu1 %v825_v60, %s5236_s20  ;;  %v662_v60 = vmul.f32 %v661_v50, %v4215_v44 }
 0x104   : > { %878 = vrot.lane.b32.xlu0 %v874_v62, %s5248_s16  ;;  %860 = vrot.lane.b32.xlu1 %v855_v63, %s5250_s21 }
 0x108   : > { %898 = vrot.lane.b32.xlu0 %v894_v2, %s5238_s27  ;;  %880 = vrot.lane.b32.xlu1 %v875_v5, %s5248_s16  ;;  %v663_v5 = vmul.f32 %v661_v50, %v4223_v51 }
 0x10c   : > { %918 = vrot.lane.b32.xlu0 %v914_v9, %s5236_s20  ;;  %900 = vrot.lane.b32.xlu1 %v895_v10, %s5238_s27 }
 0x110   : > { %920 = vrot.lane.b32.xlu1 %v915_v12, %s5236_s20 }
 0x132   : > { %v499_v14 = vpop.permute.xlu0 %498 }
 0x133   : > { %v504_v20 = vadd.f32 %v499_v14, %v4210_v42 }
 0x136   : > { %v519_v16 = vpop.permute.xlu0 %518  ;;  %v501_v19 = vpop.permute.xlu1 %500 }
 0x137   : > { %v524_v22 = vadd.f32 %v519_v16, %v504_v20  ;;  %v505_v28 = vadd.f32 %v501_v19, %v4231_v57  ;;  %v751_v20 = vrot.slane %v4149_v18, %v4139_v15 }
 0x13a   : > { %v539_v21 = vpop.permute.xlu0 %538  ;;  %v521_v24 = vpop.permute.xlu1 %520 }
 0x13b   : > { %v544_v27 = vadd.f32 %v539_v21, %v524_v22  ;;  %v525_v33 = vadd.f32 %v521_v24, %v505_v28 }
 0x13e   : > { %v559_v29 = vpop.permute.xlu0 %558  ;;  %v541_v30 = vpop.permute.xlu1 %540 }
 0x13f   : > { %v564_v31 = vadd.f32 %v559_v29, %v544_v27  ;;  %v545_v35 = vadd.f32 %v541_v30, %v525_v33  ;;  %v752_v27 = vmul.f32 %v751_v20, %v4219_v48  ;;  %v753_v33 = vmul.f32 %v751_v20, %v4225_v52 }
 0x141   : > { %v574_v34 = vadd.f32 %v572_v32, %v564_v31 }
 0x142   : > { %v589_v36 = vpop.permute.xlu0 %588  ;;  %v561_v37 = vpop.permute.xlu1 %560 }
 0x143   : > { %v565_v42 = vadd.f32 %v561_v37, %v545_v35  ;;  %v594_v6 = vadd.f32 %v589_v36, %v574_v34 }
 0x145   : > { %v575_v39 = vadd.f32 %v573_v38, %v565_v42 }
 0x146   : > { %v609_v40 = vpop.permute.xlu0 %608  ;;  %v591_v41 = vpop.permute.xlu1 %590 }
 0x147   : > { %v614_v46 = vadd.f32 %v609_v40, %v594_v6  ;;  %v595_v43 = vadd.f32 %v591_v41, %v575_v39  ;;  %v841_v39 = vrot.slane %v4174_v26, %v4129_v11 }
 0x14a   : > { %v629_v45 = vpop.permute.xlu0 %628  ;;  %v611_v57 = vpop.permute.xlu1 %610 }
 0x14b   : > { %v634_v55 = vadd.f32 %v629_v45, %v614_v46  ;;  %v615_v61 = vadd.f32 %v611_v57, %v595_v43  ;;  %v842_v46 = vmul.f32 %v841_v39, %v4221_v49 }
 0x14e   : > { %v649_v56 = vpop.permute.xlu0 %648  ;;  %v631_v58 = vpop.permute.xlu1 %630 }
 0x14f   : > { %v654_v59 = vadd.f32 %v649_v56, %v634_v55  ;;  %v635_v47 = vadd.f32 %v631_v58, %v615_v61  ;;  %v843_v58 = vmul.f32 %v841_v39, %v4227_v53  ;;  %v4376_v39 = vld [vmem:[%s5217_s1 + $0x30] sm:$0xff] }
 0x151   : > { %v664_v62 = vadd.f32 %v662_v60, %v654_v59 }
 0x152   : > { %v679_v63 = vpop.permute.xlu0 %678  ;;  %v651_v0 = vpop.permute.xlu1 %650 }
 0x153   : > { %v655_v2 = vadd.f32 %v651_v0, %v635_v47  ;;  %v684_v12 = vadd.f32 %v679_v63, %v664_v62  ;;  %v459_v47 = vld [vmem:[%s5218_s2] sm:$0x7] }
 0x155   : > { %v665_v7 = vadd.f32 %v663_v5, %v655_v2  ;;  %v929_v2 = vrot.slane %v459_v47, %v4144_v17 }
 0x156   : > { %v699_v9 = vpop.permute.xlu0 %698  ;;  %v681_v10 = vpop.permute.xlu1 %680 }
 0x157   : > { %v704_v16 = vadd.f32 %v699_v9, %v684_v12  ;;  %v685_v44 = vadd.f32 %v681_v10, %v665_v7 }
 0x15a   : > { %v719_v14 = vpop.permute.xlu0 %718  ;;  %v701_v19 = vpop.permute.xlu1 %700 }
 0x15b   : > { %v724_v21 = vadd.f32 %v719_v14, %v704_v16  ;;  %v705_v28 = vadd.f32 %v701_v19, %v685_v44  ;;  %v937_v14 = vrot.slane %v459_v47, %v4109_v3 }
 0x15e   : > { %v739_v22 = vpop.permute.xlu0 %738  ;;  %v721_v24 = vpop.permute.xlu1 %720 }
 0x15f   : > { %v744_v25 = vadd.f32 %v739_v22, %v724_v21  ;;  %v725_v51 = vadd.f32 %v721_v24, %v705_v28  ;;  %v943_v21 = vrot.slane %v459_v47, %v4114_v4 }
 0x161   : > { %v754_v29 = vadd.f32 %v752_v27, %v744_v25 }
 0x162   : > { %v769_v30 = vpop.permute.xlu0 %768  ;;  %v741_v31 = vpop.permute.xlu1 %740 }
 0x163   : > { %v745_v32 = vadd.f32 %v741_v31, %v725_v51  ;;  %v774_v37 = vadd.f32 %v769_v30, %v754_v29 }
 0x165   : > { %v755_v34 = vadd.f32 %v753_v33, %v745_v32  ;;  %v4348_v33 = vld [vmem:[%s5217_s1 + $0x20] sm:$0xff] }
 0x166   : > { %v789_v35 = vpop.permute.xlu0 %788  ;;  %v771_v36 = vpop.permute.xlu1 %770  ;;  %v1063_v47 = vrot.slane %v4348_v33, %v4129_v11 }
 0x167   : > { %v794_v42 = vadd.f32 %v789_v35, %v774_v37  ;;  %v775_v48 = vadd.f32 %v771_v36, %v755_v34  ;;  %v1021_v34 = vrot.slane %v4348_v33, %v4109_v3  ;;  %v1049_v35 = vrot.slane %v4348_v33, %v4124_v8  ;;  %v4362_v37 = vld [vmem:[%s5217_s1 + $0x28] sm:$0xff] }
 0x168   : > { %v1084_v36 = vrot.slane %v4348_v33, %v4134_v13 }
 0x16a   : > { %v809_v18 = vpop.permute.xlu0 %808  ;;  %v791_v38 = vpop.permute.xlu1 %790 }
 0x16b   : > { %v814_v40 = vadd.f32 %v809_v18, %v794_v42  ;;  %v795_v57 = vadd.f32 %v791_v38, %v775_v48  ;;  %v1112_v18 = vrot.slane %v4362_v37, %v4144_v17  ;;  %v1147_v42 = vrot.slane %v4362_v37, %v4124_v8 }
 0x16c   : > { %v1175_v38 = vrot.slane %v4362_v37, %v4163_v23  ;;  %v1238_v48 = vrot.slane %v4376_v39, %v4114_v4 }
 0x16e   : > { %v829_v41 = vpop.permute.xlu0 %828  ;;  %v811_v6 = vpop.permute.xlu1 %810 }
 0x16f   : > { %v834_v45 = vadd.f32 %v829_v41, %v814_v40  ;;  %v815_v52 = vadd.f32 %v811_v6, %v795_v57  ;;  %v1210_v40 = vrot.slane %v4376_v39, %v4144_v17  ;;  %v1273_v41 = vrot.slane %v4376_v39, %v4163_v23 }
 0x170   : > { %v1301_v6 = vrot.slane %v4376_v39, %v4139_v15 }
 0x171   : > { %v844_v50 = vadd.f32 %v842_v46, %v834_v45 }
 0x172   : > { %v859_v55 = vpop.permute.xlu0 %858  ;;  %v831_v43 = vpop.permute.xlu1 %830 }
 0x173   : > { %v835_v56 = vadd.f32 %v831_v43, %v815_v52  ;;  %v864_v62 = vadd.f32 %v859_v55, %v844_v50 }
 0x175   : > { %v845_v59 = vadd.f32 %v843_v58, %v835_v56 }
 0x176   : > { %v879_v60 = vpop.permute.xlu0 %878  ;;  %v861_v61 = vpop.permute.xlu1 %860 }
 0x177   : > { %v884_v63 = vadd.f32 %v879_v60, %v864_v62  ;;  %v865_v5 = vadd.f32 %v861_v61, %v845_v59 }
 0x17a   : > { %v899_v26 = vpop.permute.xlu0 %898  ;;  %v881_v0 = vpop.permute.xlu1 %880 }
 0x17b   : > { %v904_v49 = vadd.f32 %v899_v26, %v884_v63  ;;  %v885_v12 = vadd.f32 %v881_v0, %v865_v5  ;;  %v1035_v26 = vrot.slane %v4348_v33, %v4114_v4  ;;  %v1098_v63 = vrot.slane %v4348_v33, %v4139_v15 }
 0x17c   : > { %v1126_v0 = vrot.slane %v4362_v37, %v4109_v3  ;;  %v1224_v5 = vrot.slane %v4376_v39, %v4109_v3 }
 0x17e   : > { %v919_v7 = vpop.permute.xlu0 %918  ;;  %v901_v9 = vpop.permute.xlu1 %900 }
 0x17f   : > { %v924_v10 = vadd.f32 %v919_v7, %v904_v49  ;;  %v905_v16 = vadd.f32 %v901_v9, %v885_v12  ;;  %v1161_v49 = vrot.slane %v4362_v37, %v4129_v11  ;;  %v1252_v7 = vrot.slane %v4376_v39, %v4124_v8 }
 0x180   : > { %v1287_v9 = vrot.slane %v4376_v39, %v4134_v13 }
 0x181   : > { %v930_v53 = vadd.f32 %v929_v2, %v924_v10  ;;  %v3268_v10 = vld [vmem:[%s5217_s1 + $0x38] ss:$0 sm:$0xff] }
 0x182   : > { %v921_v20 = vpop.permute.xlu1 %920 }
 0x183   : > { %v932_v19 = vmax.f32 %v930_v53, 0.0  ;;  %v925_v44 = vadd.f32 %v921_v20, %v905_v16 }
 0x185   : > { %v938_v22 = vmul.f32 %v937_v14, %v932_v19  ;;  %v931_v24 = vadd.f32 %v929_v2, %v925_v44  ;;  %v1189_v2 = vrot.slane %v4362_v37, %v4134_v13 }
 0x187   : > { %v944_v25 = vadd.f32 %v943_v21, %v938_v22  ;;  %v933_v27 = vmax.f32 %v931_v24, 0.0 }
 0x189   : > { %951 = vrot.lane.b32.xlu0 %v944_v25, %s5246_s24  ;;  %v939_v28 = vmul.f32 %v937_v14, %v933_v27 }
 0x18b   : > { %v945_v29 = vadd.f32 %v943_v21, %v939_v28 }
 0x18d   : > { %953 = vrot.lane.b32.xlu1 %v945_v29, %s5246_s24 }
 0x1fb   : > { %v952_v51 = vpop.permute.xlu0 %951 }
 0x1fc   : > { %958 = vst.msk [vmem:[#allocation2] sm:$0xff] %vm957_vm5, %v952_v51 }
 0x1fd   : > { %961 = vst.msk [vmem:[#allocation2] sm:$0xff] %vm960_vm6, %v3941_v54 }
 0x1ff   : > { %v954_v30 = vpop.permute.xlu1 %953 }
 0x200   : > { %959 = vst.msk [vmem:[#allocation2 + $0x8] sm:$0xff] %vm957_vm5, %v954_v30 }
 0x201   : > { %962 = vst.msk [vmem:[#allocation2 + $0x8] sm:$0xff] %vm960_vm6, %v3941_v54 }
 0x204   : > { %v963_v31 = vld [vmem:[#allocation2] sm:$0xff] }
 0x205   : > { %967 = vrot.lane.b32.xlu0 %v963_v31, %s5250_s21  ;;  %984 = vst.msk [vmem:[#allocation2] sm:$0x1] %vm983_vm4, %v3941_v54 }
 0x208   : > { %v964_v32 = vld [vmem:[#allocation2 + $0x8] sm:$0xff] }
 0x209   : > { %975 = vrot.lane.b32.xlu0 %v963_v31, %s5248_s16  ;;  %969 = vrot.lane.b32.xlu1 %v964_v32, %s5250_s21 }
 0x20d   : > { %977 = vrot.lane.b32.xlu1 %v964_v32, %s5248_s16 }
 0x211   : > { %1023 = vrot.lane.b32.xlu1 %v1021_v34, %s5246_s24 }
 0x215   : > { %1051 = vrot.lane.b32.xlu1 %v1049_v35, %s5240_s30 }
 0x219   : > { %1086 = vrot.lane.b32.xlu1 %v1084_v36, %s5246_s24 }
 0x21d   : > { %1114 = vrot.lane.b32.xlu1 %v1112_v18, %s5240_s30 }
 0x221   : > { %1149 = vrot.lane.b32.xlu1 %v1147_v42, %s5246_s24 }
 0x225   : > { %1177 = vrot.lane.b32.xlu1 %v1175_v38, %s5240_s30 }
 0x229   : > { %1212 = vrot.lane.b32.xlu1 %v1210_v40, %s5246_s24 }
 0x22d   : > { %1240 = vrot.lane.b32.xlu1 %v1238_v48, %s5240_s30 }
 0x231   : > { %1275 = vrot.lane.b32.xlu1 %v1273_v41, %s5246_s24 }
 0x235   : > { %1303 = vrot.lane.b32.xlu1 %v1301_v6, %s5240_s30 }
 0x277   : > { %v968_v45 = vpop.permute.xlu0 %967 }
 0x278   : > { %v973_v46 = vmax.f32 %v963_v31, %v968_v45 }
 0x27b   : > { %v976_v57 = vpop.permute.xlu0 %975  ;;  %v970_v50 = vpop.permute.xlu1 %969 }
 0x27c   : > { %v981_v52 = vmax.f32 %v973_v46, %v976_v57  ;;  %v974_v55 = vmax.f32 %v964_v32, %v970_v50 }
 0x27e   : > { %986 = vst.msk [vmem:[#allocation2 + $0x1] sm:$0xff] %vm985_vm7, %v981_v52 }
 0x27f   : > { %v978_v43 = vpop.permute.xlu1 %977 }
 0x280   : > { %v982_v56 = vmax.f32 %v974_v55, %v978_v43 }
 0x282   : > { %987 = vst.msk [vmem:[#allocation2 + $0x9] sm:$0xff] %vm985_vm7, %v982_v56 }
 0x283   : > { %v1024_v12 = vpop.permute.xlu1 %1023 }
 0x287   : > { %v1052_v53 = vpop.permute.xlu1 %1051 }
 0x289   : > { %v991_v58 = vld [vmem:[#allocation2 + $0x1] ss:$2 sm:$0xff]  ;;  %v994_v59 = vld [vmem:[#allocation2 + $0x2] ss:$2 sm:$0xff] }
 0x28a   : > { %v989_v60 = vld [vmem:[#allocation2] ss:$2 sm:$0xff]  ;;  %1005 = vst.msk [vmem:[#allocation2 + $0x10] sm:$0xf] %vm463_vm1, %v3935_v1 }
 0x28b   : > { %v992_v61 = vmax.f32 %v989_v60, %v991_v58  ;;  %1003 = vst.msk [vmem:[#allocation2] sm:$0xff] %vm460_vm0, %v3935_v1  ;;  %1004 = vst.msk [vmem:[#allocation2 + $0x8] sm:$0xff] %vm460_vm0, %v3935_v1  ;;  %v1087_v16 = vpop.permute.xlu1 %1086 }
 0x28c   : > { %1376 = vst.msk [vmem:[#allocation2 + $0x10] sm:$0xf] %vm463_vm1, %v3935_v1 }
 0x28d   : > { %1925 = vst.msk [vmem:[#allocation2 + $0x10] sm:$0xf] %vm463_vm1, %v3935_v1  ;;  %v995_v62 = vmax.f32 %v992_v61, %v994_v59 }
 0x28e   : > { %2201 = vst.msk [vmem:[#allocation2 + $0x10] sm:$0xf] %vm463_vm1, %v3935_v1 }
 0x28f   : > { %2740 = vst.msk [vmem:[#allocation2 + $0x10] sm:$0xf] %vm463_vm1, %v3935_v1  ;;  %1007 = vrot.lane.b32.xlu0 %v995_v62, %s5244_s17  ;;  %v1115_v20 = vpop.permute.xlu1 %1114  ;;  %vm2206_vm1 = vcmask 582720  }
 0x293   : > { %1037 = vrot.lane.b32.xlu0 %v1035_v26, %s5244_s17  ;;  %v1150_v30 = vpop.permute.xlu1 %1149 }
 0x297   : > { %1065 = vrot.lane.b32.xlu0 %v1063_v47, %s5242_s14  ;;  %v1178_v18 = vpop.permute.xlu1 %1177 }
 0x29b   : > { %1100 = vrot.lane.b32.xlu0 %v1098_v63, %s5244_s17  ;;  %v1213_v41 = vpop.permute.xlu1 %1212 }
 0x29f   : > { %1128 = vrot.lane.b32.xlu0 %v1126_v0, %s5242_s14  ;;  %v1241_v52 = vpop.permute.xlu1 %1240 }
 0x2a3   : > { %1163 = vrot.lane.b32.xlu0 %v1161_v49, %s5244_s17  ;;  %v1276_v58 = vpop.permute.xlu1 %1275 }
 0x2a7   : > { %1191 = vrot.lane.b32.xlu0 %v1189_v2, %s5242_s14  ;;  %v1304_v47 = vpop.permute.xlu1 %1303  ;;  %v1015_v2 = vrot.slane %v4348_v33, %v4144_v17 }
 0x2ab   : > { %1226 = vrot.lane.b32.xlu0 %v1224_v5, %s5244_s17 }
 0x2af   : > { %1254 = vrot.lane.b32.xlu0 %v1252_v7, %s5242_s14 }
 0x2b3   : > { %1289 = vrot.lane.b32.xlu0 %v1287_v9, %s5244_s17 }
 0x2b7   : > { %1317 = vrot.lane.b32.xlu0 %v3268_v10, %s5242_s14 }
 0x301   : > { %v1008_v14 = vpop.permute.xlu0 %1007 }
 0x302   : > { %1010 = vst.msk [vmem:[#allocation2 + $0x2] sm:$0xff] %vm473_vm2, %v1008_v14  ;;  %vm2539_vm2 = vcmask 25600  }
 0x305   : > { %v1038_v19 = vpop.permute.xlu0 %1037 }
 0x309   : > { %v4440_v21 = vld [vmem:[#allocation2 + $0x2] sm:$0xff]  ;;  %v1066_v24 = vpop.permute.xlu0 %1065 }
 0x30a   : > { %v4442_v44 = vld [vmem:[#allocation2 + $0x3] sm:$0xff]  ;;  %v1152_v45 = vmul.f32 %v1150_v30, %v4440_v21  ;;  %v1180_v50 = vmul.f32 %v1178_v18, %v4440_v21 }
 0x30b   : > { %v4444_v22 = vld [vmem:[#allocation2 + $0x4] sm:$0xff]  ;;  %v1215_v56 = vmul.f32 %v1213_v41, %v4442_v44  ;;  %v1243_v61 = vmul.f32 %v1241_v52, %v4442_v44 }
 0x30c   : > { %1361 = vst.msk [vmem:[#allocation2 + $0x9] sm:$0x1] %vm983_vm4, %v3941_v54  ;;  %v1011_v25 = vld [vmem:[#allocation2] sm:$0xff]  ;;  %v1278_v62 = vmul.f32 %v1276_v58, %v4444_v22  ;;  %v1306_v0 = vmul.f32 %v1304_v47, %v4444_v22 }
 0x30d   : > { %v4448_v27 = vld [vmem:[#allocation2 + $0x1] sm:$0xff]  ;;  %v1040_v28 = vmul.f32 %v1038_v19, %v1011_v25  ;;  %v1026_v29 = vmul.f32 %v1024_v12, %v1011_v25  ;;  %v1101_v51 = vpop.permute.xlu0 %1100  ;;  %v1068_v31 = vmul.f32 %v1066_v24, %v1011_v25  ;;  %v1054_v32 = vmul.f32 %v1052_v53, %v1011_v25 }
 0x30e   : > { %1342 = vst.msk [vmem:[#allocation2] sm:$0xff] %vm946_vm3, %v3941_v54  ;;  %v1103_v35 = vmul.f32 %v1101_v51, %v4448_v27  ;;  %v1089_v36 = vmul.f32 %v1087_v16, %v4448_v27  ;;  %v1117_v40 = vmul.f32 %v1115_v20, %v4448_v27  ;;  %v1016_v5 = vmul.f32 %v1015_v2, %v1011_v25 }
 0x30f   : > { %1028 = vrot.lane.b32.xlu1 %v1026_v29, %s5250_s21  ;;  %1042 = vrot.lane.b32.xlu0 %v1040_v28, %s5248_s16  ;;  %v1078_v53 = vrot.slane %v4348_v33, %v4163_v23 }
 0x311   : > { %v1129_v34 = vpop.permute.xlu0 %1128  ;;  %v1079_v24 = vmul.f32 %v1078_v53, %v4448_v27 }
 0x312   : > { %v1131_v38 = vmul.f32 %v1129_v34, %v4448_v27  ;;  %v1141_v34 = vrot.slane %v4362_v37, %v4114_v4 }
 0x313   : > { %1056 = vrot.lane.b32.xlu1 %v1054_v32, %s5238_s27  ;;  %1070 = vrot.lane.b32.xlu0 %v1068_v31, %s5268_s15 }
 0x315   : > { %v1164_v42 = vpop.permute.xlu0 %1163 }
 0x316   : > { %v1166_v6 = vmul.f32 %v1164_v42, %v4440_v21  ;;  %v1142_v42 = vmul.f32 %v1141_v34, %v4440_v21 }
 0x317   : > { %1091 = vrot.lane.b32.xlu1 %v1089_v36, %s5250_s21  ;;  %1105 = vrot.lane.b32.xlu0 %v1103_v35, %s5248_s16 }
 0x319   : > { %v1192_v48 = vpop.permute.xlu0 %1191 }
 0x31a   : > { %v1194_v57 = vmul.f32 %v1192_v48, %v4440_v21  ;;  %v1267_v21 = vrot.slane %v4376_v39, %v4129_v11 }
 0x31b   : > { %1119 = vrot.lane.b32.xlu1 %v1117_v40, %s5238_s27  ;;  %1133 = vrot.lane.b32.xlu0 %v1131_v38, %s5268_s15 }
 0x31d   : > { %v1227_v46 = vpop.permute.xlu0 %1226 }
 0x31e   : > { %v1229_v43 = vmul.f32 %v1227_v46, %v4442_v44 }
 0x31f   : > { %1154 = vrot.lane.b32.xlu1 %v1152_v45, %s5250_s21  ;;  %1168 = vrot.lane.b32.xlu0 %v1166_v6, %s5248_s16  ;;  %v1204_v6 = vrot.slane %v4362_v37, %v4139_v15 }
 0x321   : > { %v1255_v55 = vpop.permute.xlu0 %1254 }
 0x322   : > { %v1257_v60 = vmul.f32 %v1255_v55, %v4442_v44 }
 0x323   : > { %1182 = vrot.lane.b32.xlu1 %v1180_v50, %s5238_s27  ;;  %1196 = vrot.lane.b32.xlu0 %v1194_v57, %s5268_s15  ;;  %v1205_v50 = vmul.f32 %v1204_v6, %v4442_v44  ;;  %v3267_v44 = vld [vmem:[%s5218_s2 + $0x4] sm:$0x7] }
 0x325   : > { %v1290_v59 = vpop.permute.xlu0 %1289 }
 0x326   : > { %v1292_v26 = vmul.f32 %v1290_v59, %v4444_v22 }
 0x327   : > { %1217 = vrot.lane.b32.xlu1 %v1215_v56, %s5250_s21  ;;  %1231 = vrot.lane.b32.xlu0 %v1229_v43, %s5248_s16 }
 0x329   : > { %v1318_v63 = vpop.permute.xlu0 %1317 }
 0x32a   : > { %v1320_v49 = vmul.f32 %v1318_v63, %v4444_v22 }
 0x32b   : > { %1245 = vrot.lane.b32.xlu1 %v1243_v61, %s5238_s27  ;;  %1259 = vrot.lane.b32.xlu0 %v1257_v60, %s5268_s15 }
 0x32f   : > { %1280 = vrot.lane.b32.xlu1 %v1278_v62, %s5250_s21  ;;  %1294 = vrot.lane.b32.xlu0 %v1292_v26, %s5248_s16  ;;  %v1268_v62 = vmul.f32 %v1267_v21, %v4444_v22  ;;  %v1340_v22 = vrot.slane %v3267_v44, %v4114_v4 }
 0x333   : > { %1308 = vrot.lane.b32.xlu1 %v1306_v0, %s5238_s27  ;;  %1322 = vrot.lane.b32.xlu0 %v1320_v49, %s5268_s15 }
 0x381   : > { %v1029_v7 = vpop.permute.xlu1 %1028  ;;  %v1043_v9 = vpop.permute.xlu0 %1042 }
 0x382   : > { %v1031_v10 = vadd.f32 %v1029_v7, %v1016_v5  ;;  %v1329_v5 = vrot.slane %v3267_v44, %v4144_v17 }
 0x384   : > { %v1045_v12 = vadd.f32 %v1043_v9, %v1031_v10  ;;  %v1335_v9 = vrot.slane %v3267_v44, %v4109_v3 }
 0x385   : > { %v1057_v14 = vpop.permute.xlu1 %1056  ;;  %v1071_v16 = vpop.permute.xlu0 %1070 }
 0x386   : > { %v1059_v19 = vadd.f32 %v1057_v14, %v1045_v12 }
 0x388   : > { %v1073_v20 = vadd.f32 %v1071_v16, %v1059_v19  ;;  %v4515_v19 = vld [vmem:[%s5217_s1 + $0x40] sm:$0xff] }
 0x389   : > { %v1092_v28 = vpop.permute.xlu1 %1091  ;;  %v1106_v29 = vpop.permute.xlu0 %1105 }
 0x38a   : > { %v1080_v51 = vadd.f32 %v1079_v24, %v1073_v20  ;;  %v1393_v24 = vrot.slane %v4515_v19, %v4109_v3 }
 0x38c   : > { %v1094_v30 = vadd.f32 %v1092_v28, %v1080_v51  ;;  %v1421_v28 = vrot.slane %v4515_v19, %v4124_v8  ;;  %v4532_v51 = vld [vmem:[%s5217_s1 + $0x48] sm:$0xff] }
 0x38d   : > { %v1120_v31 = vpop.permute.xlu1 %1119  ;;  %v1134_v32 = vpop.permute.xlu0 %1133 }
 0x38e   : > { %v1108_v25 = vadd.f32 %v1106_v29, %v1094_v30  ;;  %v1456_v29 = vrot.slane %v4515_v19, %v4134_v13  ;;  %v1484_v30 = vrot.slane %v4532_v51, %v4144_v17 }
 0x390   : > { %v1122_v35 = vadd.f32 %v1120_v31, %v1108_v25  ;;  %v1519_v31 = vrot.slane %v4532_v51, %v4124_v8  ;;  %v4546_v25 = vld [vmem:[%s5217_s1 + $0x50] sm:$0xff] }
 0x391   : > { %v1155_v36 = vpop.permute.xlu1 %1154  ;;  %v1169_v18 = vpop.permute.xlu0 %1168  ;;  %v1582_v34 = vrot.slane %v4546_v25, %v4144_v17  ;;  %v1659_v21 = vrot.slane %v4546_v25, %v4134_v13 }
 0x392   : > { %v1136_v33 = vadd.f32 %v1134_v32, %v1122_v35  ;;  %v1547_v32 = vrot.slane %v4532_v51, %v4163_v23  ;;  %v1610_v35 = vrot.slane %v4546_v25, %v4114_v4 }
 0x394   : > { %v1143_v38 = vadd.f32 %v1142_v42, %v1136_v33 }
 0x395   : > { %v1183_v40 = vpop.permute.xlu1 %1182  ;;  %v1197_v27 = vpop.permute.xlu0 %1196 }
 0x396   : > { %v1157_v48 = vadd.f32 %v1155_v36, %v1143_v38  ;;  %v1645_v36 = vrot.slane %v4546_v25, %v4163_v23 }
 0x398   : > { %v1171_v41 = vadd.f32 %v1169_v18, %v1157_v48  ;;  %v1673_v18 = vrot.slane %v4546_v25, %v4139_v15 }
 0x399   : > { %v1218_v46 = vpop.permute.xlu1 %1217  ;;  %v1232_v52 = vpop.permute.xlu0 %1231 }
 0x39a   : > { %v1185_v45 = vadd.f32 %v1183_v40, %v1171_v41 }
 0x39c   : > { %v1199_v57 = vadd.f32 %v1197_v27, %v1185_v45 }
 0x39d   : > { %v1246_v56 = vpop.permute.xlu1 %1245  ;;  %v1260_v59 = vpop.permute.xlu0 %1259 }
 0x39e   : > { %v1206_v55 = vadd.f32 %v1205_v50, %v1199_v57  ;;  %v1435_v57 = vrot.slane %v4515_v19, %v4129_v11  ;;  %v1470_v50 = vrot.slane %v4515_v19, %v4139_v15 }
 0x3a0   : > { %v1220_v43 = vadd.f32 %v1218_v46, %v1206_v55  ;;  %v1407_v46 = vrot.slane %v4515_v19, %v4114_v4  ;;  %v1533_v55 = vrot.slane %v4532_v51, %v4129_v11 }
 0x3a1   : > { %v1281_v26 = vpop.permute.xlu1 %1280  ;;  %v1295_v47 = vpop.permute.xlu0 %1294 }
 0x3a2   : > { %v1234_v58 = vadd.f32 %v1232_v52, %v1220_v43  ;;  %v1498_v52 = vrot.slane %v4532_v51, %v4109_v3  ;;  %v1561_v43 = vrot.slane %v4532_v51, %v4134_v13 }
 0x3a4   : > { %v1248_v60 = vadd.f32 %v1246_v56, %v1234_v58  ;;  %v1596_v56 = vrot.slane %v4546_v25, %v4109_v3  ;;  %v1624_v58 = vrot.slane %v4546_v25, %v4124_v8 }
 0x3a5   : > { %v1309_v49 = vpop.permute.xlu1 %1308  ;;  %v1323_v7 = vpop.permute.xlu0 %1322 }
 0x3a6   : > { %v1262_v61 = vadd.f32 %v1260_v59, %v1248_v60  ;;  %v3274_v59 = vld [vmem:[%s5217_s1 + $0x58] ss:$0 sm:$0xff] }
 0x3a8   : > { %v1269_v37 = vadd.f32 %v1268_v62, %v1262_v61 }
 0x3aa   : > { %v1283_v63 = vadd.f32 %v1281_v26, %v1269_v37 }
 0x3ac   : > { %v1297_v0 = vadd.f32 %v1295_v47, %v1283_v63 }
 0x3ae   : > { %v1311_v2 = vadd.f32 %v1309_v49, %v1297_v0 }
 0x3b0   : > { %v1325_v39 = vadd.f32 %v1323_v7, %v1311_v2 }
 0x3b2   : > { %v1330_v10 = vadd.f32 %v1329_v5, %v1325_v39 }
 0x3b4   : > { %v1331_v12 = vmax.f32 %v1330_v10, 0.0 }
 0x3b6   : > { %v1336_v53 = vmul.f32 %v1335_v9, %v1331_v12 }
 0x3b8   : > { %v1341_v14 = vadd.f32 %v1340_v22, %v1336_v53 }
 0x3ba   : > { %1344 = vrot.lane.b32.xlu1 %v1341_v14, %s5246_s24 }
 0x42c   : > { %v1345_v16 = vpop.permute.xlu1 %1344 }
 0x42d   : > { %1347 = vst.msk [vmem:[#allocation2] sm:$0xff] %vm957_vm5, %v1345_v16  ;;  %vm2545_vm5 = vcmask 549920  }
 0x42e   : > { %1348 = vst.msk [vmem:[#allocation2] sm:$0xff] %vm960_vm6, %v3941_v54  ;;  %vm2547_vm6 = vcmask 583200  }
 0x435   : > { %v1349_v20 = vld [vmem:[#allocation2] sm:$0xff] }
 0x436   : > { %1351 = vrot.lane.b32.xlu0 %v1349_v20, %s5250_s21  ;;  %1359 = vst.msk [vmem:[#allocation2] sm:$0x1] %vm983_vm4, %v3941_v54  ;;  %1355 = vrot.lane.b32.xlu1 %v1349_v20, %s5248_s16 }
 0x43a   : > { %1395 = vrot.lane.b32.xlu1 %v1393_v24, %s5246_s24 }
 0x43e   : > { %1423 = vrot.lane.b32.xlu1 %v1421_v28, %s5240_s30 }
 0x442   : > { %1458 = vrot.lane.b32.xlu1 %v1456_v29, %s5246_s24 }
 0x446   : > { %1486 = vrot.lane.b32.xlu1 %v1484_v30, %s5240_s30 }
 0x44a   : > { %1521 = vrot.lane.b32.xlu1 %v1519_v31, %s5246_s24 }
 0x44e   : > { %1549 = vrot.lane.b32.xlu1 %v1547_v32, %s5240_s30 }
 0x452   : > { %1584 = vrot.lane.b32.xlu1 %v1582_v34, %s5246_s24 }
 0x456   : > { %1612 = vrot.lane.b32.xlu1 %v1610_v35, %s5240_s30 }
 0x45a   : > { %1647 = vrot.lane.b32.xlu1 %v1645_v36, %s5246_s24 }
 0x45e   : > { %1675 = vrot.lane.b32.xlu1 %v1673_v18, %s5240_s30 }
 0x4a8   : > { %v1352_v33 = vpop.permute.xlu0 %1351  ;;  %v1356_v42 = vpop.permute.xlu1 %1355 }
 0x4a9   : > { %v1354_v38 = vmax.f32 %v1349_v20, %v1352_v33 }
 0x4ab   : > { %v1358_v40 = vmax.f32 %v1354_v38, %v1356_v42 }
 0x4ac   : > { %v1396_v60 = vpop.permute.xlu1 %1395 }
 0x4ad   : > { %1360 = vst.msk [vmem:[#allocation2 + $0x1] sm:$0xff] %vm985_vm7, %v1358_v40 }
 0x4b0   : > { %v1424_v61 = vpop.permute.xlu1 %1423 }
 0x4b4   : > { %v1362_v48 = vld [vmem:[#allocation2] ss:$2 sm:$0xf]  ;;  %v1363_v27 = vld [vmem:[#allocation2 + $0x1] ss:$2 sm:$0xf]  ;;  %v1459_v26 = vpop.permute.xlu1 %1458 }
 0x4b5   : > { %v1364_v41 = vmax.f32 %v1362_v48, %v1363_v27  ;;  %v1365_v6 = vld [vmem:[#allocation2 + $0x2] ss:$2 sm:$0xf] }
 0x4b6   : > { %1375 = vst.msk [vmem:[#allocation2 + $0x8] sm:$0xff] %vm460_vm0, %v3935_v1  ;;  %1374 = vst.msk [vmem:[#allocation2] sm:$0xff] %vm460_vm0, %v3935_v1 }
 0x4b7   : > { %v1366_v45 = vmax.f32 %v1364_v41, %v1365_v6  ;;  %1924 = vst.msk [vmem:[#allocation2 + $0x8] sm:$0xff] %vm460_vm0, %v3935_v1 }
 0x4b8   : > { %2200 = vst.msk [vmem:[#allocation2 + $0x8] sm:$0xff] %vm460_vm0, %v3935_v1  ;;  %v1487_v47 = vpop.permute.xlu1 %1486 }
 0x4b9   : > { %2739 = vst.msk [vmem:[#allocation2 + $0x8] sm:$0xff] %vm460_vm0, %v3935_v1  ;;  %1378 = vrot.lane.b32.xlu0 %v1366_v45, %s5244_s17 }
 0x4bc   : > { %v1522_v9 = vpop.permute.xlu1 %1521 }
 0x4bd   : > { %1409 = vrot.lane.b32.xlu0 %v1407_v46, %s5244_s17 }
 0x4c0   : > { %v1550_v20 = vpop.permute.xlu1 %1549 }
 0x4c1   : > { %1437 = vrot.lane.b32.xlu0 %v1435_v57, %s5242_s14 }
 0x4c4   : > { %v1585_v31 = vpop.permute.xlu1 %1584 }
 0x4c5   : > { %1472 = vrot.lane.b32.xlu0 %v1470_v50, %s5244_s17 }
 0x4c8   : > { %v1613_v33 = vpop.permute.xlu1 %1612 }
 0x4c9   : > { %1500 = vrot.lane.b32.xlu0 %v1498_v52, %s5242_s14 }
 0x4cc   : > { %v1648_v27 = vpop.permute.xlu1 %1647 }
 0x4cd   : > { %1535 = vrot.lane.b32.xlu0 %v1533_v55, %s5244_s17 }
 0x4d0   : > { %v1676_v50 = vpop.permute.xlu1 %1675 }
 0x4d1   : > { %1563 = vrot.lane.b32.xlu0 %v1561_v43, %s5242_s14  ;;  %v1387_v43 = vrot.slane %v4515_v19, %v4144_v17 }
 0x4d5   : > { %1598 = vrot.lane.b32.xlu0 %v1596_v56, %s5244_s17 }
 0x4d9   : > { %1626 = vrot.lane.b32.xlu0 %v1624_v58, %s5242_s14 }
 0x4dd   : > { %1661 = vrot.lane.b32.xlu0 %v1659_v21, %s5244_s17  ;;  %s5270_s17 = smov 120  }
 0x4e1   : > { %1689 = vrot.lane.b32.xlu0 %v3274_v59, %s5242_s14  ;;  %s5272_s14 = smov 8  }
 0x52b   : > { %v1379_v62 = vpop.permute.xlu0 %1378 }
 0x52c   : > { %1382 = vst.msk [vmem:[#allocation2 + $0x2] sm:$0xf] %vm1381_vm8, %v1379_v62  ;;  %v1450_v62 = vrot.slane %v4515_v19, %v4163_v23 }
 0x52f   : > { %v1410_v37 = vpop.permute.xlu0 %1409 }
 0x533   : > { %v4604_v63 = vld [vmem:[#allocation2 + $0x2] sm:$0xf]  ;;  %v1438_v44 = vpop.permute.xlu0 %1437 }
 0x534   : > { %v4606_v0 = vld [vmem:[#allocation2 + $0x3] sm:$0xf]  ;;  %v1524_v34 = vmul.f32 %v1522_v9, %v4604_v63  ;;  %v1552_v18 = vmul.f32 %v1550_v20, %v4604_v63 }
 0x535   : > { %v4608_v49 = vld [vmem:[#allocation2 + $0x4] sm:$0xf]  ;;  %v1383_v2 = vld [vmem:[#allocation2] sm:$0xf]  ;;  %v1587_v40 = vmul.f32 %v1585_v31, %v4606_v0  ;;  %v1615_v6 = vmul.f32 %v1613_v33, %v4606_v0 }
 0x536   : > { %1737 = vst.msk [vmem:[#allocation2 + $0x5] sm:$0x1] %vm983_vm4, %v3941_v54  ;;  %v1412_v5 = vmul.f32 %v1410_v37, %v1383_v2  ;;  %v1398_v7 = vmul.f32 %v1396_v60, %v1383_v2  ;;  %v1440_v10 = vmul.f32 %v1438_v44, %v1383_v2  ;;  %v1426_v22 = vmul.f32 %v1424_v61, %v1383_v2  ;;  %v1446_v12 = vld [vmem:[#allocation2 + $0x1] sm:$0xf] }
 0x537   : > { %v1473_v39 = vpop.permute.xlu0 %1472  ;;  %v1461_v16 = vmul.f32 %v1459_v26, %v1446_v12  ;;  %v1489_v29 = vmul.f32 %v1487_v47, %v1446_v12  ;;  %v1650_v46 = vmul.f32 %v1648_v27, %v4608_v49  ;;  %v1678_v55 = vmul.f32 %v1676_v50, %v4608_v49  ;;  %1715 = vst.msk [vmem:[#allocation2] sm:$0xf] %vm1714_vm9, %v3941_v54 }
 0x538   : > { %1414 = vrot.lane.b32.xlu0 %v1412_v5, %s5248_s16  ;;  %1400 = vrot.lane.b32.xlu1 %v1398_v7, %s5250_s21  ;;  %v1475_v14 = vmul.f32 %v1473_v39, %v1446_v12  ;;  %v1388_v56 = vmul.f32 %v1387_v43, %v1383_v2  ;;  %v1451_v44 = vmul.f32 %v1450_v62, %v1446_v12 }
 0x539   : > { %v1513_v2 = vrot.slane %v4532_v51, %v4114_v4 }
 0x53b   : > { %v1501_v53 = vpop.permute.xlu0 %1500  ;;  %v1514_v19 = vmul.f32 %v1513_v2, %v4604_v63  ;;  %v1757_v2 = vld [vmem:[%s5221_s5 + $0x30] sm:$0xff] }
 0x53c   : > { %1442 = vrot.lane.b32.xlu0 %v1440_v10, %s5268_s15  ;;  %1428 = vrot.lane.b32.xlu1 %v1426_v22, %s5269_s23  ;;  %v1503_v28 = vmul.f32 %v1501_v53, %v1446_v12 }
 0x53f   : > { %v1536_v24 = vpop.permute.xlu0 %1535 }
 0x540   : > { %1477 = vrot.lane.b32.xlu0 %v1475_v14, %s5248_s16  ;;  %1463 = vrot.lane.b32.xlu1 %v1461_v16, %s5250_s21  ;;  %v1538_v32 = vmul.f32 %v1536_v24, %v4604_v63 }
 0x543   : > { %v1564_v30 = vpop.permute.xlu0 %1563 }
 0x544   : > { %1505 = vrot.lane.b32.xlu0 %v1503_v28, %s5268_s15  ;;  %1491 = vrot.lane.b32.xlu1 %v1489_v29, %s5269_s23  ;;  %v1566_v36 = vmul.f32 %v1564_v30, %v4604_v63  ;;  %v1639_v63 = vrot.slane %v4546_v25, %v4129_v11 }
 0x547   : > { %v1599_v35 = vpop.permute.xlu0 %1598 }
 0x548   : > { %1540 = vrot.lane.b32.xlu0 %v1538_v32, %s5248_s16  ;;  %1526 = vrot.lane.b32.xlu1 %v1524_v34, %s5250_s21  ;;  %v1601_v38 = vmul.f32 %v1599_v35, %v4606_v0  ;;  %v1576_v32 = vrot.slane %v4532_v51, %v4139_v15 }
 0x54b   : > { %v1627_v42 = vpop.permute.xlu0 %1626 }
 0x54c   : > { %1568 = vrot.lane.b32.xlu0 %v1566_v36, %s5268_s15  ;;  %1554 = vrot.lane.b32.xlu1 %v1552_v18, %s5269_s23  ;;  %v1629_v41 = vmul.f32 %v1627_v42, %v4606_v0  ;;  %v1577_v18 = vmul.f32 %v1576_v32, %v4606_v0  ;;  %v3273_v0 = vld [vmem:[%s5218_s2 + $0x8] sm:$0x7] }
 0x54f   : > { %v1662_v48 = vpop.permute.xlu0 %1661 }
 0x550   : > { %1603 = vrot.lane.b32.xlu0 %v1601_v38, %s5248_s16  ;;  %1589 = vrot.lane.b32.xlu1 %v1587_v40, %s5250_s21  ;;  %v1664_v45 = vmul.f32 %v1662_v48, %v4608_v49 }
 0x553   : > { %v1690_v57 = vpop.permute.xlu0 %1689 }
 0x554   : > { %1631 = vrot.lane.b32.xlu0 %v1629_v41, %s5268_s15  ;;  %1617 = vrot.lane.b32.xlu1 %v1615_v6, %s5269_s23  ;;  %v1692_v52 = vmul.f32 %v1690_v57, %v4608_v49 }
 0x558   : > { %1666 = vrot.lane.b32.xlu0 %v1664_v45, %s5248_s16  ;;  %1652 = vrot.lane.b32.xlu1 %v1650_v46, %s5250_s21  ;;  %v1640_v45 = vmul.f32 %v1639_v63, %v4608_v49  ;;  %v1712_v49 = vrot.slane %v3273_v0, %v4114_v4  ;;  %s5273_s16 = smov 16  }
 0x55c   : > { %1694 = vrot.lane.b32.xlu0 %v1692_v52, %s5268_s15  ;;  %1680 = vrot.lane.b32.xlu1 %v1678_v55, %s5269_s23 }
 0x5aa   : > { %v1415_v58 = vpop.permute.xlu0 %1414  ;;  %v1401_v21 = vpop.permute.xlu1 %1400 }
 0x5ab   : > { %v1403_v59 = vadd.f32 %v1401_v21, %v1388_v56  ;;  %v1701_v56 = vrot.slane %v3273_v0, %v4144_v17  ;;  %v1707_v21 = vrot.slane %v3273_v0, %v4109_v3  ;;  %v3281_v0 = vld [vmem:[%s5219_s3 + $0x50] sm:$0xff] }
 0x5ad   : > { %v1417_v60 = vadd.f32 %v1415_v58, %v1403_v59 }
 0x5ae   : > { %v1443_v61 = vpop.permute.xlu0 %1442  ;;  %v1429_v26 = vpop.permute.xlu1 %1428 }
 0x5af   : > { %v1431_v37 = vadd.f32 %v1429_v26, %v1417_v60  ;;  %v1751_v26 = vld [vmem:[%s5221_s5] sm:$0xff] }
 0x5b1   : > { %v1445_v47 = vadd.f32 %v1443_v61, %v1431_v37  ;;  %v1752_v37 = vld [vmem:[%s5221_s5 + $0x8] sm:$0xff] }
 0x5b2   : > { %v1478_v5 = vpop.permute.xlu0 %1477  ;;  %v1464_v7 = vpop.permute.xlu1 %1463 }
 0x5b3   : > { %v1452_v39 = vadd.f32 %v1451_v44, %v1445_v47  ;;  %v1753_v47 = vld [vmem:[%s5221_s5 + $0x10] sm:$0xff] }
 0x5b5   : > { %v1466_v9 = vadd.f32 %v1464_v7, %v1452_v39  ;;  %v3645_v7 = vpack.c.bf16 %v1752_v37, %v1751_v26  ;;  %v1754_v39 = vld [vmem:[%s5221_s5 + $0x18] sm:$0xff]  ;;  %v1934_v37 = vld [vmem:[%s5219_s3 + $0x30] sm:$0xff] }
 0x5b6   : > { %v1506_v10 = vpop.permute.xlu0 %1505  ;;  %v1492_v22 = vpop.permute.xlu1 %1491  ;;  %v3286_v26 = vld [vmem:[%s5219_s3 + $0x78] sm:$0xff] }
 0x5b7   : > { %v1480_v53 = vadd.f32 %v1478_v5, %v1466_v9  ;;  %v3945_v5 = vmov 0.0|0.0   ;;  %v3648_v9 = vpack.c.bf16 %v1754_v39, %v1753_v47  ;;  %v1935_v47 = vld [vmem:[%s5219_s3 + $0x38] sm:$0xff] }
 0x5b8   : > { %3644 = vmatprep.subr.bf16.mxu0 %v3945_v5  ;;  %3656 = vmatprep.subr.bf16.mxu1 %v3945_v5 }
 0x5b9   : > { %v1494_v14 = vadd.f32 %v1492_v22, %v1480_v53  ;;  %3646 = vmatpush3.bf16.msra.mxu0 %v3645_v7  ;;  %v1756_v22 = vld [vmem:[%s5221_s5 + $0x28] sm:$0xff]  ;;  %v3678_v7 = vpack.c.bf16 %v1935_v47, %v1934_v37 }
 0x5ba   : > { %v1527_v16 = vpop.permute.xlu1 %1526  ;;  %v1541_v20 = vpop.permute.xlu0 %1540  ;;  %3647 = vmatprep.subr.bf16.mxu0 %v3945_v5 }
 0x5bb   : > { %v1508_v24 = vadd.f32 %v1506_v10, %v1494_v14  ;;  %v1755_v10 = vld [vmem:[%s5221_s5 + $0x20] sm:$0xff]  ;;  %v1758_v14 = vld [vmem:[%s5221_s5 + $0x38] sm:$0xff] }
 0x5bc   : > { %v3651_v53 = vpack.c.bf16 %v1756_v22, %v1755_v10 }
 0x5bd   : > { %v1515_v28 = vadd.f32 %v1514_v19, %v1508_v24  ;;  %3649 = vmatpush3.bf16.msra.mxu0 %v3648_v9 }
 0x5be   : > { %v1555_v29 = vpop.permute.xlu1 %1554  ;;  %v1569_v12 = vpop.permute.xlu0 %1568  ;;  %3650 = vmatprep.subr.bf16.mxu0 %v3945_v5 }
 0x5bf   : > { %v1529_v30 = vadd.f32 %v1527_v16, %v1515_v28 }
 0x5c1   : > { %v1543_v31 = vadd.f32 %v1541_v20, %v1529_v30  ;;  %3652 = vmatpush3.bf16.msra.mxu0 %v3651_v53  ;;  %v3654_v20 = vpack.c.bf16 %v1758_v14, %v1757_v2 }
 0x5c2   : > { %v1590_v35 = vpop.permute.xlu1 %1589  ;;  %v1604_v33 = vpop.permute.xlu0 %1603  ;;  %3653 = vmatprep.subr.bf16.mxu0 %v3945_v5 }
 0x5c3   : > { %v1557_v34 = vadd.f32 %v1555_v29, %v1543_v31 }
 0x5c5   : > { %v1571_v36 = vadd.f32 %v1569_v12, %v1557_v34  ;;  %3655 = vmatpush3.bf16.msra.mxu0 %v3654_v20  ;;  %v3289_v20 = vld [vmem:[%s5219_s3 + $0x80] sm:$0xff] }
 0x5c6   : > { %v1618_v40 = vpop.permute.xlu1 %1617  ;;  %v1632_v27 = vpop.permute.xlu0 %1631  ;;  %3463 = vmatprep.subr.mxu0 %v3935_v1 }
 0x5c7   : > { %v1578_v42 = vadd.f32 %v1577_v18, %v1571_v36 }
 0x5c9   : > { %v1592_v38 = vadd.f32 %v1590_v35, %v1578_v42 }
 0x5ca   : > { %v1653_v46 = vpop.permute.xlu1 %1652  ;;  %v1667_v57 = vpop.permute.xlu0 %1666 }
 0x5cb   : > { %v1606_v48 = vadd.f32 %v1604_v33, %v1592_v38 }
 0x5cd   : > { %v1620_v41 = vadd.f32 %v1618_v40, %v1606_v48  ;;  %v1833_v48 = vld [vmem:[#allocation3] sm:$0xf] }
 0x5ce   : > { %v1681_v55 = vpop.permute.xlu1 %1680  ;;  %v1695_v58 = vpop.permute.xlu0 %1694 }
 0x5cf   : > { %v1634_v6 = vadd.f32 %v1632_v27, %v1620_v41 }
 0x5d1   : > { %v1641_v51 = vadd.f32 %v1640_v45, %v1634_v6  ;;  %v3279_v6 = vld [vmem:[%s5219_s3 + $0x40] sm:$0xff]  ;;  %v3280_v45 = vld [vmem:[%s5219_s3 + $0x48] sm:$0xff] }
 0x5d3   : > { %v1655_v50 = vadd.f32 %v1653_v46, %v1641_v51  ;;  %v3657_v46 = vpack.c.bf16 %v3280_v45, %v3279_v6  ;;  %v1928_v51 = vld [vmem:[%s5219_s3] sm:$0xff] }
 0x5d5   : > { %v1669_v52 = vadd.f32 %v1667_v57, %v1655_v50  ;;  %v1929_v57 = vld [vmem:[%s5219_s3 + $0x8] sm:$0xff]  ;;  %3658 = vmatpush3.bf16.msra.mxu1 %v3657_v46 }
 0x5d6   : > { %v3669_v50 = vpack.c.bf16 %v1929_v57, %v1928_v51  ;;  %3659 = vmatprep.subr.bf16.mxu1 %v3945_v5  ;;  %v4849_v51 = vld [vmem:[%s5217_s1 + $0x70] sm:$0xff] }
 0x5d7   : > { %v1683_v43 = vadd.f32 %v1681_v55, %v1669_v52  ;;  %v3282_v52 = vld [vmem:[%s5219_s3 + $0x58] sm:$0xff]  ;;  %v2421_v57 = vrot.slane %v4849_v51, %v4109_v3 }
 0x5d8   : > { %v3660_v55 = vpack.c.bf16 %v3282_v52, %v3281_v0  ;;  %v2484_v0 = vrot.slane %v4849_v51, %v4134_v13  ;;  %v3303_v52 = vld [vmem:[%s5217_s1 + $0x78] ss:$0 sm:$0xff] }
 0x5d9   : > { %v1697_v25 = vadd.f32 %v1695_v58, %v1683_v43  ;;  %v1930_v43 = vld [vmem:[%s5219_s3 + $0x10] sm:$0xff] }
 0x5da   : > { %3661 = vmatpush3.bf16.msra.mxu1 %v3660_v55 }
 0x5db   : > { %v1702_v59 = vadd.f32 %v1701_v56, %v1697_v25  ;;  %v1931_v56 = vld [vmem:[%s5219_s3 + $0x18] sm:$0xff]  ;;  %3662 = vmatprep.subr.bf16.mxu1 %v3945_v5  ;;  %v3283_v25 = vld [vmem:[%s5219_s3 + $0x60] sm:$0xff] }
 0x5dc   : > { %v3672_v58 = vpack.c.bf16 %v1931_v56, %v1930_v43 }
 0x5dd   : > { %v1703_v60 = vmax.f32 %v1702_v59, 0.0 }
 0x5df   : > { %v1708_v61 = vmul.f32 %v1707_v21, %v1703_v60  ;;  %v3284_v21 = vld [vmem:[%s5219_s3 + $0x68] sm:$0xff] }
 0x5e0   : > { %v3663_v59 = vpack.c.bf16 %v3284_v21, %v3283_v25  ;;  %v1933_v60 = vld [vmem:[%s5219_s3 + $0x28] sm:$0xff] }
 0x5e1   : > { %v1713_v62 = vadd.f32 %v1712_v49, %v1708_v61  ;;  %v1932_v49 = vld [vmem:[%s5219_s3 + $0x20] sm:$0xff]  ;;  %v3285_v61 = vld [vmem:[%s5219_s3 + $0x70] sm:$0xff] }
 0x5e2   : > { %3664 = vmatpush3.bf16.msra.mxu1 %v3663_v59 }
 0x5e3   : > { %1717 = vrot.lane.b32.xlu1 %v1713_v62, %s5246_s24  ;;  %v3675_v62 = vpack.c.bf16 %v1933_v60, %v1932_v49  ;;  %3665 = vmatprep.subr.bf16.mxu1 %v3945_v5  ;;  %s5271_s24 = smov 4  }
 0x655   : > { %v1718_v44 = vpop.permute.xlu1 %1717 }
 0x656   : > { %1721 = vst.msk [vmem:[#allocation2] sm:$0xf] %vm1720_vm10, %v1718_v44  ;;  %v3666_v44 = vpack.c.bf16 %v3286_v26, %v3285_v61  ;;  %v1922_v26 = vld [vmem:[%s5220_s4] sm:$0x7] }
 0x657   : > { %1723 = vst.msk [vmem:[#allocation2] sm:$0xf] %vm1722_vm11, %v3941_v54  ;;  %v2179_v37 = vrot.slane %v1922_v26, %v4144_v17 }
 0x658   : > { %3667 = vmatpush3.bf16.msra.mxu1 %v3666_v44 }
 0x659   : > { %3680 = vmatprep.subr.bf16.mxu1 %v3945_v5 }
 0x65e   : > { %v1724_v16 = vld [vmem:[#allocation2] sm:$0xf] }
 0x65f   : > { %1726 = vrot.lane.b32.xlu0 %v1724_v16, %s5250_s21  ;;  %1734 = vst.msk [vmem:[#allocation2] sm:$0x1] %vm983_vm4, %v3941_v54  ;;  %1730 = vrot.lane.b32.xlu1 %v1724_v16, %s5270_s17 }
 0x6d1   : > { %v1727_v24 = vpop.permute.xlu0 %1726  ;;  %v1731_v19 = vpop.permute.xlu1 %1730 }
 0x6d2   : > { %v1729_v28 = vmax.f32 %v1724_v16, %v1727_v24  ;;  %v3290_v24 = vld [vmem:[%s5219_s3 + $0x88] sm:$0xff] }
 0x6d4   : > { %v1733_v29 = vmax.f32 %v1729_v28, %v1731_v19  ;;  %v3681_v19 = vpack.c.bf16 %v3290_v24, %v3289_v20  ;;  %v3291_v28 = vld [vmem:[%s5219_s3 + $0x90] sm:$0xff] }
 0x6d6   : > { %1736 = vst.msk [vmem:[#allocation2 + $0x1] sm:$0xf] %vm1735_vm13, %v1733_v29  ;;  %v3292_v29 = vld [vmem:[%s5219_s3 + $0x98] sm:$0xff] }
 0x6dd   : > { %v1738_v30 = vld [vmem:[#allocation2] ss:$2 sm:$0x3]  ;;  %v1739_v12 = vld [vmem:[#allocation2 + $0x1] ss:$2 sm:$0x3] }
 0x6de   : > { %v1740_v31 = vmax.f32 %v1738_v30, %v1739_v12  ;;  %v1741_v32 = vld [vmem:[#allocation2 + $0x2] ss:$2 sm:$0x3] }
 0x6df   : > { %1923 = vst.msk [vmem:[#allocation2] sm:$0xff] %vm460_vm0, %v3935_v1 }
 0x6e0   : > { %v4706_v34 = vmax.f32 %v1740_v31, %v1741_v32  ;;  %v3684_v32 = vpack.c.bf16 %v3292_v29, %v3291_v28  ;;  %v2435_v28 = vrot.slane %v4849_v51, %v4114_v4  ;;  %v2498_v29 = vrot.slane %v4849_v51, %v4139_v15 }
 0x6e2   : > { %v1744_v35 = vsel %vm1743_vm14, %v4706_v34, 0.0 }
 0x6e3   : > { %v1745_v36 = vrot.slane %v1744_v35, 4 }
 0x6e5   : > { %v1746_v18 = vadd.f32 %v1745_v36, %v1744_v35  ;;  %v3294_v35 = vld [vmem:[%s5219_s3 + $0xa8] sm:$0xff] }
 0x6e7   : > { %v1747_v33 = vrot.slane %v1746_v18, 2 }
 0x6e9   : > { %v1748_v42 = vadd.f32 %v1747_v33, %v1746_v18  ;;  %v3295_v18 = vld [vmem:[%s5219_s3 + $0xb0] sm:$0xff]  ;;  %v3296_v33 = vld [vmem:[%s5219_s3 + $0xb8] sm:$0xff] }
 0x6eb   : > { %v1749_v38 = vrot.slane %v1748_v42, 1 }
 0x6ed   : > { %v1750_v40 = vadd.f32 %v1749_v38, %v1748_v42  ;;  %v3690_v42 = vpack.c.bf16 %v3296_v33, %v3295_v18  ;;  %v4819_v38 = vld [vmem:[%s5217_s1 + $0x60] sm:$0xff] }
 0x6ef   : > { %3461 = vmatmul.mubr.msk.f32.vlgmr.msra.gmra.mrb[0].mxu0 %vm985_vm7, %v1750_v40  ;;  %v2218_v40 = vrot.slane %v4819_v38, %v4109_v3 }
 0x6f0   : > { %3464 = vmatpush3.msk.msra.mxu0 %vm1837_vm15, %v1833_v48  ;;  %3465 = vmatprep.mubr.msk.f32.mxu0 %vm3946_vm12, %v3935_v1  ;;  %v2232_v48 = vrot.slane %v4819_v38, %v4114_v4 }
 0x6f1   : > { %3668 = vmatprep.subr.bf16.mxu0 %v3945_v5  ;;  %2220 = vrot.lane.b32.xlu0 %v2218_v40, %s5271_s24 }
 0x6f5   : > { %2234 = vrot.lane.b32.xlu0 %v2232_v48, %s5272_s14 }
 0x763   : > { %v2221_v55 = vpop.permute.xlu0 %2220 }
 0x767   : > { %v2235_v56 = vpop.permute.xlu0 %2234 }
 0x7c2   : > { %v1828_v63 = vpop.f32.mrb[0].mxu0 }
 0x7c3   : > { %v1832_v27 = vmax.f32 %v1828_v63, 0.0  ;;  %v3462_v41 = vpop.f32.mrb[1].mxu0  ;;  %v2260_v63 = vrot.slane %v4819_v38, %v4129_v11 }
 0x7c4   : > { %v4836_v41 = vld [vmem:[%s5217_s1 + $0x68] sm:$0xff] }
 0x7c5   : > { %3466 = vmatmul.mubr.msk.f32.vlgmr.msra.gmra.mrb[2].mxu0 %vm946_vm3, %v1832_v27  ;;  %2262 = vrot.lane.b32.xlu0 %v2260_v63, %s5273_s16  ;;  %v2295_v27 = vrot.slane %v4819_v38, %v4139_v15  ;;  %v2323_v6 = vrot.slane %v4836_v41, %v4109_v3  ;;  %v2358_v45 = vrot.slane %v4836_v41, %v4129_v11 }
 0x7c6   : > { %3503 = vmatprep.mubr.msk.f32.mxu0 %vm3946_vm12, %v3935_v1  ;;  %3670 = vmatpush3.bf16.msra.mxu0 %v3669_v50  ;;  %v2386_v46 = vrot.slane %v4836_v41, %v4134_v13  ;;  %v2449_v50 = vrot.slane %v4849_v51, %v4124_v8  ;;  %v2309_v20 = vrot.slane %v4836_v41, %v4144_v17 }
 0x7c7   : > { %3671 = vmatprep.subr.bf16.mxu0 %v3945_v5  ;;  %v2344_v24 = vrot.slane %v4836_v41, %v4124_v8 }
 0x7c9   : > { %2297 = vrot.lane.b32.xlu0 %v2295_v27, %s5272_s14 }
 0x7ca   : > { %3673 = vmatpush3.bf16.msra.mxu0 %v3672_v58 }
 0x7cb   : > { %3674 = vmatprep.subr.bf16.mxu0 %v3945_v5 }
 0x7cd   : > { %2325 = vrot.lane.b32.xlu0 %v2323_v6, %s5273_s16 }
 0x7ce   : > { %3676 = vmatpush3.bf16.msra.mxu0 %v3675_v62 }
 0x7cf   : > { %3677 = vmatprep.subr.bf16.mxu0 %v3945_v5 }
 0x7d1   : > { %2360 = vrot.lane.b32.xlu0 %v2358_v45, %s5272_s14 }
 0x7d2   : > { %3679 = vmatpush3.bf16.msra.mxu0 %v3678_v7 }
 0x7d3   : > { %3692 = vmatprep.subr.bf16.mxu0 %v3945_v5 }
 0x7d5   : > { %2388 = vrot.lane.b32.xlu0 %v2386_v46, %s5273_s16 }
 0x7d9   : > { %2423 = vrot.lane.b32.xlu0 %v2421_v57, %s5272_s14 }
 0x7dd   : > { %2451 = vrot.lane.b32.xlu0 %v2449_v50, %s5273_s16 }
 0x7e1   : > { %2486 = vrot.lane.b32.xlu0 %v2484_v0, %s5272_s14 }
 0x7e5   : > { %2514 = vrot.lane.b32.xlu0 %v3303_v52, %s5273_s16  ;;  %s5274_s16 = smov 12  }
 0x837   : > { %v2263_v25 = vpop.permute.xlu0 %2262 }
 0x898   : > { %v1907_v39 = vpop.f32.mrb[2].mxu0 }
 0x899   : > { %v3278_v9 = vmul.f32 -1.442695, %v1907_v39  ;;  %v3467_v10 = vpop.f32.mrb[3].mxu0 }
 0x89b   : > { %3828 = vpow2.f32 %v3278_v9  ;;  %v2185_v9 = vrot.slane %v1922_v26, %v4109_v3 }
 0x8a5   : > { %v3829_v22 = vpop.eup %3828 }
 0x8a6   : > { %v1914_v53 = vadd.f32 1.0, %v3829_v22  ;;  %v2190_v22 = vrot.slane %v1922_v26, %v4114_v4 }
 0x8a8   : > { %3830 = vrcp.f32 %v1914_v53 }
 0x8b2   : > { %v3831_v2 = vpop.eup %3830 }
 0x8b3   : > { %v1920_v14 = vrot.slane %v3831_v2, %v4144_v17 }
 0x8b5   : > { %v1921_v16 = vmul.f32 %v1920_v14, %v4706_v34  ;;  %v3293_v34 = vld [vmem:[%s5219_s3 + $0xa0] sm:$0xff]  ;;  %v2246_v14 = vrot.slane %v4819_v38, %v4124_v8  ;;  %v2470_v8 = vrot.slane %v4849_v51, %v4163_v23 }
 0x8b6   : > { %v3687_v36 = vpack.c.bf16 %v3294_v35, %v3293_v34 }
 0x8b7   : > { %1926 = vst.msk [vmem:[#allocation2 + $0x1] sm:$0x3] %vm1743_vm14, %v1921_v16  ;;  %v2281_v16 = vrot.slane %v4819_v38, %v4134_v13  ;;  %v2407_v13 = vrot.slane %v4849_v51, %v4144_v17 }
 0x8be   : > { %v1936_v30 = vld [vmem:[#allocation2 + $0x1] sm:$0x3] }
 0x8bf   : > { %v1927_v12 = vld [vmem:[#allocation2] sm:$0x3]  ;;  %v2092_v31 = vld [vmem:[#allocation2 + $0x2] sm:$0x3]  ;;  %3485 = vmatmul.mubr.msk.f32.vlgmr.msra.gmra.mrb[0].mxu1 %vm985_vm7, %v1936_v30 }
 0x8c0   : > { %3504 = vmatmul.mubr.msk.f32.vlgmr.msra.gmra.mrb[4].mxu0 %vm985_vm7, %v1927_v12  ;;  %2199 = vst.msk [vmem:[#allocation2] sm:$0xff] %vm460_vm0, %v3935_v1  ;;  %3682 = vmatpush3.bf16.msra.mxu1 %v3681_v19  ;;  %v2372_v19 = vrot.slane %v4836_v41, %v4163_v23  ;;  %v2298_v12 = vpop.permute.xlu0 %2297 }
 0x8c1   : > { %3522 = vmatprep.mubr.msk.f32.mxu1 %vm3946_vm12, %v3935_v1  ;;  %3683 = vmatprep.subr.bf16.mxu1 %v3945_v5 }
 0x8c2   : > { %3541 = vmatprep.mubr.msk.f32.mxu0 %vm3946_vm12, %v3935_v1 }
 0x8c4   : > { %3685 = vmatpush3.bf16.msra.mxu1 %v3684_v32 }
 0x8c5   : > { %3686 = vmatprep.subr.bf16.mxu1 %v3945_v5 }
 0x8c7   : > { %v4865_v43 = vld [vmem:[#allocation2] sm:$0x3] }
 0x8c8   : > { %3688 = vmatpush3.bf16.msra.mxu1 %v3687_v36  ;;  %v2237_v58 = vmul.f32 %v2235_v56, %v4865_v43  ;;  %v2265_v21 = vmul.f32 %v2263_v25, %v4865_v43  ;;  %v2223_v30 = vmul.f32 %v2221_v55, %v4865_v43 }
 0x8c9   : > { %3689 = vmatprep.subr.bf16.mxu1 %v3945_v5 }
 0x8ca   : > { %2239 = vrot.lane.b32.xlu0 %v2237_v58, %s5270_s17 }
 0x8cc   : > { %3691 = vmatpush3.bf16.msra.mxu1 %v3690_v42 }
 0x8cd   : > { %3544 = vmatprep.subr.mxu1 %v3935_v1 }
 0x8ce   : > { %2267 = vrot.lane.b32.xlu0 %v2265_v21, %s5268_s15 }
 0x8cf   : > { %3523 = vmatmul.mubr.msk.f32.vlgmr.msra.gmra.mrb[2].mxu1 %vm985_vm7, %v2092_v31  ;;  %v2326_v31 = vpop.permute.xlu0 %2325 }
 0x8d0   : > { %3546 = vmatprep.mubr.msk.f32.mxu1 %vm3946_vm12, %v3935_v1 }
 0x8d3   : > { %v2361_v34 = vpop.permute.xlu0 %2360 }
 0x8d7   : > { %v2389_v27 = vpop.permute.xlu0 %2388 }
 0x8db   : > { %v2424_v57 = vpop.permute.xlu0 %2423 }
 0x8df   : > { %v2452_v25 = vpop.permute.xlu0 %2451 }
 0x992   : > { %v2015_v59 = vpop.f32.mrb[0].mxu1 }
 0x993   : > { %v2088_v49 = vpop.f32.mrb[4].mxu0  ;;  %v3486_v61 = vpop.f32.mrb[1].mxu1 }
 0x994   : > { %v2089_v60 = vadd.f32 %v2088_v49, %v2015_v59  ;;  %v3505_v62 = vpop.f32.mrb[5].mxu0 }
 0x9a2   : > { %v2171_v47 = vpop.f32.mrb[2].mxu1 }
 0x9a3   : > { %v2175_v44 = vadd.f32 %v2171_v47, %v2089_v60  ;;  %v3524_v7 = vpop.f32.mrb[3].mxu1  ;;  %v2487_v60 = vpop.permute.xlu0 %2486 }
 0x9a5   : > { %v2180_v39 = vadd.f32 %v2179_v37, %v2175_v44  ;;  %v2460_v37 = vld [vmem:[#allocation2 + $0x4] sm:$0x3] }
 0x9a6   : > { %v2489_v47 = vmul.f32 %v2487_v60, %v2460_v37 }
 0x9a7   : > { %v2181_v10 = vmax.f32 %v2180_v39, 0.0  ;;  %v2515_v7 = vpop.permute.xlu0 %2514 }
 0x9a9   : > { %v2186_v53 = vmul.f32 %v2185_v9, %v2181_v10  ;;  %v2517_v9 = vmul.f32 %v2515_v7, %v2460_v37 }
 0x9ab   : > { %v2191_v2 = vadd.f32 %v2190_v22, %v2186_v53  ;;  %v2212_v53 = vrot.slane %v4819_v38, %v4144_v17 }
 0x9ad   : > { %2203 = vrot.lane.b32.xlu1 %v2191_v2, %s5272_s14  ;;  %s5275_s14 = smov 124   ;;  %v2213_v2 = vmul.f32 %v2212_v53, %v4865_v43 }
 0x9b1   : > { %2248 = vrot.lane.b32.xlu1 %v2246_v14, %s5274_s16 }
 0x9b5   : > { %2283 = vrot.lane.b32.xlu1 %v2281_v16, %s5271_s24  ;;  %v2240_v16 = vpop.permute.xlu0 %2239 }
 0x9b9   : > { %2311 = vrot.lane.b32.xlu1 %v2309_v20, %s5274_s16 }
 0x9bd   : > { %2346 = vrot.lane.b32.xlu1 %v2344_v24, %s5271_s24  ;;  %v2268_v24 = vpop.permute.xlu0 %2267 }
 0x9c1   : > { %2374 = vrot.lane.b32.xlu1 %v2372_v19, %s5274_s16 }
 0x9c5   : > { %2409 = vrot.lane.b32.xlu1 %v2407_v13, %s5271_s24  ;;  %v2275_v13 = vrot.slane %v4819_v38, %v4163_v23 }
 0x9c9   : > { %2437 = vrot.lane.b32.xlu1 %v2435_v28, %s5274_s16 }
 0x9cd   : > { %2472 = vrot.lane.b32.xlu1 %v2470_v8, %s5271_s24 }
 0x9d1   : > { %2500 = vrot.lane.b32.xlu1 %v2498_v29, %s5274_s16  ;;  %s3346_s16 = sshll.u32 %s4039_s29, 4  ;;  %s3947_s29 = smov [#allocation6]  }
 0x9d2   : > { %s5174_s6 = scalar_lea.hbm %s5229_s13, %s3346_s16 }
 0x9d5   : > { %2225 = vrot.lane.b32.xlu1 %v2223_v30, %s5275_s14 }
 0xa1f   : > { %v2204_v32 = vpop.permute.xlu1 %2203 }
 0xa20   : > { %2207 = vst.msk [vmem:[#allocation2 + $0x2] sm:$0x3] %vm2206_vm1, %v2204_v32 }
 0xa23   : > { %v2249_v35 = vpop.permute.xlu1 %2248 }
 0xa24   : > { %v2251_v36 = vmul.f32 %v2249_v35, %v4865_v43  ;;  %v2338_v43 = vrot.slane %v4836_v41, %v4114_v4 }
 0xa26   : > { %2253 = vrot.lane.b32.xlu1 %v2251_v36, %s5269_s23 }
 0xa27   : > { %v4909_v18 = vld [vmem:[#allocation2 + $0x3] sm:$0x3]  ;;  %v2271_v33 = vld [vmem:[#allocation2 + $0x1] sm:$0x3]  ;;  %v2284_v42 = vpop.permute.xlu1 %2283 }
 0xa28   : > { %v4911_v40 = vld [vmem:[#allocation2 + $0x2] sm:$0x3]  ;;  %v2286_v48 = vmul.f32 %v2284_v42, %v2271_v33  ;;  %v2300_v63 = vmul.f32 %v2298_v12, %v2271_v33  ;;  %v2328_v46 = vmul.f32 %v2326_v31, %v2271_v33  ;;  %v2426_v59 = vmul.f32 %v2424_v57, %v4909_v18  ;;  %2540 = vst.msk [vmem:[#allocation2] sm:$0x3] %vm2539_vm2, %v3941_v54 }
 0xa29   : > { %2561 = vst.msk [vmem:[#allocation2 + $0x3] sm:$0x1] %vm983_vm4, %v3941_v54  ;;  %v2363_v52 = vmul.f32 %v2361_v34, %v4911_v40  ;;  %v2391_v58 = vmul.f32 %v2389_v27, %v4911_v40  ;;  %v2454_v62 = vmul.f32 %v2452_v25, %v4909_v18  ;;  %v2276_v30 = vmul.f32 %v2275_v13, %v2271_v33  ;;  %v3308_v13 = vld [vmem:[%s5221_s5 + $0x60] sm:$0xff] }
 0xa2a   : > { %2302 = vrot.lane.b32.xlu0 %v2300_v63, %s5270_s17  ;;  %2288 = vrot.lane.b32.xlu1 %v2286_v48, %s5275_s14  ;;  %v2339_v23 = vmul.f32 %v2338_v43, %v4911_v40 }
 0xa2b   : > { %v2312_v6 = vpop.permute.xlu1 %2311 }
 0xa2c   : > { %v2314_v45 = vmul.f32 %v2312_v6, %v2271_v33 }
 0xa2e   : > { %2330 = vrot.lane.b32.xlu0 %v2328_v46, %s5268_s15  ;;  %2316 = vrot.lane.b32.xlu1 %v2314_v45, %s5269_s23 }
 0xa2f   : > { %v2347_v50 = vpop.permute.xlu1 %2346 }
 0xa30   : > { %v2349_v0 = vmul.f32 %v2347_v50, %v4911_v40  ;;  %v2401_v50 = vrot.slane %v4836_v41, %v4139_v15 }
 0xa32   : > { %2365 = vrot.lane.b32.xlu0 %v2363_v52, %s5270_s17  ;;  %2351 = vrot.lane.b32.xlu1 %v2349_v0, %s5275_s14 }
 0xa33   : > { %v2375_v55 = vpop.permute.xlu1 %2374 }
 0xa34   : > { %v2377_v56 = vmul.f32 %v2375_v55, %v4911_v40 }
 0xa36   : > { %2393 = vrot.lane.b32.xlu0 %v2391_v58, %s5268_s15  ;;  %2379 = vrot.lane.b32.xlu1 %v2377_v56, %s5269_s23  ;;  %v2402_v56 = vmul.f32 %v2401_v50, %v4909_v18  ;;  %v3317_v50 = vld [vmem:[%s5219_s3 + $0xc0] sm:$0xff] }
 0xa37   : > { %v2410_v21 = vpop.permute.xlu1 %2409 }
 0xa38   : > { %v2412_v49 = vmul.f32 %v2410_v21, %v4909_v18 }
 0xa3a   : > { %2428 = vrot.lane.b32.xlu0 %v2426_v59, %s5270_s17  ;;  %2414 = vrot.lane.b32.xlu1 %v2412_v49, %s5275_s14  ;;  %v2464_v59 = vrot.slane %v4849_v51, %v4129_v11 }
 0xa3b   : > { %v2438_v61 = vpop.permute.xlu1 %2437 }
 0xa3c   : > { %v2440_v26 = vmul.f32 %v2438_v61, %v4909_v18  ;;  %v3302_v18 = vld [vmem:[%s5218_s2 + $0xc] sm:$0x7] }
 0xa3d   : > { %v2526_v11 = vrot.slane %v3302_v18, %v4144_v17 }
 0xa3e   : > { %2456 = vrot.lane.b32.xlu0 %v2454_v62, %s5268_s15  ;;  %2442 = vrot.lane.b32.xlu1 %v2440_v26, %s5269_s23  ;;  %v2465_v62 = vmul.f32 %v2464_v59, %v2460_v37 }
 0xa3f   : > { %v2473_v44 = vpop.permute.xlu1 %2472 }
 0xa40   : > { %v2475_v39 = vmul.f32 %v2473_v44, %v2460_v37 }
 0xa42   : > { %2477 = vrot.lane.b32.xlu1 %v2475_v39, %s5275_s14  ;;  %2491 = vrot.lane.b32.xlu0 %v2489_v47, %s5270_s17 }
 0xa43   : > { %v2501_v10 = vpop.permute.xlu1 %2500 }
 0xa44   : > { %v2503_v22 = vmul.f32 %v2501_v10, %v2460_v37  ;;  %v2537_v37 = vrot.slane %v3302_v18, %v4114_v4  ;;  %v3306_v4 = vld [vmem:[%s5221_s5 + $0x50] sm:$0xff] }
 0xa46   : > { %2505 = vrot.lane.b32.xlu1 %v2503_v22, %s5269_s23  ;;  %2519 = vrot.lane.b32.xlu0 %v2517_v9, %s5268_s15  ;;  %v2532_v22 = vrot.slane %v3302_v18, %v4109_v3 }
 0xa47   : > { %v2226_v14 = vpop.permute.xlu1 %2225 }
 0xa48   : > { %v2228_v20 = vadd.f32 %v2226_v14, %v2213_v2 }
 0xa4a   : > { %v2242_v19 = vadd.f32 %v2240_v16, %v2228_v20  ;;  %v3304_v20 = vld [vmem:[%s5221_s5 + $0x40] sm:$0xff] }
 0xa98   : > { %v2254_v28 = vpop.permute.xlu1 %2253 }
 0xa99   : > { %v2256_v8 = vadd.f32 %v2254_v28, %v2242_v19  ;;  %v3307_v19 = vld [vmem:[%s5221_s5 + $0x58] sm:$0xff] }
 0xa9a   : > { %v3696_v28 = vpack.c.bf16 %v3307_v19, %v3306_v4  ;;  %v3339_v4 = vld [vmem:[%s5219_s3 + $0x160] sm:$0xff]  ;;  %v3340_v19 = vld [vmem:[%s5219_s3 + $0x168] sm:$0xff] }
 0xa9b   : > { %v2270_v29 = vadd.f32 %v2268_v24, %v2256_v8  ;;  %v3305_v24 = vld [vmem:[%s5221_s5 + $0x48] sm:$0xff] }
 0xa9c   : > { %v2303_v12 = vpop.permute.xlu0 %2302  ;;  %v2289_v31 = vpop.permute.xlu1 %2288  ;;  %v3693_v17 = vpack.c.bf16 %v3305_v24, %v3304_v20  ;;  %v3309_v8 = vld [vmem:[%s5221_s5 + $0x68] sm:$0xff]  ;;  %v3337_v20 = vld [vmem:[%s5219_s3 + $0x150] sm:$0xff]  ;;  %v3338_v24 = vld [vmem:[%s5219_s3 + $0x158] sm:$0xff] }
 0xa9d   : > { %v2277_v32 = vadd.f32 %v2276_v30, %v2270_v29  ;;  %v3699_v29 = vpack.c.bf16 %v3309_v8, %v3308_v13  ;;  %v3310_v30 = vld [vmem:[%s5221_s5 + $0x70] sm:$0xff]  ;;  %v3735_v13 = vpack.c.bf16 %v3340_v19, %v3339_v4  ;;  %v3342_v8 = vld [vmem:[%s5219_s3 + $0x178] sm:$0xff] }
 0xa9e   : > { %3694 = vmatpush3.bf16.msra.mxu0 %v3693_v17 }
 0xa9f   : > { %v2291_v34 = vadd.f32 %v2289_v31, %v2277_v32  ;;  %3695 = vmatprep.subr.bf16.mxu0 %v3945_v5 }
 0xaa0   : > { %v2331_v35 = vpop.permute.xlu0 %2330  ;;  %v2317_v36 = vpop.permute.xlu1 %2316 }
 0xaa1   : > { %v2305_v42 = vadd.f32 %v2303_v12, %v2291_v34  ;;  %v3311_v12 = vld [vmem:[%s5221_s5 + $0x78] sm:$0xff] }
 0xaa2   : > { %3697 = vmatpush3.bf16.msra.mxu0 %v3696_v28  ;;  %v3702_v31 = vpack.c.bf16 %v3311_v12, %v3310_v30  ;;  %v2652_v34 = vld [vmem:[#allocation3 + $0x4] sm:$0xf]  ;;  %v3341_v28 = vld [vmem:[%s5219_s3 + $0x170] sm:$0xff] }
 0xaa3   : > { %v2319_v48 = vadd.f32 %v2317_v36, %v2305_v42  ;;  %3698 = vmatprep.subr.bf16.mxu0 %v3945_v5  ;;  %3545 = vmatpush3.msk.msra.mxu1 %vm1837_vm15, %v2652_v34  ;;  %v3008_v34 = vld [vmem:[%s5225_s9 + $0x8] sm:$0xff] }
 0xaa4   : > { %v2366_v63 = vpop.permute.xlu0 %2365  ;;  %v2352_v27 = vpop.permute.xlu1 %2351  ;;  %3704 = vmatprep.subr.bf16.mxu1 %v3945_v5 }
 0xaa5   : > { %v2333_v6 = vadd.f32 %v2331_v35, %v2319_v48 }
 0xaa6   : > { %3700 = vmatpush3.bf16.msra.mxu0 %v3699_v29  ;;  %v3738_v29 = vpack.c.bf16 %v3342_v8, %v3341_v28 }
 0xaa7   : > { %v2340_v38 = vadd.f32 %v2339_v23, %v2333_v6  ;;  %3701 = vmatprep.subr.bf16.mxu0 %v3945_v5 }
 0xaa8   : > { %v2380_v45 = vpop.permute.xlu1 %2379  ;;  %v2394_v33 = vpop.permute.xlu0 %2393 }
 0xaa9   : > { %v2354_v46 = vadd.f32 %v2352_v27, %v2340_v38 }
 0xaaa   : > { %3703 = vmatpush3.bf16.msra.mxu0 %v3702_v31 }
 0xaab   : > { %v2368_v57 = vadd.f32 %v2366_v63, %v2354_v46  ;;  %3716 = vmatprep.subr.bf16.mxu0 %v3945_v5  ;;  %v3325_v46 = vld [vmem:[%s5219_s3 + $0x100] sm:$0xff] }
 0xaac   : > { %v2415_v52 = vpop.permute.xlu1 %2414  ;;  %v2429_v58 = vpop.permute.xlu0 %2428 }
 0xaad   : > { %v2382_v0 = vadd.f32 %v2380_v45, %v2368_v57 }
 0xaaf   : > { %v2396_v55 = vadd.f32 %v2394_v33, %v2382_v0  ;;  %v3326_v33 = vld [vmem:[%s5219_s3 + $0x108] sm:$0xff] }
 0xab0   : > { %v2443_v40 = vpop.permute.xlu1 %2442  ;;  %v2457_v60 = vpop.permute.xlu0 %2456  ;;  %v3705_v57 = vpack.c.bf16 %v3326_v33, %v3325_v46  ;;  %v3318_v0 = vld [vmem:[%s5219_s3 + $0xc8] sm:$0xff]  ;;  %v3093_v33 = vld [vmem:[%s5227_s11 + $0x18] sm:$0xff] }
 0xab1   : > { %v2403_v25 = vadd.f32 %v2402_v56, %v2396_v55  ;;  %v3327_v55 = vld [vmem:[%s5219_s3 + $0x110] sm:$0xff]  ;;  %v3328_v56 = vld [vmem:[%s5219_s3 + $0x118] sm:$0xff] }
 0xab3   : > { %v2417_v21 = vadd.f32 %v2415_v52, %v2403_v25  ;;  %v3717_v52 = vpack.c.bf16 %v3318_v0, %v3317_v50  ;;  %v3319_v25 = vld [vmem:[%s5219_s3 + $0xd0] sm:$0xff]  ;;  %v3094_v50 = vld [vmem:[%s5227_s11 + $0x20] sm:$0xff]  ;;  %v3095_v0 = vld [vmem:[%s5227_s11 + $0x28] sm:$0xff] }
 0xab4   : > { %v2478_v26 = vpop.permute.xlu1 %2477  ;;  %v2492_v44 = vpop.permute.xlu0 %2491 }
 0xab5   : > { %v2431_v49 = vadd.f32 %v2429_v58, %v2417_v21  ;;  %v3708_v58 = vpack.c.bf16 %v3328_v56, %v3327_v55  ;;  %v3320_v21 = vld [vmem:[%s5219_s3 + $0xd8] sm:$0xff] }
 0xab6   : > { %v3720_v59 = vpack.c.bf16 %v3320_v21, %v3319_v25  ;;  %v3316_v25 = vld [vmem:[%s5220_s4 + $0x4] sm:$0x7] }
 0xab7   : > { %v2445_v61 = vadd.f32 %v2443_v40, %v2431_v49  ;;  %v3329_v40 = vld [vmem:[%s5219_s3 + $0x120] sm:$0xff]  ;;  %v3330_v49 = vld [vmem:[%s5219_s3 + $0x128] sm:$0xff] }
 0xab8   : > { %v2506_v7 = vpop.permute.xlu1 %2505  ;;  %v2520_v9 = vpop.permute.xlu0 %2519 }
 0xab9   : > { %v2459_v47 = vadd.f32 %v2457_v60, %v2445_v61  ;;  %v3711_v60 = vpack.c.bf16 %v3330_v49, %v3329_v40  ;;  %v3321_v61 = vld [vmem:[%s5219_s3 + $0xe0] sm:$0xff] }
 0xabb   : > { %v2466_v15 = vadd.f32 %v2465_v62, %v2459_v47  ;;  %v3322_v62 = vld [vmem:[%s5219_s3 + $0xe8] sm:$0xff] }
 0xabc   : > { %v3723_v47 = vpack.c.bf16 %v3322_v62, %v3321_v61  ;;  %v2998_v62 = vrot.slane %v3316_v25, 2 }
 0xabd   : > { %v2480_v41 = vadd.f32 %v2478_v26, %v2466_v15  ;;  %v3331_v26 = vld [vmem:[%s5219_s3 + $0x130] sm:$0xff] }
 0xabe   : > { %v3323_v15 = vld [vmem:[%s5219_s3 + $0xf0] sm:$0xff] }
 0xabf   : > { %v2494_v39 = vadd.f32 %v2492_v44, %v2480_v41  ;;  %v3332_v44 = vld [vmem:[%s5219_s3 + $0x138] sm:$0xff] }
 0xac0   : > { %v3324_v41 = vld [vmem:[%s5219_s3 + $0xf8] sm:$0xff] }
 0xac1   : > { %v2508_v10 = vadd.f32 %v2506_v7, %v2494_v39  ;;  %v3714_v7 = vpack.c.bf16 %v3332_v44, %v3331_v26  ;;  %v3726_v18 = vpack.c.bf16 %v3324_v41, %v3323_v15  ;;  %v3004_v44 = vld [vmem:[%s5224_s8] sm:$0x1] }
 0xac3   : > { %v2522_v51 = vadd.f32 %v2520_v9, %v2508_v10 }
 0xac5   : > { %v2527_v53 = vadd.f32 %v2526_v11, %v2522_v51 }
 0xac7   : > { %v2528_v2 = vmax.f32 %v2527_v53, 0.0 }
 0xac9   : > { %v2533_v14 = vmul.f32 %v2532_v22, %v2528_v2  ;;  %v3335_v2 = vld [vmem:[%s5219_s3 + $0x140] sm:$0xff] }
 0xacb   : > { %v2538_v16 = vadd.f32 %v2537_v37, %v2533_v14  ;;  %v3336_v14 = vld [vmem:[%s5219_s3 + $0x148] sm:$0xff] }
 0xacd   : > { %2542 = vrot.lane.b32.xlu1 %v2538_v16, %s5271_s24  ;;  %v3729_v16 = vpack.c.bf16 %v3336_v14, %v3335_v2  ;;  %s446_s24 = sand.u32 1, %s3922_s26  }
 0xace   : > { %s447_s15 = scalar_lea.vmem [#allocation6], %s446_s24  ;;  %s3175_s19 = scalar_lea.sflag [#allocation5], %s446_s24 }
 0xacf   : > { %s3187_s23 = sshll.u32 %s447_s15, 4  ;;  %s5176_s23 = int_to_ptr.vmem [resolvable:$true] %s3187_s23 }
 0xb3f   : > { %v2543_v3 = vpop.permute.xlu1 %2542 }
 0xb40   : > { %2546 = vst.msk [vmem:[#allocation2] sm:$0x3] %vm2545_vm5, %v2543_v3  ;;  %v3732_v3 = vpack.c.bf16 %v3338_v24, %v3337_v20 }
 0xb41   : > { %2548 = vst.msk [vmem:[#allocation2] sm:$0x3] %vm2547_vm6, %v3941_v54 }
 0xb48   : > { %v2549_v32 = vld [vmem:[#allocation2] sm:$0x3] }
 0xb49   : > { %2551 = vrot.lane.b32.xlu0 %v2549_v32, %s5275_s14  ;;  %2559 = vst.msk [vmem:[#allocation2] sm:$0x1] %vm983_vm4, %v3941_v54  ;;  %2555 = vrot.lane.b32.xlu1 %v2549_v32, %s5270_s17  ;;  %s3864_s17 = scalar_lea.vmem %s5176_s23, 16  ;;  %s3868_s14 = sshll.u32 %s3947_s29, 4  ;;  %s3869_s14 = int_to_ptr.vmem [resolvable:$false] %s3868_s14 }
 0xb4a   : > { %p3865_p6 = scmp.ne.s32.totalorder %s5176_s23, %s3864_s17  ;;  %s3870_s22 = scalar_lea.vmem %s3869_s14, 32 }
 0xb4b   : > { %p3871_p2 = scmp.lt.s32.totalorder %s5176_s23, %s3869_s14  ;;  %p3872_p3 = scmp.lt.s32.totalorder %s3870_s22, %s3864_s17 }
 0xb4c   : > { %p3866_p10 = pnand %p3865_p6, %p5276_p9 }
 0xb4d   : > { %p3873_p4 = por %p3872_p3, %p3871_p2 }
 0xb4e   : > { %p3867_p12 = pneg %p3866_p10 }
 0xb50   : > { %v2562_v48 = vld [vmem:[#allocation2] ss:$2 sm:$0x1]  ;;  %p3874_p7 = pnand %p3873_p4, %p3867_p12 }
 0xbbb   : > { %v2552_v35 = vpop.permute.xlu0 %2551  ;;  %v2556_v36 = vpop.permute.xlu1 %2555 }
 0xbbc   : > { %v2554_v42 = vmax.f32 %v2549_v32, %v2552_v35  ;;  %v3007_v32 = vld [vmem:[%s5225_s9] sm:$0xff] }
 0xbbd   : > { %v3741_v35 = vpack.c.bf16 %v3008_v34, %v3007_v32 }
 0xbbe   : > { %v2558_v43 = vmax.f32 %v2554_v42, %v2556_v36  ;;  %v3009_v36 = vld [vmem:[%s5225_s9 + $0x10] sm:$0xff] }
 0xbc0   : > { %2560 = vst.msk [vmem:[#allocation2 + $0x1] sm:$0x3] %vm1743_vm14, %v2558_v43  ;;  %v3011_v43 = vld [vmem:[%s5225_s9 + $0x20] sm:$0xff] }
 0xbc7   : > { %v2563_v63 = vld [vmem:[#allocation2 + $0x1] ss:$2 sm:$0x1]  ;;  %v2565_v27 = vld [vmem:[#allocation2 + $0x2] ss:$2 sm:$0x1] }
 0xbc8   : > { %v2564_v54 = vmax.f32 %v2562_v48, %v2563_v63  ;;  %2738 = vst.msk [vmem:[#allocation2] sm:$0xff] %vm460_vm0, %v3935_v1  ;;  %v3012_v48 = vld [vmem:[%s5225_s9 + $0x28] sm:$0xff]  ;;  %vm3172_vm0 = vcmask 32768  }
 0xbc9   : > { %v3747_v63 = vpack.c.bf16 %v3012_v48, %v3011_v43 }
 0xbca   : > { %v2566_v6 = vmax.f32 %v2564_v54, %v2565_v27  ;;  %v3013_v27 = vld [vmem:[%s5225_s9 + $0x30] sm:$0xff]  ;;  %v3014_v54 = vld [vmem:[%s5225_s9 + $0x38] sm:$0xff] }
 0xbcc   : > { %3542 = vmatmul.mubr.msk.f32.vlgmr.msra.gmra.mrb[6].mxu0 %vm985_vm7, %v2566_v6 }
 0xbcd   : > { %3584 = vmatprep.mubr.msk.f32.mxu0 %vm3946_vm12, %v3935_v1  ;;  %3718 = vmatpush3.bf16.msra.mxu0 %v3717_v52  ;;  %v3759_v52 = vpack.c.bf16 %v3095_v0, %v3094_v50 }
 0xbce   : > { %3719 = vmatprep.subr.bf16.mxu0 %v3945_v5 }
 0xbcf   : > { %v2742_v39 = vld [vmem:[#allocation2] sm:$0x1]  ;;  %v2908_v30 = vld [vmem:[#allocation2 + $0x2] sm:$0x1] }
 0xbd1   : > { %3721 = vmatpush3.bf16.msra.mxu0 %v3720_v59 }
 0xbd2   : > { %3722 = vmatprep.subr.bf16.mxu0 %v3945_v5 }
 0xbd5   : > { %3724 = vmatpush3.bf16.msra.mxu0 %v3723_v47  ;;  %v3001_v47 = vld [vmem:[%s5223_s7] sm:$0x1] }
 0xbd6   : > { %3725 = vmatprep.subr.bf16.mxu0 %v3945_v5 }
 0xbd9   : > { %3727 = vmatpush3.bf16.msra.mxu0 %v3726_v18  ;;  %v3096_v18 = vld [vmem:[%s5227_s11 + $0x30] sm:$0xff] }
 0xbda   : > { %3740 = vmatprep.subr.bf16.mxu0 %v3945_v5 }
 0xbdc   : > { %3585 = vmatmul.mubr.msk.f32.vlgmr.msra.gmra.mrb[8].mxu0 %vm985_vm7, %v2742_v39  ;;  %v3097_v39 = vld [vmem:[%s5227_s11 + $0x38] sm:$0xff] }
 0xbdd   : > { %3622 = vmatprep.mubr.msk.f32.mxu0 %vm3946_vm12, %v3935_v1  ;;  %3742 = vmatpush3.bf16.msra.mxu0 %v3741_v35 }
 0xbde   : > { %3743 = vmatprep.subr.bf16.mxu0 %v3945_v5 }
 0xc9f   : > { %v2646_v23 = vpop.f32.mrb[6].mxu0 }
 0xca0   : > { %v2650_v38 = vmax.f32 %v2646_v23, 0.0  ;;  %v3543_v45 = vpop.f32.mrb[7].mxu0  ;;  %v3090_v23 = vld [vmem:[%s5227_s11] sm:$0xff] }
 0xca1   : > { %v3092_v45 = vld [vmem:[%s5227_s11 + $0x10] sm:$0xff] }
 0xca2   : > { %3547 = vmatmul.mubr.msk.f32.vlgmr.msra.gmra.mrb[4].mxu1 %vm946_vm3, %v2650_v38  ;;  %v3091_v38 = vld [vmem:[%s5227_s11 + $0x8] sm:$0xff] }
 0xca3   : > { %3565 = vmatprep.mubr.msk.f32.mxu1 %vm3946_vm12, %v3935_v1  ;;  %3706 = vmatpush3.bf16.msra.mxu1 %v3705_v57  ;;  %v3753_v46 = vpack.c.bf16 %v3091_v38, %v3090_v23  ;;  %v3756_v57 = vpack.c.bf16 %v3093_v33, %v3092_v45 }
 0xca4   : > { %3707 = vmatprep.subr.bf16.mxu1 %v3945_v5 }
 0xca7   : > { %3709 = vmatpush3.bf16.msra.mxu1 %v3708_v58 }
 0xca8   : > { %3710 = vmatprep.subr.bf16.mxu1 %v3945_v5 }
 0xcab   : > { %3712 = vmatpush3.bf16.msra.mxu1 %v3711_v60  ;;  %v2995_v60 = vrot.slane %v3316_v25, 1 }
 0xcac   : > { %3713 = vmatprep.subr.bf16.mxu1 %v3945_v5 }
 0xcaf   : > { %3715 = vmatpush3.bf16.msra.mxu1 %v3714_v7  ;;  %v2904_v12 = vpop.f32.mrb[8].mxu0 }
 0xcb0   : > { %3728 = vmatprep.subr.bf16.mxu1 %v3945_v5  ;;  %v3586_v31 = vpop.f32.mrb[9].mxu0 }
 0xd75   : > { %v2725_v9 = vpop.f32.mrb[4].mxu1 }
 0xd76   : > { %v3315_v10 = vmul.f32 -1.442695, %v2725_v9  ;;  %v3548_v11 = vpop.f32.mrb[5].mxu1  ;;  %v3762_v9 = vpack.c.bf16 %v3097_v39, %v3096_v18 }
 0xd78   : > { %3832 = vpow2.f32 %v3315_v10  ;;  %v3015_v10 = vld [vmem:[%s5226_s10] sm:$0x1] }
 0xd82   : > { %v3833_v51 = vpop.eup %3832 }
 0xd83   : > { %v2732_v22 = vadd.f32 1.0, %v3833_v51 }
 0xd85   : > { %3834 = vrcp.f32 %v2732_v22 }
 0xd8f   : > { %v3835_v53 = vpop.eup %3834 }
 0xd90   : > { %v2735_v37 = vmul.f32 %v3835_v53, %v2566_v6  ;;  %v3750_v6 = vpack.c.bf16 %v3014_v54, %v3013_v27 }
 0xd92   : > { %2741 = vst.msk [vmem:[#allocation2 + $0x1] sm:$0x1] %vm983_vm4, %v2735_v37  ;;  %v3098_v37 = vld [vmem:[%s5228_s12] sm:$0x1] }
 0xd99   : > { %v2752_v17 = vld [vmem:[#allocation2 + $0x1] sm:$0x1] }
 0xd9a   : > { %3566 = vmatmul.mubr.msk.f32.vlgmr.msra.gmra.mrb[6].mxu1 %vm985_vm7, %v2752_v17 }
 0xd9b   : > { %3730 = vmatpush3.bf16.msra.mxu1 %v3729_v16  ;;  %3603 = vmatprep.mubr.msk.f32.mxu1 %vm3946_vm12, %v3935_v1 }
 0xd9c   : > { %3731 = vmatprep.subr.bf16.mxu1 %v3945_v5 }
 0xd9f   : > { %3733 = vmatpush3.bf16.msra.mxu1 %v3732_v3 }
 0xda0   : > { %3734 = vmatprep.subr.bf16.mxu1 %v3945_v5 }
 0xda3   : > { %3736 = vmatpush3.bf16.msra.mxu1 %v3735_v13 }
 0xda4   : > { %3737 = vmatprep.subr.bf16.mxu1 %v3945_v5 }
 0xda7   : > { %3739 = vmatpush3.bf16.msra.mxu1 %v3738_v29 }
 0xda8   : > { %3752 = vmatprep.subr.bf16.mxu1 %v3945_v5 }
 0xdaa   : > { %3604 = vmatmul.mubr.msk.f32.vlgmr.msra.gmra.mrb[8].mxu1 %vm985_vm7, %v2908_v30 }
 0xdab   : > { %3641 = vmatprep.mubr.msk.f32.mxu1 %vm3946_vm12, %v3935_v1  ;;  %v3010_v1 = vld [vmem:[%s5225_s9 + $0x18] sm:$0xff]  ;;  %3754 = vmatpush3.bf16.msra.mxu1 %v3753_v46 }
 0xdac   : > { %v3744_v42 = vpack.c.bf16 %v3010_v1, %v3009_v36  ;;  %3755 = vmatprep.subr.bf16.mxu1 %v3945_v5 }
 0xdae   : > { %3745 = vmatpush3.bf16.msra.mxu0 %v3744_v42 }
 0xdaf   : > { %3746 = vmatprep.subr.bf16.mxu0 %v3945_v5  ;;  %3757 = vmatpush3.bf16.msra.mxu1 %v3756_v57 }
 0xdb0   : > { %3758 = vmatprep.subr.bf16.mxu1 %v3945_v5 }
 0xdb2   : > { %3748 = vmatpush3.bf16.msra.mxu0 %v3747_v63 }
 0xdb3   : > { %3749 = vmatprep.subr.bf16.mxu0 %v3945_v5  ;;  %3760 = vmatpush3.bf16.msra.mxu1 %v3759_v52 }
 0xdb4   : > { %3761 = vmatprep.subr.bf16.mxu1 %v3945_v5 }
 0xdb6   : > { %3751 = vmatpush3.bf16.msra.mxu0 %v3750_v6 }
 0xdb7   : > { %3763 = vmatpush3.bf16.msra.mxu1 %v3762_v9 }
 0xe6d   : > { %v2831_v55 = vpop.f32.mrb[6].mxu1 }
 0xe6e   : > { %v2905_v56 = vadd.f32 %v2904_v12, %v2831_v55  ;;  %v3567_v58 = vpop.f32.mrb[7].mxu1 }
 0xe7d   : > { %v2987_v21 = vpop.f32.mrb[8].mxu1 }
 0xe7e   : > { %v2991_v59 = vadd.f32 %v2987_v21, %v2905_v56  ;;  %v3605_v40 = vpop.f32.mrb[9].mxu1 }
 0xe80   : > { %v2992_v49 = vadd.f32 %v3316_v25, %v2991_v59 }
 0xe82   : > { %v2993_v61 = vmax.f32 %v2992_v49, 0.0 }
 0xe84   : > { %v2997_v26 = vmul.f32 %v2995_v60, %v2993_v61 }
 0xe86   : > { %v3000_v5 = vadd.f32 %v2998_v62, %v2997_v26 }
 0xe88   : > { %v3002_v15 = vmul.f32 %v3001_v47, %v3000_v5 }
 0xe8a   : > { %v3005_v41 = vadd.f32 %v3004_v44, %v3002_v15 }
 0xe8c   : > { %v3006_v7 = vmax.f32 %v3005_v41, 0.0 }
 0xe8e   : > { %3623 = vmatmul.mubr.msk.f32.vlgmr.msra.gmra.mrb[10].mxu0 %vm985_vm7, %v3006_v7 }
 0xf61   : > { %v3085_v11 = vpop.f32.mrb[10].mxu0 }
 0xf62   : > { %v3086_v51 = vadd.f32 %v3085_v11, %v3015_v10  ;;  %v3624_v22 = vpop.f32.mrb[11].mxu0 }
 0xf64   : > { %v3089_v53 = vmax.f32 %v3086_v51, 0.0 }
 0xf66   : > { %3642 = vmatmul.mubr.msk.f32.vlgmr.msra.gmra.mrb[10].mxu1 %vm985_vm7, %v3089_v53 }
0x1039   : > { %v3168_v2 = vpop.f32.mrb[10].mxu1 }
0x103a   : > { %v3169_v14 = vadd.f32 %v3168_v2, %v3098_v37  ;;  %v3643_v16 = vpop.f32.mrb[11].mxu1 }
0x103c   : > { %3173 = vst.msk [vmem:[%s447_s15] sm:$0x1] %vm3172_vm0, %v3169_v14 }
0x103d   : > { %3877 = shalt.err (!%p3874_p7)
}
0x103e   : > { %s3878_s21 = scalar_lea.hbm %s5174_s6, 16  ;;  %s3882_s30 = scalar_lea.hbm %s5229_s13, 32 }
0x103f   : > { %p3879_p8 = scmp.ne.s32.totalorder %s5174_s6, %s3878_s21  ;;  %p3883_p1 = scmp.lt.u32.totalorder %s5174_s6, %s5229_s13 }
0x1040   : > { %p3884_p0 = scmp.lt.u32.totalorder %s3882_s30, %s3878_s21  ;;  %p3886_p6 = scmp.lt.u32.totalorder %s3878_s21, %s5174_s6 }
0x1041   : > { %p3880_p11 = pnand %p3879_p8, %p5276_p9 }
0x1042   : > { %p3885_p5 = por %p3884_p0, %p3883_p1 }
0x1043   : > { %p3881_p13 = pneg %p3880_p11 }
0x1044   : > { %p3887_p10 = por %p3886_p6, %p3885_p5 }
0x1046   : > { %p3888_p12 = pnand %p3887_p10, %p3881_p13 }
0x1048   : > { %3891 = shalt.err (!%p3888_p12)
}
0x1049   : > { %3768 = dma.vmem_to_hbm [thread:$0]  (%p5276_p9), %s5176_s23, 16, %s5174_s6, %s3175_s19  }
0x104a PF: > { %s5277_s20 = sld [smem:[#allocation12_spill]]  ;;  %p3780_p2 = scmp.ge.s32.totalorder %s3930_s28, 2 }
0x104b   : > { %s3199_s0 = sand.u32 1, %s3918_s25  }
0x104c   : > { %s3200_s17 = scalar_lea.sflag [#allocation5], %s3199_s0 }
0x1050   : > { %p5278_p3 = scmp.ne.s32.totalorder %s5277_s20, 0 }
0x1052   : > { %p3775_p4 = pnand %p3780_p2, %p5278_p3 }
0x1054   : > { %3913 = dma.done.wait (!%p3775_p4), %s3200_s17, 16  }
0x1055   : > { %3915 = vsyncadd (!%p3775_p4), %s3200_s17, 4294967280  ;;  %s5279_s28 = sld [smem:[#allocation10_spill]]  ;;  %s5280_s29 = sld [smem:[#allocation9_spill]] }
0x1056   : > { %s5281_s27 = sld [smem:[#allocation11_spill]]  ;;  %s5282_s25 = smov %s3922_s26 }
0x105b   : > { %p24_p7 = scmp.ge.s32.totalorder %s5279_s28, 4   ;;  %s5283_s26 = smov %s5280_s29 }
0x105d   :  { %26 = sbr.rel (!%p24_p7) target bundleno = 7 (0x7), region = 128 }
0x1064   :  { %3204 = vsyncpa [#allocation4], 1 }
0x1065   :  { %3206 = vsyncpa [#allocation4 + $0x1], 1 }
0x1066   :  { %3207 = vsyncpa [#allocation5], 1 }
0x1067   :  { %3209 = vsyncpa [#allocation5 + $0x1], 1 }

</bundles_post_ra>
